<compile_context>
chip_gen: v6e
topology: v6e:2x2x1
jax: 0.10.0
libtpu: 0.0.40
codegen_flags: <defaults>
</compile_context>

<pallas_src>
import numpy as np
import jax
import jax.numpy as jnp
from jax import lax
from jax.experimental import pallas as pl
from jax.experimental.pallas import tpu as pltpu

LN_EPS = 1e-5   # nn.LayerNorm default
GN_EPS = 1e-8   # GroupNorm eps used in the module

# rows of the packed affine table, in order
_AFFINE_NAMES = ("ln_g", "ln_b",
                 "r1_g1", "r1_b1", "r1_g2", "r1_b2",
                 "r2_g1", "r2_b1", "r2_g2", "r2_b2",
                 "r3_g1", "r3_b1", "r3_g2", "r3_b2")
_WEIGHT_NAMES = ("w_bn", "r1_w1", "r1_w2", "r2_w1", "r2_w2", "r2_wds",
                 "r3_w1", "r3_w2", "w_final")


# ---------------------------------------------------------------------------
# Pallas kernel: one grid step == NB batch samples
# ---------------------------------------------------------------------------
def speaker_encoder_kernel(
    x_ref, w_bn, r1_w1, r1_w2, r2_w1, r2_w2, r2_wds, r3_w1, r3_w2, w_final,
    affine_ref, p1_ref, p2_ref, p3_ref, prelu_ref,
    out_ref, avg_ref,
):
    nb = x_ref.shape[0]

    def affine(row, c):
        # [1, 1, c] slice of the packed [14, Cmax] affine table
        return affine_ref[row:row + 1, 0:c][None]

    def conv1x1(h, w_ref):
        # 1x1 Conv1d == batched [T, Cin] @ [Cin, Cout] matmul
        w = w_ref[...]
        wb = jnp.broadcast_to(w[None], (nb,) + w.shape)
        return jnp.einsum("ntc,ncd->ntd", h, wb,
                          preferred_element_type=jnp.float32)

    def avg_pool3(h, p_ref):
        # AvgPool1d(3) along time via a precomputed [T//3, T] pooling matrix
        p = p_ref[...]
        pb = jnp.broadcast_to(p[None], (nb,) + p.shape)
        return jnp.einsum("npt,ntc->npc", pb, h,
                          preferred_element_type=jnp.float32)

    def layer_norm_c(h, g, b):
        # ChannelWiseLayerNorm: normalize each time step over channels
        mu = jnp.mean(h, axis=-1, keepdims=True)
        xc = h - mu
        var = jnp.mean(xc * xc, axis=-1, keepdims=True)
        return xc * lax.rsqrt(var + LN_EPS) * g + b

    def group_norm1(h, g, b):
        # GroupNorm(1, C): per-sample normalization over all (T, C) elements
        inv = 1.0 / float(h.shape[1] * h.shape[2])
        mu = jnp.sum(jnp.sum(h, axis=2, keepdims=True), axis=1,
                     keepdims=True) * inv
        xc = h - mu
        var = jnp.sum(jnp.sum(xc * xc, axis=2, keepdims=True), axis=1,
                      keepdims=True) * inv
        return xc * lax.rsqrt(var + GN_EPS) * g + b

    def prelu(h, a):
        return jnp.where(h >= 0, h, a * h)

    def res_block(h, w1, w2, row0, a1, a2, p_ref, wds=None):
        c_out = w1.shape[-1]
        res = h
        y = conv1x1(h, w1)                                        # conv1
        y = group_norm1(y, affine(row0, c_out), affine(row0 + 1, c_out))
        y = prelu(y, a1)
        y = conv1x1(y, w2)                                        # conv2
        y = group_norm1(y, affine(row0 + 2, c_out), affine(row0 + 3, c_out))
        if wds is not None:                                       # downsample
            res = conv1x1(res, wds)
        y = prelu(y + res, a2)
        return avg_pool3(y, p_ref)                                # AvgPool1d(3)

    b_dim = w_bn.shape[0]
    x = x_ref[...]                                                # [NB, T, B]
    x = layer_norm_c(x, affine(0, b_dim), affine(1, b_dim))
    x = conv1x1(x, w_bn)                                          # bottleneck
    x = res_block(x, r1_w1, r1_w2, 2, prelu_ref[0], prelu_ref[1], p1_ref)
    x = res_block(x, r2_w1, r2_w2, 6, prelu_ref[2], prelu_ref[3], p2_ref,
                  wds=r2_wds)
    x = res_block(x, r3_w1, r3_w2, 10, prelu_ref[4], prelu_ref[5], p3_ref)
    # nn.Dropout(0.9): identity at inference.
    # TODO(synk): training-mode dropout (p=0.9) not implemented.
    x = conv1x1(x, w_final)                                       # [NB, T3, B]
    out_ref[...] = x
    avg_ref[...] = jnp.mean(x, axis=1, keepdims=True)             # AdaptiveAvgPool1d(1)


# ---------------------------------------------------------------------------
# wrapper
# ---------------------------------------------------------------------------
def _pool_matrix(t):
    # [t//3, t] averaging matrix for AvgPool1d(kernel=3, stride=3) (floors t)
    t_out = t // 3
    rows = np.arange(t_out)[:, None]
    cols = np.arange(t)[None, :]
    m = ((cols >= 3 * rows) & (cols < 3 * rows + 3)).astype(np.float32) / 3.0
    return jnp.asarray(m)


def speaker_encoder_forward(x_nct, params, samples_per_step=8):
    n, b_dim, t = x_nct.shape
    h_dim = params["r2_w1"].shape[1]
    cmax = max(b_dim, h_dim)
    t1 = t // 3
    t2 = t1 // 3
    t3 = t2 // 3
    assert t3 >= 1, "need T >= 27 (three AvgPool1d(3) stages)"

    nb = max(1, min(n, samples_per_step))
    n_pad = -(-n // nb) * nb

    # NOTE: for very long T, keep data channels-last upstream to avoid this
    # extra HBM round-trip; negligible at demo sizes.
    x_ntc = jnp.transpose(x_nct, (0, 2, 1)).astype(jnp.float32)   # [N, T, B]
    if n_pad != n:
        x_ntc = jnp.pad(x_ntc, ((0, n_pad - n), (0, 0), (0, 0)))

    # pack the 14 [1, C] norm-affine vectors into one [14, Cmax] table
    affine = jnp.concatenate(
        [jnp.pad(params[k].astype(jnp.float32),
                 ((0, 0), (0, cmax - params[k].shape[1])))
         for k in _AFFINE_NAMES], axis=0)

    p1, p2, p3 = _pool_matrix(t), _pool_matrix(t1), _pool_matrix(t2)

    const2 = lambda i: (0, 0)
    in_specs = [pl.BlockSpec((nb, t, b_dim), lambda i: (i, 0, 0))]
    args = [x_ntc]
    for name in _WEIGHT_NAMES:
        w = params[name].astype(jnp.float32)
        in_specs.append(pl.BlockSpec(w.shape, const2))
        args.append(w)
    for arr in (affine, p1, p2, p3):
        in_specs.append(pl.BlockSpec(arr.shape, const2))
        args.append(arr)
    # PReLU scalars live in SMEM
    in_specs.append(pl.BlockSpec(memory_space=pltpu.MemorySpace.SMEM))
    args.append(params["prelu"].astype(jnp.float32))

    out_shape = (
        jax.ShapeDtypeStruct((n_pad, t3, b_dim), jnp.float32),
        jax.ShapeDtypeStruct((n_pad, 1, b_dim), jnp.float32),
    )
    out_specs = (
        pl.BlockSpec((nb, t3, b_dim), lambda i: (i, 0, 0)),
        pl.BlockSpec((nb, 1, b_dim), lambda i: (i, 0, 0)),
    )

    out_ntc, avg = pl.pallas_call(
        speaker_encoder_kernel,
        out_shape=out_shape,
        grid_spec=pltpu.PrefetchScalarGridSpec(
            num_scalar_prefetch=0,
            grid=(n_pad // nb,),
            in_specs=in_specs,
            out_specs=out_specs,
        ),
        compiler_params=pltpu.CompilerParams(
            dimension_semantics=("parallel",)),
    )(*args)

    out_ntc = out_ntc[:n]
    avg = avg[:n]
    # back to PyTorch NCT convention; (x, x_avg.squeeze(2))
    return jnp.transpose(out_ntc, (0, 2, 1)), avg[:, 0, :]


# ---------------------------------------------------------------------------
# deterministic parameter init (norm affines at PyTorch defaults, PReLU=0.25)
# ---------------------------------------------------------------------------
def init_params(key, B, H):
    ks = jax.random.split(key, 9)

    def conv_w(k, cin, cout):
        # mimic Conv1d kaiming-uniform bound 1/sqrt(cin); stored as [Cin, Cout]
        bound = 1.0 / float(cin) ** 0.5
        return jax.random.uniform(k, (cin, cout), jnp.float32, -bound, bound)

    ones = lambda c: jnp.ones((1, c), jnp.float32)
    zeros = lambda c: jnp.zeros((1, c), jnp.float32)

    return {
        "ln_g": ones(B), "ln_b": zeros(B),
        "w_bn": conv_w(ks[0], B, B),
        "r1_w1": conv_w(ks[1], B, B), "r1_w2": conv_w(ks[2], B, B),
        "r1_g1": ones(B), "r1_b1": zeros(B), "r1_g2": ones(B), "r1_b2": zeros(B),
        "r2_w1": conv_w(ks[3], B, H), "r2_w2": conv_w(ks[4], H, H),
        "r2_wds": conv_w(ks[5], B, H),
        "r2_g1": ones(H), "r2_b1": zeros(H), "r2_g2": ones(H), "r2_b2": zeros(H),
        "r3_w1": conv_w(ks[6], H, H), "r3_w2": conv_w(ks[7], H, H),
        "r3_g1": ones(H), "r3_b1": zeros(H), "r3_g2": ones(H), "r3_b2": zeros(H),
        "w_final": conv_w(ks[8], H, B),
        "prelu": jnp.full((6,), 0.25, jnp.float32),   # PReLU default init
    }


# ---------------------------------------------------------------------------
# pure-JAX reference (same semantics) for a correctness check
# ---------------------------------------------------------------------------
def reference_forward(x_nct, params):
    x = jnp.transpose(x_nct, (0, 2, 1)).astype(jnp.float32)       # [N, T, C]
    mu = x.mean(-1, keepdims=True)
    var = ((x - mu) ** 2).mean(-1, keepdims=True)
    x = (x - mu) / jnp.sqrt(var + LN_EPS) * params["ln_g"][0] + params["ln_b"][0]
    x = x @ params["w_bn"]

    def gn(h, g, b):
        m = h.mean((1, 2), keepdims=True)
        v = ((h - m) ** 2).mean((1, 2), keepdims=True)
        return (h - m) / jnp.sqrt(v + GN_EPS) * g[0] + b[0]

    def prelu(h, a):
        return jnp.where(h >= 0, h, a * h)

    def pool(h):
        t = h.shape[1]
        t3 = t // 3
        return h[:, : t3 * 3].reshape(h.shape[0], t3, 3, h.shape[2]).mean(2)

    def rb(h, w1, w2, g1, b1, g2, b2, a1, a2, wds=None):
        res = h
        y = prelu(gn(h @ w1, g1, b1), a1)
        y = gn(y @ w2, g2, b2)
        if wds is not None:
            res = res @ wds
        return pool(prelu(y + res, a2))

    p = params["prelu"]
    x = rb(x, params["r1_w1"], params["r1_w2"], params["r1_g1"], params["r1_b1"],
           params["r1_g2"], params["r1_b2"], p[0], p[1])
    x = rb(x, params["r2_w1"], params["r2_w2"], params["r2_g1"], params["r2_b1"],
           params["r2_g2"], params["r2_b2"], p[2], p[3], wds=params["r2_wds"])
    x = rb(x, params["r3_w1"], params["r3_w2"], params["r3_g1"], params["r3_b1"],
           params["r3_g2"], params["r3_b2"], p[4], p[5])
    x = x @ params["w_final"]
    return jnp.transpose(x, (0, 2, 1)), x.mean(1)


if __name__ == "__main__":
    N, B, H, T = 2, 32, 64, 81                     # T -> 27 -> 9 -> 3
    key = jax.random.PRNGKey(0)
    kx, kp = jax.random.split(key)
    x = jax.random.normal(kx, (N, B, T), jnp.float32)
    params = init_params(kp, B, H)

    out, avg = speaker_encoder_forward(x, params)
    jax.block_until_ready((out, avg))

    ref_out, ref_avg = reference_forward(x, params)
    assert out.shape == (N, B, T // 27) and avg.shape == (N, B)
    assert jnp.allclose(out, ref_out, atol=1e-4, rtol=1e-4)
    assert jnp.allclose(avg, ref_avg, atol=1e-4, rtol=1e-4)
    print("KERNEL_OK")
</pallas_src>

<mosaic_0001>
module attributes {stable_mosaic.version = 11 : i64} {
  func.func @speaker_encoder_kernel(%arg0: i32, %arg1: memref<2x81x32xf32, #tpu.memory_space<vmem>>, %arg2: memref<32x32xf32, #tpu.memory_space<vmem>>, %arg3: memref<32x32xf32, #tpu.memory_space<vmem>>, %arg4: memref<32x32xf32, #tpu.memory_space<vmem>>, %arg5: memref<32x64xf32, #tpu.memory_space<vmem>>, %arg6: memref<64x64xf32, #tpu.memory_space<vmem>>, %arg7: memref<32x64xf32, #tpu.memory_space<vmem>>, %arg8: memref<64x64xf32, #tpu.memory_space<vmem>>, %arg9: memref<64x64xf32, #tpu.memory_space<vmem>>, %arg10: memref<64x32xf32, #tpu.memory_space<vmem>>, %arg11: memref<14x64xf32, #tpu.memory_space<vmem>>, %arg12: memref<27x81xf32, #tpu.memory_space<vmem>>, %arg13: memref<9x27xf32, #tpu.memory_space<vmem>>, %arg14: memref<3x9xf32, #tpu.memory_space<vmem>>, %arg15: memref<6xf32, #tpu.memory_space<smem>>, %arg16: memref<2x3x32xf32, #tpu.memory_space<vmem>>, %arg17: memref<2x1x32xf32, #tpu.memory_space<vmem>>) attributes {dimension_semantics = [#tpu.dimension_semantics<parallel>], iteration_bounds = array<i64: 1>, scalar_prefetch = 0 : i64, scratch_operands = 0 : i64, tpu.core_type = #tpu.core_type<tc>, window_params = [{transform_indices = @transform_0, window_bounds = array<i64: 2, 81, 32>}, {pipeline_mode = #tpu.pipeline_mode<synchronous>, transform_indices = @transform_1, window_bounds = array<i64: 32, 32>}, {pipeline_mode = #tpu.pipeline_mode<synchronous>, transform_indices = @transform_2, window_bounds = array<i64: 32, 32>}, {pipeline_mode = #tpu.pipeline_mode<synchronous>, transform_indices = @transform_3, window_bounds = array<i64: 32, 32>}, {pipeline_mode = #tpu.pipeline_mode<synchronous>, transform_indices = @transform_4, window_bounds = array<i64: 32, 64>}, {pipeline_mode = #tpu.pipeline_mode<synchronous>, transform_indices = @transform_5, window_bounds = array<i64: 64, 64>}, {pipeline_mode = #tpu.pipeline_mode<synchronous>, transform_indices = @transform_6, window_bounds = array<i64: 32, 64>}, {pipeline_mode = #tpu.pipeline_mode<synchronous>, transform_indices = @transform_7, window_bounds = array<i64: 64, 64>}, {pipeline_mode = #tpu.pipeline_mode<synchronous>, transform_indices = @transform_8, window_bounds = array<i64: 64, 64>}, {pipeline_mode = #tpu.pipeline_mode<synchronous>, transform_indices = @transform_9, window_bounds = array<i64: 64, 32>}, {pipeline_mode = #tpu.pipeline_mode<synchronous>, transform_indices = @transform_10, window_bounds = array<i64: 14, 64>}, {pipeline_mode = #tpu.pipeline_mode<synchronous>, transform_indices = @transform_11, window_bounds = array<i64: 27, 81>}, {pipeline_mode = #tpu.pipeline_mode<synchronous>, transform_indices = @transform_12, window_bounds = array<i64: 9, 27>}, {pipeline_mode = #tpu.pipeline_mode<synchronous>, transform_indices = @transform_13, window_bounds = array<i64: 3, 9>}, {transform_indices = @transform_14, window_bounds = array<i64: 6>}, {transform_indices = @transform_15, window_bounds = array<i64: 2, 3, 32>}, {transform_indices = @transform_16, window_bounds = array<i64: 2, 1, 32>}]} {
    %c0 = arith.constant 0 : index
    %c0_0 = arith.constant 0 : index
    %c0_1 = arith.constant 0 : index
    %0 = vector.load %arg1[%c0, %c0_0, %c0_1] : memref<2x81x32xf32, #tpu.memory_space<vmem>>, vector<2x81x32xf32>
    %c0_2 = arith.constant 0 : index
    %c0_3 = arith.constant 0 : index
    %1 = vector.load %arg11[%c0_2, %c0_3] : memref<14x64xf32, #tpu.memory_space<vmem>>, vector<1x32xf32>
    %2 = vector.shape_cast %1 : vector<1x32xf32> to vector<1x1x32xf32>
    %c1 = arith.constant 1 : index
    %c0_4 = arith.constant 0 : index
    %3 = vector.load %arg11[%c1, %c0_4] : memref<14x64xf32, #tpu.memory_space<vmem>>, vector<1x32xf32>
    %4 = vector.shape_cast %3 : vector<1x32xf32> to vector<1x1x32xf32>
    %cst = arith.constant dense<0.000000e+00> : vector<2x81xf32>
    %5 = vector.multi_reduction <add>, %0, %cst [2] : vector<2x81x32xf32> to vector<2x81xf32>
    %6 = vector.shape_cast %5 : vector<2x81xf32> to vector<2x81x1xf32>
    %cst_5 = arith.constant 3.200000e+01 : f32
    %7 = vector.broadcast %cst_5 : f32 to vector<2x81x1xf32>
    %8 = arith.divf %6, %7 : vector<2x81x1xf32>
    %9 = vector.broadcast %8 : vector<2x81x1xf32> to vector<2x81x32xf32>
    %10 = arith.subf %0, %9 : vector<2x81x32xf32>
    %11 = arith.mulf %10, %10 : vector<2x81x32xf32>
    %cst_6 = arith.constant dense<0.000000e+00> : vector<2x81xf32>
    %12 = vector.multi_reduction <add>, %11, %cst_6 [2] : vector<2x81x32xf32> to vector<2x81xf32>
    %13 = vector.shape_cast %12 : vector<2x81xf32> to vector<2x81x1xf32>
    %cst_7 = arith.constant 3.200000e+01 : f32
    %14 = vector.broadcast %cst_7 : f32 to vector<2x81x1xf32>
    %15 = arith.divf %13, %14 : vector<2x81x1xf32>
    %cst_8 = arith.constant 9.99999974E-6 : f32
    %16 = vector.broadcast %cst_8 : f32 to vector<2x81x1xf32>
    %17 = arith.addf %15, %16 : vector<2x81x1xf32>
    %18 = math.rsqrt %17 : vector<2x81x1xf32>
    %19 = vector.broadcast %18 : vector<2x81x1xf32> to vector<2x81x32xf32>
    %20 = arith.mulf %10, %19 : vector<2x81x32xf32>
    %21 = vector.broadcast %2 : vector<1x1x32xf32> to vector<2x81x32xf32>
    %22 = arith.mulf %20, %21 : vector<2x81x32xf32>
    %23 = vector.broadcast %4 : vector<1x1x32xf32> to vector<2x81x32xf32>
    %24 = arith.addf %22, %23 : vector<2x81x32xf32>
    %c0_9 = arith.constant 0 : index
    %c0_10 = arith.constant 0 : index
    %25 = vector.load %arg2[%c0_9, %c0_10] : memref<32x32xf32, #tpu.memory_space<vmem>>, vector<32x32xf32>
    %26 = vector.shape_cast %25 : vector<32x32xf32> to vector<1x32x32xf32>
    %27 = vector.shape_cast %26 : vector<1x32x32xf32> to vector<1x32x32xf32>
    %28 = vector.broadcast %27 : vector<1x32x32xf32> to vector<2x32x32xf32>
    "tpu.trace_start"() <{level = 10 : i32, message = "ntc,ncd->ntd"}> : () -> ()
    %cst_11 = arith.constant dense<0.000000e+00> : vector<2x81x32xf32>
    %29 = tpu.matmul %24, %28, %cst_11 {dimension_numbers = #tpu.dot_dimension_numbers<[2], [1], [1], [2], [0, 0, 0, 1, 1, 2], [0], [0]>} : vector<2x81x32xf32>, vector<2x32x32xf32>, vector<2x81x32xf32> -> vector<2x81x32xf32>
    "tpu.trace_stop"() : () -> ()
    %c0_12 = arith.constant 0 : index
    %30 = memref.load %arg15[%c0_12] : memref<6xf32, #tpu.memory_space<smem>>
    %c1_13 = arith.constant 1 : index
    %31 = memref.load %arg15[%c1_13] : memref<6xf32, #tpu.memory_space<smem>>
    %c0_14 = arith.constant 0 : index
    %c0_15 = arith.constant 0 : index
    %32 = vector.load %arg3[%c0_14, %c0_15] : memref<32x32xf32, #tpu.memory_space<vmem>>, vector<32x32xf32>
    %33 = vector.shape_cast %32 : vector<32x32xf32> to vector<1x32x32xf32>
    %34 = vector.shape_cast %33 : vector<1x32x32xf32> to vector<1x32x32xf32>
    %35 = vector.broadcast %34 : vector<1x32x32xf32> to vector<2x32x32xf32>
    "tpu.trace_start"() <{level = 10 : i32, message = "ntc,ncd->ntd"}> : () -> ()
    %cst_16 = arith.constant dense<0.000000e+00> : vector<2x81x32xf32>
    %36 = tpu.matmul %29, %35, %cst_16 {dimension_numbers = #tpu.dot_dimension_numbers<[2], [1], [1], [2], [0, 0, 0, 1, 1, 2], [0], [0]>} : vector<2x81x32xf32>, vector<2x32x32xf32>, vector<2x81x32xf32> -> vector<2x81x32xf32>
    "tpu.trace_stop"() : () -> ()
    %c2 = arith.constant 2 : index
    %c0_17 = arith.constant 0 : index
    %37 = vector.load %arg11[%c2, %c0_17] : memref<14x64xf32, #tpu.memory_space<vmem>>, vector<1x32xf32>
    %38 = vector.shape_cast %37 : vector<1x32xf32> to vector<1x1x32xf32>
    %c3 = arith.constant 3 : index
    %c0_18 = arith.constant 0 : index
    %39 = vector.load %arg11[%c3, %c0_18] : memref<14x64xf32, #tpu.memory_space<vmem>>, vector<1x32xf32>
    %40 = vector.shape_cast %39 : vector<1x32xf32> to vector<1x1x32xf32>
    %cst_19 = arith.constant dense<0.000000e+00> : vector<2x81xf32>
    %41 = vector.multi_reduction <add>, %36, %cst_19 [2] : vector<2x81x32xf32> to vector<2x81xf32>
    %42 = vector.shape_cast %41 : vector<2x81xf32> to vector<2x81x1xf32>
    %cst_20 = arith.constant dense<0.000000e+00> : vector<2x1xf32>
    %43 = vector.multi_reduction <add>, %42, %cst_20 [1] : vector<2x81x1xf32> to vector<2x1xf32>
    %44 = vector.shape_cast %43 : vector<2x1xf32> to vector<2x1x1xf32>
    %cst_21 = arith.constant 3.85802472E-4 : f32
    %45 = vector.broadcast %cst_21 : f32 to vector<2x1x1xf32>
    %46 = arith.mulf %44, %45 : vector<2x1x1xf32>
    %47 = vector.broadcast %46 : vector<2x1x1xf32> to vector<2x81x32xf32>
    %48 = arith.subf %36, %47 : vector<2x81x32xf32>
    %49 = arith.mulf %48, %48 : vector<2x81x32xf32>
    %cst_22 = arith.constant dense<0.000000e+00> : vector<2x81xf32>
    %50 = vector.multi_reduction <add>, %49, %cst_22 [2] : vector<2x81x32xf32> to vector<2x81xf32>
    %51 = vector.shape_cast %50 : vector<2x81xf32> to vector<2x81x1xf32>
    %cst_23 = arith.constant dense<0.000000e+00> : vector<2x1xf32>
    %52 = vector.multi_reduction <add>, %51, %cst_23 [1] : vector<2x81x1xf32> to vector<2x1xf32>
    %53 = vector.shape_cast %52 : vector<2x1xf32> to vector<2x1x1xf32>
    %cst_24 = arith.constant 3.85802472E-4 : f32
    %54 = vector.broadcast %cst_24 : f32 to vector<2x1x1xf32>
    %55 = arith.mulf %53, %54 : vector<2x1x1xf32>
    %cst_25 = arith.constant 9.99999993E-9 : f32
    %56 = vector.broadcast %cst_25 : f32 to vector<2x1x1xf32>
    %57 = arith.addf %55, %56 : vector<2x1x1xf32>
    %58 = math.rsqrt %57 : vector<2x1x1xf32>
    %59 = vector.broadcast %58 : vector<2x1x1xf32> to vector<2x81x32xf32>
    %60 = arith.mulf %48, %59 : vector<2x81x32xf32>
    %61 = vector.broadcast %38 : vector<1x1x32xf32> to vector<2x81x32xf32>
    %62 = arith.mulf %60, %61 : vector<2x81x32xf32>
    %63 = vector.broadcast %40 : vector<1x1x32xf32> to vector<2x81x32xf32>
    %64 = arith.addf %62, %63 : vector<2x81x32xf32>
    %cst_26 = arith.constant 0.000000e+00 : f32
    %65 = vector.broadcast %cst_26 : f32 to vector<2x81x32xf32>
    %66 = arith.cmpf oge, %64, %65 : vector<2x81x32xf32>
    %67 = vector.broadcast %30 : f32 to vector<2x81x32xf32>
    %68 = arith.mulf %67, %64 : vector<2x81x32xf32>
    %69 = arith.select %66, %64, %68 : vector<2x81x32xi1>, vector<2x81x32xf32>
    %c0_27 = arith.constant 0 : index
    %c0_28 = arith.constant 0 : index
    %70 = vector.load %arg4[%c0_27, %c0_28] : memref<32x32xf32, #tpu.memory_space<vmem>>, vector<32x32xf32>
    %71 = vector.shape_cast %70 : vector<32x32xf32> to vector<1x32x32xf32>
    %72 = vector.shape_cast %71 : vector<1x32x32xf32> to vector<1x32x32xf32>
    %73 = vector.broadcast %72 : vector<1x32x32xf32> to vector<2x32x32xf32>
    "tpu.trace_start"() <{level = 10 : i32, message = "ntc,ncd->ntd"}> : () -> ()
    %cst_29 = arith.constant dense<0.000000e+00> : vector<2x81x32xf32>
    %74 = tpu.matmul %69, %73, %cst_29 {dimension_numbers = #tpu.dot_dimension_numbers<[2], [1], [1], [2], [0, 0, 0, 1, 1, 2], [0], [0]>} : vector<2x81x32xf32>, vector<2x32x32xf32>, vector<2x81x32xf32> -> vector<2x81x32xf32>
    "tpu.trace_stop"() : () -> ()
    %c4 = arith.constant 4 : index
    %c0_30 = arith.constant 0 : index
    %75 = vector.load %arg11[%c4, %c0_30] : memref<14x64xf32, #tpu.memory_space<vmem>>, vector<1x32xf32>
    %76 = vector.shape_cast %75 : vector<1x32xf32> to vector<1x1x32xf32>
    %c5 = arith.constant 5 : index
    %c0_31 = arith.constant 0 : index
    %77 = vector.load %arg11[%c5, %c0_31] : memref<14x64xf32, #tpu.memory_space<vmem>>, vector<1x32xf32>
    %78 = vector.shape_cast %77 : vector<1x32xf32> to vector<1x1x32xf32>
    %cst_32 = arith.constant dense<0.000000e+00> : vector<2x81xf32>
    %79 = vector.multi_reduction <add>, %74, %cst_32 [2] : vector<2x81x32xf32> to vector<2x81xf32>
    %80 = vector.shape_cast %79 : vector<2x81xf32> to vector<2x81x1xf32>
    %cst_33 = arith.constant dense<0.000000e+00> : vector<2x1xf32>
    %81 = vector.multi_reduction <add>, %80, %cst_33 [1] : vector<2x81x1xf32> to vector<2x1xf32>
    %82 = vector.shape_cast %81 : vector<2x1xf32> to vector<2x1x1xf32>
    %cst_34 = arith.constant 3.85802472E-4 : f32
    %83 = vector.broadcast %cst_34 : f32 to vector<2x1x1xf32>
    %84 = arith.mulf %82, %83 : vector<2x1x1xf32>
    %85 = vector.broadcast %84 : vector<2x1x1xf32> to vector<2x81x32xf32>
    %86 = arith.subf %74, %85 : vector<2x81x32xf32>
    %87 = arith.mulf %86, %86 : vector<2x81x32xf32>
    %cst_35 = arith.constant dense<0.000000e+00> : vector<2x81xf32>
    %88 = vector.multi_reduction <add>, %87, %cst_35 [2] : vector<2x81x32xf32> to vector<2x81xf32>
    %89 = vector.shape_cast %88 : vector<2x81xf32> to vector<2x81x1xf32>
    %cst_36 = arith.constant dense<0.000000e+00> : vector<2x1xf32>
    %90 = vector.multi_reduction <add>, %89, %cst_36 [1] : vector<2x81x1xf32> to vector<2x1xf32>
    %91 = vector.shape_cast %90 : vector<2x1xf32> to vector<2x1x1xf32>
    %cst_37 = arith.constant 3.85802472E-4 : f32
    %92 = vector.broadcast %cst_37 : f32 to vector<2x1x1xf32>
    %93 = arith.mulf %91, %92 : vector<2x1x1xf32>
    %cst_38 = arith.constant 9.99999993E-9 : f32
    %94 = vector.broadcast %cst_38 : f32 to vector<2x1x1xf32>
    %95 = arith.addf %93, %94 : vector<2x1x1xf32>
    %96 = math.rsqrt %95 : vector<2x1x1xf32>
    %97 = vector.broadcast %96 : vector<2x1x1xf32> to vector<2x81x32xf32>
    %98 = arith.mulf %86, %97 : vector<2x81x32xf32>
    %99 = vector.broadcast %76 : vector<1x1x32xf32> to vector<2x81x32xf32>
    %100 = arith.mulf %98, %99 : vector<2x81x32xf32>
    %101 = vector.broadcast %78 : vector<1x1x32xf32> to vector<2x81x32xf32>
    %102 = arith.addf %100, %101 : vector<2x81x32xf32>
    %103 = arith.addf %102, %29 : vector<2x81x32xf32>
    %cst_39 = arith.constant 0.000000e+00 : f32
    %104 = vector.broadcast %cst_39 : f32 to vector<2x81x32xf32>
    %105 = arith.cmpf oge, %103, %104 : vector<2x81x32xf32>
    %106 = vector.broadcast %31 : f32 to vector<2x81x32xf32>
    %107 = arith.mulf %106, %103 : vector<2x81x32xf32>
    %108 = arith.select %105, %103, %107 : vector<2x81x32xi1>, vector<2x81x32xf32>
    %c0_40 = arith.constant 0 : index
    %c0_41 = arith.constant 0 : index
    %109 = vector.load %arg12[%c0_40, %c0_41] : memref<27x81xf32, #tpu.memory_space<vmem>>, vector<27x81xf32>
    %110 = vector.shape_cast %109 : vector<27x81xf32> to vector<1x27x81xf32>
    %111 = vector.shape_cast %110 : vector<1x27x81xf32> to vector<1x27x81xf32>
    %112 = vector.broadcast %111 : vector<1x27x81xf32> to vector<2x27x81xf32>
    "tpu.trace_start"() <{level = 10 : i32, message = "npt,ntc->npc"}> : () -> ()
    %cst_42 = arith.constant dense<0.000000e+00> : vector<2x27x32xf32>
    %113 = tpu.matmul %112, %108, %cst_42 {dimension_numbers = #tpu.dot_dimension_numbers<[2], [1], [1], [2], [0, 0, 0, 1, 1, 2], [0], [0]>} : vector<2x27x81xf32>, vector<2x81x32xf32>, vector<2x27x32xf32> -> vector<2x27x32xf32>
    "tpu.trace_stop"() : () -> ()
    %c2_43 = arith.constant 2 : index
    %114 = memref.load %arg15[%c2_43] : memref<6xf32, #tpu.memory_space<smem>>
    %c3_44 = arith.constant 3 : index
    %115 = memref.load %arg15[%c3_44] : memref<6xf32, #tpu.memory_space<smem>>
    %c0_45 = arith.constant 0 : index
    %c0_46 = arith.constant 0 : index
    %116 = vector.load %arg5[%c0_45, %c0_46] : memref<32x64xf32, #tpu.memory_space<vmem>>, vector<32x64xf32>
    %117 = vector.shape_cast %116 : vector<32x64xf32> to vector<1x32x64xf32>
    %118 = vector.shape_cast %117 : vector<1x32x64xf32> to vector<1x32x64xf32>
    %119 = vector.broadcast %118 : vector<1x32x64xf32> to vector<2x32x64xf32>
    "tpu.trace_start"() <{level = 10 : i32, message = "ntc,ncd->ntd"}> : () -> ()
    %cst_47 = arith.constant dense<0.000000e+00> : vector<2x27x64xf32>
    %120 = tpu.matmul %113, %119, %cst_47 {dimension_numbers = #tpu.dot_dimension_numbers<[2], [1], [1], [2], [0, 0, 0, 1, 1, 2], [0], [0]>} : vector<2x27x32xf32>, vector<2x32x64xf32>, vector<2x27x64xf32> -> vector<2x27x64xf32>
    "tpu.trace_stop"() : () -> ()
    %c6 = arith.constant 6 : index
    %c0_48 = arith.constant 0 : index
    %121 = vector.load %arg11[%c6, %c0_48] : memref<14x64xf32, #tpu.memory_space<vmem>>, vector<1x64xf32>
    %122 = vector.shape_cast %121 : vector<1x64xf32> to vector<1x1x64xf32>
    %c7 = arith.constant 7 : index
    %c0_49 = arith.constant 0 : index
    %123 = vector.load %arg11[%c7, %c0_49] : memref<14x64xf32, #tpu.memory_space<vmem>>, vector<1x64xf32>
    %124 = vector.shape_cast %123 : vector<1x64xf32> to vector<1x1x64xf32>
    %cst_50 = arith.constant dense<0.000000e+00> : vector<2x27xf32>
    %125 = vector.multi_reduction <add>, %120, %cst_50 [2] : vector<2x27x64xf32> to vector<2x27xf32>
    %126 = vector.shape_cast %125 : vector<2x27xf32> to vector<2x27x1xf32>
    %cst_51 = arith.constant dense<0.000000e+00> : vector<2x1xf32>
    %127 = vector.multi_reduction <add>, %126, %cst_51 [1] : vector<2x27x1xf32> to vector<2x1xf32>
    %128 = vector.shape_cast %127 : vector<2x1xf32> to vector<2x1x1xf32>
    %cst_52 = arith.constant 5.78703708E-4 : f32
    %129 = vector.broadcast %cst_52 : f32 to vector<2x1x1xf32>
    %130 = arith.mulf %128, %129 : vector<2x1x1xf32>
    %131 = vector.broadcast %130 : vector<2x1x1xf32> to vector<2x27x64xf32>
    %132 = arith.subf %120, %131 : vector<2x27x64xf32>
    %133 = arith.mulf %132, %132 : vector<2x27x64xf32>
    %cst_53 = arith.constant dense<0.000000e+00> : vector<2x27xf32>
    %134 = vector.multi_reduction <add>, %133, %cst_53 [2] : vector<2x27x64xf32> to vector<2x27xf32>
    %135 = vector.shape_cast %134 : vector<2x27xf32> to vector<2x27x1xf32>
    %cst_54 = arith.constant dense<0.000000e+00> : vector<2x1xf32>
    %136 = vector.multi_reduction <add>, %135, %cst_54 [1] : vector<2x27x1xf32> to vector<2x1xf32>
    %137 = vector.shape_cast %136 : vector<2x1xf32> to vector<2x1x1xf32>
    %cst_55 = arith.constant 5.78703708E-4 : f32
    %138 = vector.broadcast %cst_55 : f32 to vector<2x1x1xf32>
    %139 = arith.mulf %137, %138 : vector<2x1x1xf32>
    %cst_56 = arith.constant 9.99999993E-9 : f32
    %140 = vector.broadcast %cst_56 : f32 to vector<2x1x1xf32>
    %141 = arith.addf %139, %140 : vector<2x1x1xf32>
    %142 = math.rsqrt %141 : vector<2x1x1xf32>
    %143 = vector.broadcast %142 : vector<2x1x1xf32> to vector<2x27x64xf32>
    %144 = arith.mulf %132, %143 : vector<2x27x64xf32>
    %145 = vector.broadcast %122 : vector<1x1x64xf32> to vector<2x27x64xf32>
    %146 = arith.mulf %144, %145 : vector<2x27x64xf32>
    %147 = vector.broadcast %124 : vector<1x1x64xf32> to vector<2x27x64xf32>
    %148 = arith.addf %146, %147 : vector<2x27x64xf32>
    %cst_57 = arith.constant 0.000000e+00 : f32
    %149 = vector.broadcast %cst_57 : f32 to vector<2x27x64xf32>
    %150 = arith.cmpf oge, %148, %149 : vector<2x27x64xf32>
    %151 = vector.broadcast %114 : f32 to vector<2x27x64xf32>
    %152 = arith.mulf %151, %148 : vector<2x27x64xf32>
    %153 = arith.select %150, %148, %152 : vector<2x27x64xi1>, vector<2x27x64xf32>
    %c0_58 = arith.constant 0 : index
    %c0_59 = arith.constant 0 : index
    %154 = vector.load %arg6[%c0_58, %c0_59] : memref<64x64xf32, #tpu.memory_space<vmem>>, vector<64x64xf32>
    %155 = vector.shape_cast %154 : vector<64x64xf32> to vector<1x64x64xf32>
    %156 = vector.shape_cast %155 : vector<1x64x64xf32> to vector<1x64x64xf32>
    %157 = vector.broadcast %156 : vector<1x64x64xf32> to vector<2x64x64xf32>
    "tpu.trace_start"() <{level = 10 : i32, message = "ntc,ncd->ntd"}> : () -> ()
    %cst_60 = arith.constant dense<0.000000e+00> : vector<2x27x64xf32>
    %158 = tpu.matmul %153, %157, %cst_60 {dimension_numbers = #tpu.dot_dimension_numbers<[2], [1], [1], [2], [0, 0, 0, 1, 1, 2], [0], [0]>} : vector<2x27x64xf32>, vector<2x64x64xf32>, vector<2x27x64xf32> -> vector<2x27x64xf32>
    "tpu.trace_stop"() : () -> ()
    %c8 = arith.constant 8 : index
    %c0_61 = arith.constant 0 : index
    %159 = vector.load %arg11[%c8, %c0_61] : memref<14x64xf32, #tpu.memory_space<vmem>>, vector<1x64xf32>
    %160 = vector.shape_cast %159 : vector<1x64xf32> to vector<1x1x64xf32>
    %c9 = arith.constant 9 : index
    %c0_62 = arith.constant 0 : index
    %161 = vector.load %arg11[%c9, %c0_62] : memref<14x64xf32, #tpu.memory_space<vmem>>, vector<1x64xf32>
    %162 = vector.shape_cast %161 : vector<1x64xf32> to vector<1x1x64xf32>
    %cst_63 = arith.constant dense<0.000000e+00> : vector<2x27xf32>
    %163 = vector.multi_reduction <add>, %158, %cst_63 [2] : vector<2x27x64xf32> to vector<2x27xf32>
    %164 = vector.shape_cast %163 : vector<2x27xf32> to vector<2x27x1xf32>
    %cst_64 = arith.constant dense<0.000000e+00> : vector<2x1xf32>
    %165 = vector.multi_reduction <add>, %164, %cst_64 [1] : vector<2x27x1xf32> to vector<2x1xf32>
    %166 = vector.shape_cast %165 : vector<2x1xf32> to vector<2x1x1xf32>
    %cst_65 = arith.constant 5.78703708E-4 : f32
    %167 = vector.broadcast %cst_65 : f32 to vector<2x1x1xf32>
    %168 = arith.mulf %166, %167 : vector<2x1x1xf32>
    %169 = vector.broadcast %168 : vector<2x1x1xf32> to vector<2x27x64xf32>
    %170 = arith.subf %158, %169 : vector<2x27x64xf32>
    %171 = arith.mulf %170, %170 : vector<2x27x64xf32>
    %cst_66 = arith.constant dense<0.000000e+00> : vector<2x27xf32>
    %172 = vector.multi_reduction <add>, %171, %cst_66 [2] : vector<2x27x64xf32> to vector<2x27xf32>
    %173 = vector.shape_cast %172 : vector<2x27xf32> to vector<2x27x1xf32>
    %cst_67 = arith.constant dense<0.000000e+00> : vector<2x1xf32>
    %174 = vector.multi_reduction <add>, %173, %cst_67 [1] : vector<2x27x1xf32> to vector<2x1xf32>
    %175 = vector.shape_cast %174 : vector<2x1xf32> to vector<2x1x1xf32>
    %cst_68 = arith.constant 5.78703708E-4 : f32
    %176 = vector.broadcast %cst_68 : f32 to vector<2x1x1xf32>
    %177 = arith.mulf %175, %176 : vector<2x1x1xf32>
    %cst_69 = arith.constant 9.99999993E-9 : f32
    %178 = vector.broadcast %cst_69 : f32 to vector<2x1x1xf32>
    %179 = arith.addf %177, %178 : vector<2x1x1xf32>
    %180 = math.rsqrt %179 : vector<2x1x1xf32>
    %181 = vector.broadcast %180 : vector<2x1x1xf32> to vector<2x27x64xf32>
    %182 = arith.mulf %170, %181 : vector<2x27x64xf32>
    %183 = vector.broadcast %160 : vector<1x1x64xf32> to vector<2x27x64xf32>
    %184 = arith.mulf %182, %183 : vector<2x27x64xf32>
    %185 = vector.broadcast %162 : vector<1x1x64xf32> to vector<2x27x64xf32>
    %186 = arith.addf %184, %185 : vector<2x27x64xf32>
    %c0_70 = arith.constant 0 : index
    %c0_71 = arith.constant 0 : index
    %187 = vector.load %arg7[%c0_70, %c0_71] : memref<32x64xf32, #tpu.memory_space<vmem>>, vector<32x64xf32>
    %188 = vector.shape_cast %187 : vector<32x64xf32> to vector<1x32x64xf32>
    %189 = vector.shape_cast %188 : vector<1x32x64xf32> to vector<1x32x64xf32>
    %190 = vector.broadcast %189 : vector<1x32x64xf32> to vector<2x32x64xf32>
    "tpu.trace_start"() <{level = 10 : i32, message = "ntc,ncd->ntd"}> : () -> ()
    %cst_72 = arith.constant dense<0.000000e+00> : vector<2x27x64xf32>
    %191 = tpu.matmul %113, %190, %cst_72 {dimension_numbers = #tpu.dot_dimension_numbers<[2], [1], [1], [2], [0, 0, 0, 1, 1, 2], [0], [0]>} : vector<2x27x32xf32>, vector<2x32x64xf32>, vector<2x27x64xf32> -> vector<2x27x64xf32>
    "tpu.trace_stop"() : () -> ()
    %192 = arith.addf %186, %191 : vector<2x27x64xf32>
    %cst_73 = arith.constant 0.000000e+00 : f32
    %193 = vector.broadcast %cst_73 : f32 to vector<2x27x64xf32>
    %194 = arith.cmpf oge, %192, %193 : vector<2x27x64xf32>
    %195 = vector.broadcast %115 : f32 to vector<2x27x64xf32>
    %196 = arith.mulf %195, %192 : vector<2x27x64xf32>
    %197 = arith.select %194, %192, %196 : vector<2x27x64xi1>, vector<2x27x64xf32>
    %c0_74 = arith.constant 0 : index
    %c0_75 = arith.constant 0 : index
    %198 = vector.load %arg13[%c0_74, %c0_75] : memref<9x27xf32, #tpu.memory_space<vmem>>, vector<9x27xf32>
    %199 = vector.shape_cast %198 : vector<9x27xf32> to vector<1x9x27xf32>
    %200 = vector.shape_cast %199 : vector<1x9x27xf32> to vector<1x9x27xf32>
    %201 = vector.broadcast %200 : vector<1x9x27xf32> to vector<2x9x27xf32>
    "tpu.trace_start"() <{level = 10 : i32, message = "npt,ntc->npc"}> : () -> ()
    %cst_76 = arith.constant dense<0.000000e+00> : vector<2x9x64xf32>
    %202 = tpu.matmul %201, %197, %cst_76 {dimension_numbers = #tpu.dot_dimension_numbers<[2], [1], [1], [2], [0, 0, 0, 1, 1, 2], [0], [0]>} : vector<2x9x27xf32>, vector<2x27x64xf32>, vector<2x9x64xf32> -> vector<2x9x64xf32>
    "tpu.trace_stop"() : () -> ()
    %c4_77 = arith.constant 4 : index
    %203 = memref.load %arg15[%c4_77] : memref<6xf32, #tpu.memory_space<smem>>
    %c5_78 = arith.constant 5 : index
    %204 = memref.load %arg15[%c5_78] : memref<6xf32, #tpu.memory_space<smem>>
    %c0_79 = arith.constant 0 : index
    %c0_80 = arith.constant 0 : index
    %205 = vector.load %arg8[%c0_79, %c0_80] : memref<64x64xf32, #tpu.memory_space<vmem>>, vector<64x64xf32>
    %206 = vector.shape_cast %205 : vector<64x64xf32> to vector<1x64x64xf32>
    %207 = vector.shape_cast %206 : vector<1x64x64xf32> to vector<1x64x64xf32>
    %208 = vector.broadcast %207 : vector<1x64x64xf32> to vector<2x64x64xf32>
    "tpu.trace_start"() <{level = 10 : i32, message = "ntc,ncd->ntd"}> : () -> ()
    %cst_81 = arith.constant dense<0.000000e+00> : vector<2x9x64xf32>
    %209 = tpu.matmul %202, %208, %cst_81 {dimension_numbers = #tpu.dot_dimension_numbers<[2], [1], [1], [2], [0, 0, 0, 1, 1, 2], [0], [0]>} : vector<2x9x64xf32>, vector<2x64x64xf32>, vector<2x9x64xf32> -> vector<2x9x64xf32>
    "tpu.trace_stop"() : () -> ()
    %c10 = arith.constant 10 : index
    %c0_82 = arith.constant 0 : index
    %210 = vector.load %arg11[%c10, %c0_82] : memref<14x64xf32, #tpu.memory_space<vmem>>, vector<1x64xf32>
    %211 = vector.shape_cast %210 : vector<1x64xf32> to vector<1x1x64xf32>
    %c11 = arith.constant 11 : index
    %c0_83 = arith.constant 0 : index
    %212 = vector.load %arg11[%c11, %c0_83] : memref<14x64xf32, #tpu.memory_space<vmem>>, vector<1x64xf32>
    %213 = vector.shape_cast %212 : vector<1x64xf32> to vector<1x1x64xf32>
    %cst_84 = arith.constant dense<0.000000e+00> : vector<2x9xf32>
    %214 = vector.multi_reduction <add>, %209, %cst_84 [2] : vector<2x9x64xf32> to vector<2x9xf32>
    %215 = vector.shape_cast %214 : vector<2x9xf32> to vector<2x9x1xf32>
    %cst_85 = arith.constant dense<0.000000e+00> : vector<2x1xf32>
    %216 = vector.multi_reduction <add>, %215, %cst_85 [1] : vector<2x9x1xf32> to vector<2x1xf32>
    %217 = vector.shape_cast %216 : vector<2x1xf32> to vector<2x1x1xf32>
    %cst_86 = arith.constant 0.00173611112 : f32
    %218 = vector.broadcast %cst_86 : f32 to vector<2x1x1xf32>
    %219 = arith.mulf %217, %218 : vector<2x1x1xf32>
    %220 = vector.broadcast %219 : vector<2x1x1xf32> to vector<2x9x64xf32>
    %221 = arith.subf %209, %220 : vector<2x9x64xf32>
    %222 = arith.mulf %221, %221 : vector<2x9x64xf32>
    %cst_87 = arith.constant dense<0.000000e+00> : vector<2x9xf32>
    %223 = vector.multi_reduction <add>, %222, %cst_87 [2] : vector<2x9x64xf32> to vector<2x9xf32>
    %224 = vector.shape_cast %223 : vector<2x9xf32> to vector<2x9x1xf32>
    %cst_88 = arith.constant dense<0.000000e+00> : vector<2x1xf32>
    %225 = vector.multi_reduction <add>, %224, %cst_88 [1] : vector<2x9x1xf32> to vector<2x1xf32>
    %226 = vector.shape_cast %225 : vector<2x1xf32> to vector<2x1x1xf32>
    %cst_89 = arith.constant 0.00173611112 : f32
    %227 = vector.broadcast %cst_89 : f32 to vector<2x1x1xf32>
    %228 = arith.mulf %226, %227 : vector<2x1x1xf32>
    %cst_90 = arith.constant 9.99999993E-9 : f32
    %229 = vector.broadcast %cst_90 : f32 to vector<2x1x1xf32>
    %230 = arith.addf %228, %229 : vector<2x1x1xf32>
    %231 = math.rsqrt %230 : vector<2x1x1xf32>
    %232 = vector.broadcast %231 : vector<2x1x1xf32> to vector<2x9x64xf32>
    %233 = arith.mulf %221, %232 : vector<2x9x64xf32>
    %234 = vector.broadcast %211 : vector<1x1x64xf32> to vector<2x9x64xf32>
    %235 = arith.mulf %233, %234 : vector<2x9x64xf32>
    %236 = vector.broadcast %213 : vector<1x1x64xf32> to vector<2x9x64xf32>
    %237 = arith.addf %235, %236 : vector<2x9x64xf32>
    %cst_91 = arith.constant 0.000000e+00 : f32
    %238 = vector.broadcast %cst_91 : f32 to vector<2x9x64xf32>
    %239 = arith.cmpf oge, %237, %238 : vector<2x9x64xf32>
    %240 = vector.broadcast %203 : f32 to vector<2x9x64xf32>
    %241 = arith.mulf %240, %237 : vector<2x9x64xf32>
    %242 = arith.select %239, %237, %241 : vector<2x9x64xi1>, vector<2x9x64xf32>
    %c0_92 = arith.constant 0 : index
    %c0_93 = arith.constant 0 : index
    %243 = vector.load %arg9[%c0_92, %c0_93] : memref<64x64xf32, #tpu.memory_space<vmem>>, vector<64x64xf32>
    %244 = vector.shape_cast %243 : vector<64x64xf32> to vector<1x64x64xf32>
    %245 = vector.shape_cast %244 : vector<1x64x64xf32> to vector<1x64x64xf32>
    %246 = vector.broadcast %245 : vector<1x64x64xf32> to vector<2x64x64xf32>
    "tpu.trace_start"() <{level = 10 : i32, message = "ntc,ncd->ntd"}> : () -> ()
    %cst_94 = arith.constant dense<0.000000e+00> : vector<2x9x64xf32>
    %247 = tpu.matmul %242, %246, %cst_94 {dimension_numbers = #tpu.dot_dimension_numbers<[2], [1], [1], [2], [0, 0, 0, 1, 1, 2], [0], [0]>} : vector<2x9x64xf32>, vector<2x64x64xf32>, vector<2x9x64xf32> -> vector<2x9x64xf32>
    "tpu.trace_stop"() : () -> ()
    %c12 = arith.constant 12 : index
    %c0_95 = arith.constant 0 : index
    %248 = vector.load %arg11[%c12, %c0_95] : memref<14x64xf32, #tpu.memory_space<vmem>>, vector<1x64xf32>
    %249 = vector.shape_cast %248 : vector<1x64xf32> to vector<1x1x64xf32>
    %c13 = arith.constant 13 : index
    %c0_96 = arith.constant 0 : index
    %250 = vector.load %arg11[%c13, %c0_96] : memref<14x64xf32, #tpu.memory_space<vmem>>, vector<1x64xf32>
    %251 = vector.shape_cast %250 : vector<1x64xf32> to vector<1x1x64xf32>
    %cst_97 = arith.constant dense<0.000000e+00> : vector<2x9xf32>
    %252 = vector.multi_reduction <add>, %247, %cst_97 [2] : vector<2x9x64xf32> to vector<2x9xf32>
    %253 = vector.shape_cast %252 : vector<2x9xf32> to vector<2x9x1xf32>
    %cst_98 = arith.constant dense<0.000000e+00> : vector<2x1xf32>
    %254 = vector.multi_reduction <add>, %253, %cst_98 [1] : vector<2x9x1xf32> to vector<2x1xf32>
    %255 = vector.shape_cast %254 : vector<2x1xf32> to vector<2x1x1xf32>
    %cst_99 = arith.constant 0.00173611112 : f32
    %256 = vector.broadcast %cst_99 : f32 to vector<2x1x1xf32>
    %257 = arith.mulf %255, %256 : vector<2x1x1xf32>
    %258 = vector.broadcast %257 : vector<2x1x1xf32> to vector<2x9x64xf32>
    %259 = arith.subf %247, %258 : vector<2x9x64xf32>
    %260 = arith.mulf %259, %259 : vector<2x9x64xf32>
    %cst_100 = arith.constant dense<0.000000e+00> : vector<2x9xf32>
    %261 = vector.multi_reduction <add>, %260, %cst_100 [2] : vector<2x9x64xf32> to vector<2x9xf32>
    %262 = vector.shape_cast %261 : vector<2x9xf32> to vector<2x9x1xf32>
    %cst_101 = arith.constant dense<0.000000e+00> : vector<2x1xf32>
    %263 = vector.multi_reduction <add>, %262, %cst_101 [1] : vector<2x9x1xf32> to vector<2x1xf32>
    %264 = vector.shape_cast %263 : vector<2x1xf32> to vector<2x1x1xf32>
    %cst_102 = arith.constant 0.00173611112 : f32
    %265 = vector.broadcast %cst_102 : f32 to vector<2x1x1xf32>
    %266 = arith.mulf %264, %265 : vector<2x1x1xf32>
    %cst_103 = arith.constant 9.99999993E-9 : f32
    %267 = vector.broadcast %cst_103 : f32 to vector<2x1x1xf32>
    %268 = arith.addf %266, %267 : vector<2x1x1xf32>
    %269 = math.rsqrt %268 : vector<2x1x1xf32>
    %270 = vector.broadcast %269 : vector<2x1x1xf32> to vector<2x9x64xf32>
    %271 = arith.mulf %259, %270 : vector<2x9x64xf32>
    %272 = vector.broadcast %249 : vector<1x1x64xf32> to vector<2x9x64xf32>
    %273 = arith.mulf %271, %272 : vector<2x9x64xf32>
    %274 = vector.broadcast %251 : vector<1x1x64xf32> to vector<2x9x64xf32>
    %275 = arith.addf %273, %274 : vector<2x9x64xf32>
    %276 = arith.addf %275, %202 : vector<2x9x64xf32>
    %cst_104 = arith.constant 0.000000e+00 : f32
    %277 = vector.broadcast %cst_104 : f32 to vector<2x9x64xf32>
    %278 = arith.cmpf oge, %276, %277 : vector<2x9x64xf32>
    %279 = vector.broadcast %204 : f32 to vector<2x9x64xf32>
    %280 = arith.mulf %279, %276 : vector<2x9x64xf32>
    %281 = arith.select %278, %276, %280 : vector<2x9x64xi1>, vector<2x9x64xf32>
    %c0_105 = arith.constant 0 : index
    %c0_106 = arith.constant 0 : index
    %282 = vector.load %arg14[%c0_105, %c0_106] : memref<3x9xf32, #tpu.memory_space<vmem>>, vector<3x9xf32>
    %283 = vector.shape_cast %282 : vector<3x9xf32> to vector<1x3x9xf32>
    %284 = vector.shape_cast %283 : vector<1x3x9xf32> to vector<1x3x9xf32>
    %285 = vector.broadcast %284 : vector<1x3x9xf32> to vector<2x3x9xf32>
    "tpu.trace_start"() <{level = 10 : i32, message = "npt,ntc->npc"}> : () -> ()
    %cst_107 = arith.constant dense<0.000000e+00> : vector<2x3x64xf32>
    %286 = tpu.matmul %285, %281, %cst_107 {dimension_numbers = #tpu.dot_dimension_numbers<[2], [1], [1], [2], [0, 0, 0, 1, 1, 2], [0], [0]>} : vector<2x3x9xf32>, vector<2x9x64xf32>, vector<2x3x64xf32> -> vector<2x3x64xf32>
    "tpu.trace_stop"() : () -> ()
    %c0_108 = arith.constant 0 : index
    %c0_109 = arith.constant 0 : index
    %287 = vector.load %arg10[%c0_108, %c0_109] : memref<64x32xf32, #tpu.memory_space<vmem>>, vector<64x32xf32>
    %288 = vector.shape_cast %287 : vector<64x32xf32> to vector<1x64x32xf32>
    %289 = vector.shape_cast %288 : vector<1x64x32xf32> to vector<1x64x32xf32>
    %290 = vector.broadcast %289 : vector<1x64x32xf32> to vector<2x64x32xf32>
    "tpu.trace_start"() <{level = 10 : i32, message = "ntc,ncd->ntd"}> : () -> ()
    %cst_110 = arith.constant dense<0.000000e+00> : vector<2x3x32xf32>
    %291 = tpu.matmul %286, %290, %cst_110 {dimension_numbers = #tpu.dot_dimension_numbers<[2], [1], [1], [2], [0, 0, 0, 1, 1, 2], [0], [0]>} : vector<2x3x64xf32>, vector<2x64x32xf32>, vector<2x3x32xf32> -> vector<2x3x32xf32>
    "tpu.trace_stop"() : () -> ()
    %c0_111 = arith.constant 0 : index
    %c0_112 = arith.constant 0 : index
    %c0_113 = arith.constant 0 : index
    %292 = vector.load %arg16[%c0_111, %c0_112, %c0_113] : memref<2x3x32xf32, #tpu.memory_space<vmem>>, vector<2x3x32xf32>
    tpu.vector_store %arg16[%c0_111, %c0_112, %c0_113], %291 {strides = array<i32>} : memref<2x3x32xf32, #tpu.memory_space<vmem>>, vector<2x3x32xf32>,
    %cst_114 = arith.constant dense<0.000000e+00> : vector<2x32xf32>
    %293 = vector.multi_reduction <add>, %291, %cst_114 [1] : vector<2x3x32xf32> to vector<2x32xf32>
    %294 = vector.shape_cast %293 : vector<2x32xf32> to vector<2x1x32xf32>
    %cst_115 = arith.constant 3.000000e+00 : f32
    %295 = vector.broadcast %cst_115 : f32 to vector<2x1x32xf32>
    %296 = arith.divf %294, %295 : vector<2x1x32xf32>
    %c0_116 = arith.constant 0 : index
    %c0_117 = arith.constant 0 : index
    %c0_118 = arith.constant 0 : index
    %297 = vector.load %arg17[%c0_116, %c0_117, %c0_118] : memref<2x1x32xf32, #tpu.memory_space<vmem>>, vector<2x1x32xf32>
    tpu.vector_store %arg17[%c0_116, %c0_117, %c0_118], %296 {strides = array<i32>} : memref<2x1x32xf32, #tpu.memory_space<vmem>>, vector<2x1x32xf32>,
    return
  }
  func.func @transform_0(%arg0: i32) -> (i32, i32, i32) {
    %c0_i32 = arith.constant 0 : i32
    %c0_i32_0 = arith.constant 0 : i32
    %c0_i32_1 = arith.constant 0 : i32
    return %arg0, %c0_i32, %c0_i32_0 : i32, i32, i32
  }
  func.func @transform_1(%arg0: i32) -> (i32, i32) {
    %c0_i32 = arith.constant 0 : i32
    %c0_i32_0 = arith.constant 0 : i32
    %c0_i32_1 = arith.constant 0 : i32
    return %c0_i32, %c0_i32_0 : i32, i32
  }
  func.func @transform_2(%arg0: i32) -> (i32, i32) {
    %c0_i32 = arith.constant 0 : i32
    %c0_i32_0 = arith.constant 0 : i32
    %c0_i32_1 = arith.constant 0 : i32
    return %c0_i32, %c0_i32_0 : i32, i32
  }
  func.func @transform_3(%arg0: i32) -> (i32, i32) {
    %c0_i32 = arith.constant 0 : i32
    %c0_i32_0 = arith.constant 0 : i32
    %c0_i32_1 = arith.constant 0 : i32
    return %c0_i32, %c0_i32_0 : i32, i32
  }
  func.func @transform_4(%arg0: i32) -> (i32, i32) {
    %c0_i32 = arith.constant 0 : i32
    %c0_i32_0 = arith.constant 0 : i32
    %c0_i32_1 = arith.constant 0 : i32
    return %c0_i32, %c0_i32_0 : i32, i32
  }
  func.func @transform_5(%arg0: i32) -> (i32, i32) {
    %c0_i32 = arith.constant 0 : i32
    %c0_i32_0 = arith.constant 0 : i32
    %c0_i32_1 = arith.constant 0 : i32
    return %c0_i32, %c0_i32_0 : i32, i32
  }
  func.func @transform_6(%arg0: i32) -> (i32, i32) {
    %c0_i32 = arith.constant 0 : i32
    %c0_i32_0 = arith.constant 0 : i32
    %c0_i32_1 = arith.constant 0 : i32
    return %c0_i32, %c0_i32_0 : i32, i32
  }
  func.func @transform_7(%arg0: i32) -> (i32, i32) {
    %c0_i32 = arith.constant 0 : i32
    %c0_i32_0 = arith.constant 0 : i32
    %c0_i32_1 = arith.constant 0 : i32
    return %c0_i32, %c0_i32_0 : i32, i32
  }
  func.func @transform_8(%arg0: i32) -> (i32, i32) {
    %c0_i32 = arith.constant 0 : i32
    %c0_i32_0 = arith.constant 0 : i32
    %c0_i32_1 = arith.constant 0 : i32
    return %c0_i32, %c0_i32_0 : i32, i32
  }
  func.func @transform_9(%arg0: i32) -> (i32, i32) {
    %c0_i32 = arith.constant 0 : i32
    %c0_i32_0 = arith.constant 0 : i32
    %c0_i32_1 = arith.constant 0 : i32
    return %c0_i32, %c0_i32_0 : i32, i32
  }
  func.func @transform_10(%arg0: i32) -> (i32, i32) {
    %c0_i32 = arith.constant 0 : i32
    %c0_i32_0 = arith.constant 0 : i32
    %c0_i32_1 = arith.constant 0 : i32
    return %c0_i32, %c0_i32_0 : i32, i32
  }
  func.func @transform_11(%arg0: i32) -> (i32, i32) {
    %c0_i32 = arith.constant 0 : i32
    %c0_i32_0 = arith.constant 0 : i32
    %c0_i32_1 = arith.constant 0 : i32
    return %c0_i32, %c0_i32_0 : i32, i32
  }
  func.func @transform_12(%arg0: i32) -> (i32, i32) {
    %c0_i32 = arith.constant 0 : i32
    %c0_i32_0 = arith.constant 0 : i32
    %c0_i32_1 = arith.constant 0 : i32
    return %c0_i32, %c0_i32_0 : i32, i32
  }
  func.func @transform_13(%arg0: i32) -> (i32, i32) {
    %c0_i32 = arith.constant 0 : i32
    %c0_i32_0 = arith.constant 0 : i32
    %c0_i32_1 = arith.constant 0 : i32
    return %c0_i32, %c0_i32_0 : i32, i32
  }
  func.func @transform_14(%arg0: i32) -> i32 {
    %c0_i32 = arith.constant 0 : i32
    %c0_i32_0 = arith.constant 0 : i32
    return %c0_i32 : i32
  }
  func.func @transform_15(%arg0: i32) -> (i32, i32, i32) {
    %c0_i32 = arith.constant 0 : i32
    %c0_i32_0 = arith.constant 0 : i32
    %c0_i32_1 = arith.constant 0 : i32
    return %arg0, %c0_i32, %c0_i32_0 : i32, i32, i32
  }
  func.func @transform_16(%arg0: i32) -> (i32, i32, i32) {
    %c0_i32 = arith.constant 0 : i32
    %c0_i32_0 = arith.constant 0 : i32
    %c0_i32_1 = arith.constant 0 : i32
    return %arg0, %c0_i32, %c0_i32_0 : i32, i32, i32
  }
}

</mosaic_0001>

<bundles_post_ra>
// kernel: tpu_custom_call.1
= control target key start
LH: loop header
LB: loop body
LE: loop exit
PB: predicated region body
PF: predicated region fallthrough
CT: control target
= control target key end

     0   :  { %s7604_s0 = inlined_call_operand.vmem [shape: f32[2,81,32], index: 0, kind: input, shape index: {}]   ;;  %s7605_s1 = inlined_call_operand.vmem [shape: f32[32,32], index: 1, kind: input, shape index: {}]   ;;  %s7606_s2 = inlined_call_operand.vmem [shape: f32[32,32], index: 2, kind: input, shape index: {}]   ;;  %s7607_s3 = inlined_call_operand.hbm [shape: f32[32,32], index: 3, kind: input, shape index: {}]   ;;  %s7608_s4 = inlined_call_operand.hbm [shape: f32[32,64], index: 4, kind: input, shape index: {}]   ;;  %s7609_s5 = inlined_call_operand.vmem [shape: f32[64,64], index: 5, kind: input, shape index: {}]   ;;  %s7610_s6 = inlined_call_operand.hbm [shape: f32[32,64], index: 6, kind: input, shape index: {}]   ;;  %s7611_s7 = inlined_call_operand.vmem [shape: f32[64,64], index: 7, kind: input, shape index: {}]   ;;  %s7612_s8 = inlined_call_operand.vmem [shape: f32[64,64], index: 8, kind: input, shape index: {}]   ;;  %s7613_s9 = inlined_call_operand.vmem [shape: f32[64,32], index: 9, kind: input, shape index: {}]   ;;  %s7614_s10 = inlined_call_operand.hbm [shape: f32[14,64], index: 10, kind: input, shape index: {}]   ;;  %s7615_s11 = inlined_call_operand.vmem [shape: f32[27,81], index: 11, kind: input, shape index: {}]   ;;  %s7616_s12 = inlined_call_operand.hbm [shape: f32[9,27], index: 12, kind: input, shape index: {}]   ;;  %s7617_s13 = inlined_call_operand.vmem [shape: f32[3,9], index: 13, kind: input, shape index: {}]   ;;  %s7618_s14 = inlined_call_operand.vmem [shape: f32[6], index: 14, kind: input, shape index: {}]   ;;  %s7619_s15 = inlined_call_operand.vmem [shape: f32[2,3,32], index: 15, kind: output, shape index: {0}]   ;;  %s7620_s16 = inlined_call_operand.hbm [shape: f32[2,1,32], index: 16, kind: output, shape index: {1}]  }
   0x1   :  { %7637 = sst [smem:[#allocation32_spill]] %s7604_s0 }
   0x2   :  { %22 = vsyncpa [#allocation3], 0 }
   0x3   :  { %23 = vsyncpa [#allocation7], 0 }
   0x4   :  { %24 = vsyncpa [#allocation10], 0 }
   0x5   :  { %25 = vsyncpa [#allocation5], 0 }
   0x6   :  { %26 = vsyncpa [#allocation4], 0  ;;  %s5609_s21 = smov [#allocation6]   ;;  %s5610_s23 = smov [#allocation9]  }
   0x7   :  { %s50_s22 = sshll.u32 %s5609_s21, 4  ;;  %s82_s24 = sshll.u32 %s5610_s23, 4  ;;  %s51_s22 = int_to_ptr.vmem [resolvable:$true] %s50_s22  ;;  %s83_s24 = int_to_ptr.vmem [resolvable:$true] %s82_s24 }
   0x8   :  { %s5475_s25 = scalar_lea.vmem %s51_s22, 512  ;;  %p5480_p1 = scmp.lt.s32.totalorder %s51_s22, %s51_s22 }
   0x9   :  { %p5476_p0 = scmp.ne.s32.totalorder %s51_s22, %s5475_s25  ;;  %p5481_p2 = scmp.lt.s32.totalorder %s5475_s25, %s5475_s25 }
   0xb   :  { %p5482_p3 = por %p5481_p2, %p5480_p1 }
   0xd   :  { %p5483_p4 = pnand %p5482_p3, %p5476_p0 }
   0xf   :  { %5486 = shalt.err (!%p5483_p4)
}
  0x10   :  { %s5611_s26 = smov 128   ;;  %s5612_s27 = smov 8  }
  0x11   :  { %56 = dma.hbm_to_vmem [thread:$0]  %s7608_s4, 512, %s51_s22, [#allocation7], %s5611_s26, %s5611_s26, %s5612_s27  }
  0x12   :  { %s5495_s30 = scalar_lea.vmem %s83_s24, 256  ;;  %p5500_p6 = scmp.lt.s32.totalorder %s83_s24, %s83_s24 }
  0x13   :  { %p5496_p5 = scmp.ne.s32.totalorder %s83_s24, %s5495_s30  ;;  %p5501_p7 = scmp.lt.s32.totalorder %s5495_s30, %s5495_s30 }
  0x15   :  { %p5502_p8 = por %p5501_p7, %p5500_p6 }
  0x17   :  { %p5503_p9 = pnand %p5502_p8, %p5496_p5 }
  0x19   :  { %5506 = shalt.err (!%p5503_p9)
}
  0x1a   :  { %88 = dma.hbm_to_vmem [thread:$0]  %s7614_s10, 256, %s83_s24, [#allocation10], %s5611_s26, %s5611_s26, %s5612_s27  }
  0x1b   :  { %s5613_s18 = smov [#allocation2]   ;;  %s5614_s20 = smov [#allocation8]  }
  0x1c   :  { %s38_s19 = sshll.u32 %s5613_s18, 4  ;;  %s64_s21 = sshll.u32 %s5614_s20, 4  ;;  %s39_s19 = int_to_ptr.vmem [resolvable:$true] %s38_s19  ;;  %s65_s21 = int_to_ptr.vmem [resolvable:$true] %s64_s21 }
  0x1d   :  { %s5515_s4 = scalar_lea.vmem %s39_s19, 512  ;;  %p5520_p11 = scmp.lt.s32.totalorder %s39_s19, %s39_s19 }
  0x1e   :  { %p5516_p10 = scmp.ne.s32.totalorder %s39_s19, %s5515_s4  ;;  %p5521_p12 = scmp.lt.s32.totalorder %s5515_s4, %s5515_s4 }
  0x20   :  { %p5522_p13 = por %p5521_p12, %p5520_p11 }
  0x22   :  { %p5523_p0 = pnand %p5522_p13, %p5516_p10 }
  0x24   :  { %5526 = shalt.err (!%p5523_p0)
}
  0x25   :  { %44 = dma.hbm_to_vmem [thread:$0]  %s7607_s3, 512, %s39_s19, [#allocation3], %s5611_s26, %s5611_s26, %s5612_s27  }
  0x26   :  { %s5535_s10 = scalar_lea.vmem %s65_s21, 512  ;;  %p5540_p2 = scmp.lt.s32.totalorder %s65_s21, %s65_s21 }
  0x27   :  { %p5536_p1 = scmp.ne.s32.totalorder %s65_s21, %s5535_s10  ;;  %p5541_p3 = scmp.lt.s32.totalorder %s5535_s10, %s5535_s10 }
  0x29   :  { %p5542_p4 = por %p5541_p3, %p5540_p2 }
  0x2b   :  { %p5543_p5 = pnand %p5542_p4, %p5536_p1 }
  0x2d   :  { %5546 = shalt.err (!%p5543_p5)
}
  0x2e   :  { %70 = dma.hbm_to_vmem [thread:$0]  %s7610_s6, 512, %s65_s21, [#allocation7], %s5611_s26, %s5611_s26, %s5612_s27  }
  0x2f   :  { %s111_s30 = sshll.u32 %s7618_s14, 4  ;;  %s5615_s0 = smov [#allocation11]   ;;  %s112_s30 = int_to_ptr.vmem [resolvable:$true] %s111_s30 }
  0x30   :  { %s96_s3 = sshll.u32 %s5615_s0, 4  ;;  %s97_s3 = int_to_ptr.vmem [resolvable:$true] %s96_s3 }
  0x31   :  { %s5555_s17 = scalar_lea.vmem %s97_s3, 256  ;;  %p5560_p7 = scmp.lt.s32.totalorder %s97_s3, %s97_s3 }
  0x32   :  { %p5556_p6 = scmp.ne.s32.totalorder %s97_s3, %s5555_s17  ;;  %p5561_p8 = scmp.lt.s32.totalorder %s5555_s17, %s5555_s17 }
  0x34   :  { %p5562_p9 = por %p5561_p8, %p5560_p7 }
  0x36   :  { %p5563_p10 = pnand %p5562_p9, %p5556_p6 }
  0x38   :  { %5566 = shalt.err (!%p5563_p10)
}
  0x39   :  { %102 = dma.hbm_to_vmem [thread:$0]  %s7616_s12, 256, %s97_s3, [#allocation10], %s5611_s26, %s5611_s26, %s5612_s27  }
  0x3a   :  { %s5567_s19 = scalar_lea.vmem %s112_s30, 16  ;;  %p5572_p12 = scmp.lt.s32.totalorder %s112_s30, %s112_s30 }
  0x3b   :  { %p5568_p11 = scmp.ne.s32.totalorder %s112_s30, %s5567_s19  ;;  %p5573_p13 = scmp.lt.s32.totalorder %s5567_s19, %s5567_s19 }
  0x3d   :  { %p5574_p0 = por %p5573_p13, %p5572_p12 }
  0x3f   :  { %p5575_p1 = pnand %p5574_p0, %p5568_p11 }
  0x41   :  { %5578 = shalt.err (!%p5575_p1)
}
  0x42   :  { %s5616_s14 = smov [#allocation12]  }
  0x43   :  { %114 = dma.vmem_to_smem %s112_s30, 16, %s5616_s14, [#allocation5]  }
  0x44   :  { %5599 = dma.done.wait [#allocation3], 512  }
  0x45   :  { %5600 = vsyncadd [#allocation3], 4294966784 }
  0x46   :  { %5601 = dma.done.wait [#allocation7], 1024  }
  0x47   :  { %5602 = vsyncadd [#allocation7], 4294966272 }
  0x48   :  { %5603 = dma.done.wait [#allocation10], 512  }
  0x49   :  { %5604 = vsyncadd [#allocation10], 4294966784 }
  0x4a   :  { %5605 = dma.done.wait [#allocation5], 16  }
  0x4b   :  { %5606 = vsyncadd [#allocation5], 4294967280 }
  0x4c   :  { %133 = sfence }
  0x4d   :  { %s7638_s26 = sld [smem:[#allocation32_spill]]  ;;  %vm158_vm0 = vcmask 261120   ;;  %vm189_vm1 = vcmask 253952   ;;  %vm5618_vm2 = vmmov 0   ;;  %vm1198_vm3 = vcmask 1040384   ;;  %s5619_s12 = smov [#allocation13]  }
  0x4e   :  { %s4467_s20 = sld [smem:[#allocation12 + $0x1]]  ;;  %s4426_s27 = sshll.u32 %s5619_s12, 4  ;;  %s4427_s27 = int_to_ptr.vmem [resolvable:$true] %s4426_s27 }
  0x4f   :  { %s4527_s14 = sld [smem:[#allocation12 + $0x3]]  ;;  %p5584_p3 = scmp.lt.s32.totalorder %s4427_s27, %s4427_s27 }
  0x50   :  { %s4563_s22 = sld [smem:[#allocation12 + $0x5]] }
  0x53   :  { %v5743_v0 = vld [vmem:[%s7638_s26] sm:$0xff]  ;;  %v5748_v1 = vld [vmem:[%s7638_s26 + $0x8] sm:$0xff]  ;;  %v5753_v2 = vld [vmem:[%s7638_s26 + $0x58] sm:$0xff] }
  0x54   :  { %v159_v3 = vsel %vm158_vm0, %v5743_v0, 0.0  ;;  %v162_v4 = vsel %vm158_vm0, %v5748_v1, 0.0  ;;  %v5762_v5 = vld [vmem:[%s7638_s26 + $0x60] sm:$0xff]  ;;  %v193_v6 = vsel %vm158_vm0, %v5753_v2, 0.0  ;;  %v5771_v8 = vld [vmem:[%s7638_s26 + $0x10] sm:$0xff]  ;;  %v5776_v9 = vld [vmem:[%s7638_s26 + $0x68] sm:$0xff] }
  0x55   :  { %160 = vadd.xlane.f32.xlu0 %v159_v3  ;;  %163 = vadd.xlane.f32.xlu1 %v162_v4  ;;  %v196_v7 = vsel %vm158_vm0, %v5762_v5, 0.0  ;;  %v165_v10 = vsel %vm158_vm0, %v5771_v8, 0.0  ;;  %v199_v11 = vsel %vm158_vm0, %v5776_v9, 0.0  ;;  %v5785_v12 = vld [vmem:[%s7638_s26 + $0x18] sm:$0xff]  ;;  %v5790_v13 = vld [vmem:[%s7638_s26 + $0x70] sm:$0xff]  ;;  %v5799_v16 = vld [vmem:[%s7638_s26 + $0x20] sm:$0xff] }
  0x56   :  { %v168_v14 = vsel %vm158_vm0, %v5785_v12, 0.0  ;;  %v202_v15 = vsel %vm158_vm0, %v5790_v13, 0.0  ;;  %v5804_v17 = vld [vmem:[%s7638_s26 + $0x78] sm:$0xff]  ;;  %v171_v18 = vsel %vm158_vm0, %v5799_v16, 0.0  ;;  %v5813_v20 = vld [vmem:[%s7638_s26 + $0x28] sm:$0xff]  ;;  %v5818_v21 = vld [vmem:[%s7638_s26 + $0x80] sm:$0xff] }
  0x57   :  { %v205_v19 = vsel %vm158_vm0, %v5804_v17, 0.0  ;;  %v174_v22 = vsel %vm158_vm0, %v5813_v20, 0.0  ;;  %v208_v23 = vsel %vm158_vm0, %v5818_v21, 0.0  ;;  %v5827_v24 = vld [vmem:[%s7638_s26 + $0x30] sm:$0xff]  ;;  %v5832_v25 = vld [vmem:[%s7638_s26 + $0x88] sm:$0xff]  ;;  %v5841_v28 = vld [vmem:[%s7638_s26 + $0x38] sm:$0xff] }
  0x58   :  { %v177_v26 = vsel %vm158_vm0, %v5827_v24, 0.0  ;;  %v211_v27 = vsel %vm158_vm0, %v5832_v25, 0.0  ;;  %v5846_v29 = vld [vmem:[%s7638_s26 + $0x90] sm:$0xff]  ;;  %v180_v30 = vsel %vm158_vm0, %v5841_v28, 0.0  ;;  %v5855_v32 = vld [vmem:[%s7638_s26 + $0x40] sm:$0xff]  ;;  %v5860_v33 = vld [vmem:[%s7638_s26 + $0x98] sm:$0xff] }
  0x59   :  { %194 = vadd.xlane.f32.xlu0 %v193_v6  ;;  %197 = vadd.xlane.f32.xlu1 %v196_v7  ;;  %v214_v31 = vsel %vm158_vm0, %v5846_v29, 0.0  ;;  %v183_v34 = vsel %vm158_vm0, %v5855_v32, 0.0  ;;  %v217_v35 = vsel %vm158_vm0, %v5860_v33, 0.0  ;;  %v5869_v36 = vld [vmem:[%s7638_s26 + $0x48] sm:$0xff]  ;;  %v5874_v37 = vld [vmem:[%s7638_s26 + $0xa0] sm:$0xff] }
  0x5a   :  { %v186_v38 = vsel %vm158_vm0, %v5869_v36, 0.0  ;;  %v220_v39 = vsel %vm158_vm0, %v5874_v37, 0.0  ;;  %v5883_v40 = vld [vmem:[%s7638_s26 + $0x50] sm:$0x1]  ;;  %v5888_v41 = vld [vmem:[%s7638_s26 + $0xa8] sm:$0x1] }
  0x5b   :  { %v190_v42 = vsel %vm189_vm1, %v5883_v40, 0.0  ;;  %v223_v43 = vsel %vm189_vm1, %v5888_v41, 0.0 }
  0x5d   :  { %166 = vadd.xlane.f32.xlu0 %v165_v10  ;;  %200 = vadd.xlane.f32.xlu1 %v199_v11 }
  0x61   :  { %169 = vadd.xlane.f32.xlu0 %v168_v14  ;;  %203 = vadd.xlane.f32.xlu1 %v202_v15 }
  0x65   :  { %172 = vadd.xlane.f32.xlu0 %v171_v18  ;;  %206 = vadd.xlane.f32.xlu1 %v205_v19 }
  0x69   :  { %175 = vadd.xlane.f32.xlu0 %v174_v22  ;;  %209 = vadd.xlane.f32.xlu1 %v208_v23 }
  0x6d   :  { %178 = vadd.xlane.f32.xlu0 %v177_v26  ;;  %212 = vadd.xlane.f32.xlu1 %v211_v27 }
  0x71   :  { %181 = vadd.xlane.f32.xlu0 %v180_v30  ;;  %215 = vadd.xlane.f32.xlu1 %v214_v31 }
  0x75   :  { %184 = vadd.xlane.f32.xlu0 %v183_v34  ;;  %218 = vadd.xlane.f32.xlu1 %v217_v35 }
  0x79   :  { %187 = vadd.xlane.f32.xlu0 %v186_v38  ;;  %221 = vadd.xlane.f32.xlu1 %v220_v39 }
  0x7d   :  { %191 = vadd.xlane.f32.xlu0 %v190_v42  ;;  %224 = vadd.xlane.f32.xlu1 %v223_v43 }
  0xde   :  { %v161_v44 = vpop.xlane.xlu0 %160  ;;  %v164_v45 = vpop.xlane.xlu1 %163 }
  0xdf   :  { %v227_v46 = vmul.f32 0.03125, %v161_v44  ;;  %v228_v47 = vmul.f32 0.03125, %v164_v45 }
  0xe1   :  { %v5895_v48 = vsub.f32 %v5743_v0, %v227_v46  ;;  %v5898_v49 = vsub.f32 %v5748_v1, %v228_v47 }
  0xe2   :  { %v195_v50 = vpop.xlane.xlu0 %194  ;;  %v198_v51 = vpop.xlane.xlu1 %197 }
  0xe3   :  { %v238_v52 = vmul.f32 0.03125, %v195_v50  ;;  %v239_v53 = vmul.f32 0.03125, %v198_v51  ;;  %v271_v54 = vmul.f32 %v5895_v48, %v5895_v48  ;;  %v272_v55 = vmul.f32 %v5898_v49, %v5898_v49 }
  0xe5   :  { %v5905_v56 = vsub.f32 %v5753_v2, %v238_v52  ;;  %v5908_v57 = vsub.f32 %v5762_v5, %v239_v53  ;;  %v293_v58 = vsel %vm158_vm0, %v271_v54, 0.0  ;;  %v296_v61 = vsel %vm158_vm0, %v272_v55, 0.0 }
  0xe6   :  { %294 = vadd.xlane.f32.xlu0 %v293_v58  ;;  %v167_v59 = vpop.xlane.xlu0 %166  ;;  %v201_v60 = vpop.xlane.xlu1 %200 }
  0xe7   :  { %v229_v62 = vmul.f32 0.03125, %v167_v59  ;;  %v240_v63 = vmul.f32 0.03125, %v201_v60  ;;  %v282_v0 = vmul.f32 %v5905_v56, %v5905_v56  ;;  %v283_v1 = vmul.f32 %v5908_v57, %v5908_v57 }
  0xe9   :  { %v5917_v2 = vsub.f32 %v5771_v8, %v229_v62  ;;  %v5920_v3 = vsub.f32 %v5776_v9, %v240_v63  ;;  %v326_v4 = vsel %vm158_vm0, %v282_v0, 0.0  ;;  %v329_v7 = vsel %vm158_vm0, %v283_v1, 0.0 }
  0xea   :  { %297 = vadd.xlane.f32.xlu0 %v296_v61  ;;  %327 = vadd.xlane.f32.xlu1 %v326_v4  ;;  %v170_v5 = vpop.xlane.xlu0 %169  ;;  %v204_v6 = vpop.xlane.xlu1 %203 }
  0xeb   :  { %v230_v10 = vmul.f32 0.03125, %v170_v5  ;;  %v241_v11 = vmul.f32 0.03125, %v204_v6  ;;  %v273_v14 = vmul.f32 %v5917_v2, %v5917_v2  ;;  %v284_v8 = vmul.f32 %v5920_v3, %v5920_v3 }
  0xed   :  { %v5929_v15 = vsub.f32 %v5785_v12, %v230_v10  ;;  %v5932_v9 = vsub.f32 %v5790_v13, %v241_v11  ;;  %v299_v18 = vsel %vm158_vm0, %v273_v14, 0.0  ;;  %v332_v23 = vsel %vm158_vm0, %v284_v8, 0.0 }
  0xee   :  { %330 = vadd.xlane.f32.xlu1 %v329_v7  ;;  %300 = vadd.xlane.f32.xlu0 %v299_v18  ;;  %v173_v19 = vpop.xlane.xlu0 %172  ;;  %v207_v22 = vpop.xlane.xlu1 %206 }
  0xef   :  { %v231_v26 = vmul.f32 0.03125, %v173_v19  ;;  %v242_v27 = vmul.f32 0.03125, %v207_v22  ;;  %v274_v30 = vmul.f32 %v5929_v15, %v5929_v15  ;;  %v285_v12 = vmul.f32 %v5932_v9, %v5932_v9  ;;  %v502_v22 = vld [vmem:[%s7605_s1 + $0x18] sm:$0xff] }
  0xf0   :  { %v7622_v19 = vmov 0.0  }
  0xf1   :  { %v5941_v31 = vsub.f32 %v5799_v16, %v231_v26  ;;  %v5944_v13 = vsub.f32 %v5804_v17, %v242_v27  ;;  %v302_v34 = vsel %vm158_vm0, %v274_v30, 0.0  ;;  %v335_v39 = vsel %vm158_vm0, %v285_v12, 0.0  ;;  %4834 = vmatprep.subr.mxu0 %v7622_v19  ;;  %4875 = vmatprep.subr.mxu1 %v7622_v19 }
  0xf2   :  { %333 = vadd.xlane.f32.xlu1 %v332_v23  ;;  %303 = vadd.xlane.f32.xlu0 %v302_v34  ;;  %v176_v35 = vpop.xlane.xlu0 %175  ;;  %v210_v38 = vpop.xlane.xlu1 %209  ;;  %v501_v34 = vld [vmem:[%s7605_s1 + $0x10] sm:$0xff] }
  0xf3   :  { %v232_v42 = vmul.f32 0.03125, %v176_v35  ;;  %v243_v43 = vmul.f32 0.03125, %v210_v38  ;;  %v275_v44 = vmul.f32 %v5941_v31, %v5941_v31  ;;  %v286_v16 = vmul.f32 %v5944_v13, %v5944_v13  ;;  %4835 = vmatpush3.msra.mxu0 %v502_v22  ;;  %4876 = vmatpush3.msra.mxu1 %v502_v22 }
  0xf4   :  { %4836 = vmatprep.subr.mxu0 %v7622_v19  ;;  %4877 = vmatprep.subr.mxu1 %v7622_v19 }
  0xf5   :  { %v5953_v45 = vsub.f32 %v5813_v20, %v232_v42  ;;  %v5956_v17 = vsub.f32 %v5818_v21, %v243_v43  ;;  %v305_v46 = vsel %vm158_vm0, %v275_v44, 0.0  ;;  %v338_v51 = vsel %vm158_vm0, %v286_v16, 0.0  ;;  %4837 = vmatpush3.msra.mxu0 %v501_v34  ;;  %v500_v42 = vld [vmem:[%s7605_s1 + $0x8] sm:$0xff]  ;;  %4878 = vmatpush3.msra.mxu1 %v501_v34 }
  0xf6   :  { %336 = vadd.xlane.f32.xlu1 %v335_v39  ;;  %306 = vadd.xlane.f32.xlu0 %v305_v46  ;;  %v179_v47 = vpop.xlane.xlu0 %178  ;;  %v213_v50 = vpop.xlane.xlu1 %212 }
  0xf7   :  { %v233_v52 = vmul.f32 0.03125, %v179_v47  ;;  %v244_v53 = vmul.f32 0.03125, %v213_v50  ;;  %v276_v54 = vmul.f32 %v5953_v45, %v5953_v45  ;;  %v287_v20 = vmul.f32 %v5956_v17, %v5956_v17  ;;  %4838 = vmatprep.subr.mxu0 %v7622_v19  ;;  %4879 = vmatprep.subr.mxu1 %v7622_v19  ;;  %v499_v50 = vld [vmem:[%s7605_s1] sm:$0xff] }
  0xf8   :  { %4839 = vmatpush3.msra.mxu0 %v500_v42  ;;  %4880 = vmatpush3.msra.mxu1 %v500_v42  ;;  %v6052_v42 = vld [vmem:[#allocation9] ss:$0 sm:$0xff] }
  0xf9   :  { %v5965_v55 = vsub.f32 %v5827_v24, %v233_v52  ;;  %v5968_v21 = vsub.f32 %v5832_v25, %v244_v53  ;;  %v308_v58 = vsel %vm158_vm0, %v276_v54, 0.0  ;;  %v341_v61 = vsel %vm158_vm0, %v287_v20, 0.0  ;;  %4840 = vmatprep.subr.mxu0 %v7622_v19  ;;  %4842 = vmatprep.mubr.msk.f32.mxu0 %vm5618_vm2, %v7622_v19 }
  0xfa   :  { %339 = vadd.xlane.f32.xlu1 %v338_v51  ;;  %309 = vadd.xlane.f32.xlu0 %v308_v58  ;;  %v182_v59 = vpop.xlane.xlu0 %181  ;;  %v216_v60 = vpop.xlane.xlu1 %215 }
  0xfb   :  { %v234_v62 = vmul.f32 0.03125, %v182_v59  ;;  %v245_v63 = vmul.f32 0.03125, %v216_v60  ;;  %v277_v0 = vmul.f32 %v5965_v55, %v5965_v55  ;;  %v288_v24 = vmul.f32 %v5968_v21, %v5968_v21  ;;  %4841 = vmatpush3.msra.mxu0 %v499_v50  ;;  %4881 = vmatprep.subr.mxu1 %v7622_v19 }
  0xfc   :  { %4882 = vmatpush3.msra.mxu1 %v499_v50  ;;  %4883 = vmatprep.mubr.msk.f32.mxu1 %vm5618_vm2, %v7622_v19 }
  0xfd   :  { %v5977_v1 = vsub.f32 %v5841_v28, %v234_v62  ;;  %v5980_v25 = vsub.f32 %v5846_v29, %v245_v63  ;;  %v311_v4 = vsel %vm158_vm0, %v277_v0, 0.0  ;;  %v344_v7 = vsel %vm158_vm0, %v288_v24, 0.0  ;;  %4916 = vmatprep.subr.mxu0 %v7622_v19  ;;  %4957 = vmatprep.subr.mxu1 %v7622_v19 }
  0xfe   :  { %342 = vadd.xlane.f32.xlu1 %v341_v61  ;;  %312 = vadd.xlane.f32.xlu0 %v311_v4  ;;  %v185_v5 = vpop.xlane.xlu0 %184  ;;  %v219_v6 = vpop.xlane.xlu1 %218 }
  0xff   :  { %v235_v10 = vmul.f32 0.03125, %v185_v5  ;;  %v246_v11 = vmul.f32 0.03125, %v219_v6  ;;  %v278_v14 = vmul.f32 %v5977_v1, %v5977_v1  ;;  %v289_v28 = vmul.f32 %v5980_v25, %v5980_v25 }
 0x101   :  { %v5989_v8 = vsub.f32 %v5855_v32, %v235_v10  ;;  %v5992_v29 = vsub.f32 %v5860_v33, %v246_v11  ;;  %v314_v18 = vsel %vm158_vm0, %v278_v14, 0.0  ;;  %v347_v32 = vsel %vm158_vm0, %v289_v28, 0.0 }
 0x102   :  { %345 = vadd.xlane.f32.xlu1 %v344_v7  ;;  %315 = vadd.xlane.f32.xlu0 %v314_v18  ;;  %v188_v23 = vpop.xlane.xlu0 %187  ;;  %v222_v26 = vpop.xlane.xlu1 %221 }
 0x103   :  { %v236_v27 = vmul.f32 0.03125, %v188_v23  ;;  %v247_v33 = vmul.f32 0.03125, %v222_v26  ;;  %v279_v30 = vmul.f32 %v5989_v8, %v5989_v8  ;;  %v290_v12 = vmul.f32 %v5992_v29, %v5992_v29 }
 0x105   :  { %v6011_v35 = vsub.f32 %v5869_v36, %v236_v27  ;;  %v6014_v38 = vsub.f32 %v5874_v37, %v247_v33  ;;  %v317_v39 = vsel %vm158_vm0, %v279_v30, 0.0  ;;  %v350_v16 = vsel %vm158_vm0, %v290_v12, 0.0 }
 0x106   :  { %348 = vadd.xlane.f32.xlu1 %v347_v32  ;;  %318 = vadd.xlane.f32.xlu0 %v317_v39  ;;  %v192_v43 = vpop.xlane.xlu0 %191  ;;  %v225_v44 = vpop.xlane.xlu1 %224 }
 0x107   :  { %v237_v46 = vmul.f32 0.03125, %v192_v43  ;;  %v248_v36 = vmul.f32 0.03125, %v225_v44  ;;  %v280_v37 = vmul.f32 %v6011_v35, %v6011_v35  ;;  %v291_v47 = vmul.f32 %v6014_v38, %v6014_v38 }
 0x109   :  { %v6031_v51 = vsub.f32 %v5883_v40, %v237_v46  ;;  %v6034_v52 = vsub.f32 %v5888_v41, %v248_v36  ;;  %v320_v53 = vsel %vm158_vm0, %v280_v37, 0.0  ;;  %v353_v54 = vsel %vm158_vm0, %v291_v47, 0.0  ;;  %v6055_v37 = vld [vmem:[#allocation9 + $0x1] ss:$0 sm:$0xff] }
 0x10a   :  { %351 = vadd.xlane.f32.xlu1 %v350_v16  ;;  %321 = vadd.xlane.f32.xlu0 %v320_v53 }
 0x10b   :  { %v281_v20 = vmul.f32 %v6031_v51, %v6031_v51  ;;  %v292_v40 = vmul.f32 %v6034_v52, %v6034_v52 }
 0x10d   :  { %v323_v41 = vsel %vm189_vm1, %v281_v20, 0.0  ;;  %v356_v58 = vsel %vm189_vm1, %v292_v40, 0.0 }
 0x10e   :  { %354 = vadd.xlane.f32.xlu1 %v353_v54  ;;  %324 = vadd.xlane.f32.xlu0 %v323_v41 }
 0x112   :  { %357 = vadd.xlane.f32.xlu1 %v356_v58 }
 0x16f   :  { %v295_v59 = vpop.xlane.xlu0 %294 }
 0x170   :  { %v359_v60 = vmul.f32 0.03125, %v295_v59 }
 0x172   :  { %v381_v61 = vadd.f32 1e-05, %v359_v60 }
 0x173   :  { %v328_v62 = vpop.xlane.xlu1 %327  ;;  %v298_v63 = vpop.xlane.xlu0 %297 }
 0x174   :  { %5399 = vrsqrt.f32 %v381_v61  ;;  %v370_v0 = vmul.f32 0.03125, %v328_v62  ;;  %v360_v24 = vmul.f32 0.03125, %v298_v63 }
 0x176   :  { %v392_v4 = vadd.f32 1e-05, %v370_v0  ;;  %v382_v5 = vadd.f32 1e-05, %v360_v24 }
 0x177   :  { %v331_v6 = vpop.xlane.xlu1 %330  ;;  %v301_v7 = vpop.xlane.xlu0 %300 }
 0x178   :  { %5401 = vrsqrt.f32 %v392_v4  ;;  %v371_v10 = vmul.f32 0.03125, %v331_v6  ;;  %v361_v11 = vmul.f32 0.03125, %v301_v7  ;;  %v813_v4 = vld [vmem:[%s7606_s2 + $0x10] sm:$0xff] }
 0x179   :  { %5403 = vrsqrt.f32 %v382_v5 }
 0x17a   :  { %v393_v14 = vadd.f32 1e-05, %v371_v10  ;;  %v383_v28 = vadd.f32 1e-05, %v361_v11 }
 0x17b   :  { %v334_v18 = vpop.xlane.xlu1 %333  ;;  %v304_v22 = vpop.xlane.xlu0 %303 }
 0x17c   :  { %5405 = vrsqrt.f32 %v393_v14  ;;  %v372_v23 = vmul.f32 0.03125, %v334_v18  ;;  %v362_v26 = vmul.f32 0.03125, %v304_v22 }
 0x17d   :  { %5407 = vrsqrt.f32 %v383_v28 }
 0x17e   :  { %v394_v32 = vadd.f32 1e-05, %v372_v23  ;;  %v384_v27 = vadd.f32 1e-05, %v362_v26 }
 0x17f   :  { %v337_v33 = vpop.xlane.xlu1 %336  ;;  %v307_v30 = vpop.xlane.xlu0 %306 }
 0x180   :  { %5409 = vrsqrt.f32 %v394_v32  ;;  %v373_v12 = vmul.f32 0.03125, %v337_v33  ;;  %v363_v34 = vmul.f32 0.03125, %v307_v30 }
 0x181   :  { %v5400_v39 = vpop.eup %5399  ;;  %5411 = vrsqrt.f32 %v384_v27 }
 0x182   :  { %v395_v43 = vadd.f32 1e-05, %v373_v12  ;;  %v385_v44 = vadd.f32 1e-05, %v363_v34  ;;  %v425_v16 = vmul.f32 %v5400_v39, %v5895_v48  ;;  %v814_v48 = vld [vmem:[%s7606_s2 + $0x18] sm:$0xff] }
 0x183   :  { %v340_v46 = vpop.xlane.xlu1 %339  ;;  %v310_v36 = vpop.xlane.xlu0 %309 }
 0x184   :  { %5413 = vrsqrt.f32 %v395_v43  ;;  %v374_v47 = vmul.f32 0.03125, %v340_v46  ;;  %v364_v50 = vmul.f32 0.03125, %v310_v36  ;;  %v451_v53 = vmul.f32 %v6052_v42, %v425_v16 }
 0x185   :  { %v5402_v54 = vpop.eup %5401  ;;  %5415 = vrsqrt.f32 %v385_v44 }
 0x186   :  { %v5404_v20 = vpop.eup %5403  ;;  %v396_v40 = vadd.f32 1e-05, %v374_v47  ;;  %v386_v41 = vadd.f32 1e-05, %v364_v50  ;;  %v477_v58 = vadd.f32 %v6055_v37, %v451_v53  ;;  %v436_v59 = vmul.f32 %v5402_v54, %v5905_v56 }
 0x187   :  { %v343_v60 = vpop.xlane.xlu1 %342  ;;  %v313_v61 = vpop.xlane.xlu0 %312  ;;  %v426_v62 = vmul.f32 %v5404_v20, %v5898_v49 }
 0x188   :  { %5417 = vrsqrt.f32 %v396_v40  ;;  %v375_v63 = vmul.f32 0.03125, %v343_v60  ;;  %v365_v0 = vmul.f32 0.03125, %v313_v61  ;;  %4843 = vmatmul.mubr.msk.f32.vlgmr.msra.gmra.mxu0 %vm158_vm0, %v477_v58  ;;  %v462_v24 = vmul.f32 %v6052_v42, %v436_v59 }
 0x189   :  { %v5406_v56 = vpop.eup %5405  ;;  %5419 = vrsqrt.f32 %v386_v41  ;;  %4845 = vmatprep.mubr.msk.f32.mxu0 %vm5618_vm2, %v7622_v19  ;;  %v452_v5 = vmul.f32 %v6052_v42, %v426_v62  ;;  %4917 = vmatpush3.msra.mxu0 %v814_v48 }
 0x18a   :  { %v5408_v49 = vpop.eup %5407  ;;  %v397_v6 = vadd.f32 1e-05, %v375_v63  ;;  %v387_v7 = vadd.f32 1e-05, %v365_v0  ;;  %v488_v10 = vadd.f32 %v6055_v37, %v462_v24  ;;  %v437_v11 = vmul.f32 %v5406_v56, %v5908_v57  ;;  %4918 = vmatprep.subr.mxu0 %v7622_v19  ;;  %v812_v57 = vld [vmem:[%s7606_s2 + $0x8] sm:$0xff] }
 0x18b   :  { %v346_v14 = vpop.xlane.xlu1 %345  ;;  %v316_v28 = vpop.xlane.xlu0 %315  ;;  %v478_v18 = vadd.f32 %v6055_v37, %v452_v5  ;;  %v427_v22 = vmul.f32 %v5408_v49, %v5917_v2  ;;  %4919 = vmatpush3.msra.mxu0 %v813_v4 }
 0x18c   :  { %5421 = vrsqrt.f32 %v397_v6  ;;  %v376_v23 = vmul.f32 0.03125, %v346_v14  ;;  %v366_v26 = vmul.f32 0.03125, %v316_v28  ;;  %4884 = vmatmul.mubr.msk.f32.vlgmr.msra.gmra.mxu1 %vm158_vm0, %v488_v10  ;;  %v463_v32 = vmul.f32 %v6052_v42, %v437_v11  ;;  %4920 = vmatprep.subr.mxu0 %v7622_v19 }
 0x18d   :  { %v5410_v27 = vpop.eup %5409  ;;  %5423 = vrsqrt.f32 %v387_v7  ;;  %4846 = vmatmul.mubr.msk.f32.gmra.mxu0 %vm158_vm0, %v478_v18  ;;  %4886 = vmatprep.mubr.msk.f32.mxu1 %vm5618_vm2, %v7622_v19  ;;  %v453_v2 = vmul.f32 %v6052_v42, %v427_v22 }
 0x18e   :  { %v5412_v33 = vpop.eup %5411  ;;  %v398_v30 = vadd.f32 1e-05, %v376_v23  ;;  %v388_v12 = vadd.f32 1e-05, %v366_v26  ;;  %4848 = vmatprep.mubr.msk.f32.mxu0 %vm5618_vm2, %v7622_v19  ;;  %v489_v34 = vadd.f32 %v6055_v37, %v463_v32  ;;  %v438_v39 = vmul.f32 %v5410_v27, %v5920_v3  ;;  %4958 = vmatpush3.msra.mxu1 %v814_v48 }
 0x18f   :  { %v349_v43 = vpop.xlane.xlu1 %348  ;;  %v319_v44 = vpop.xlane.xlu0 %318  ;;  %v479_v16 = vadd.f32 %v6055_v37, %v453_v2  ;;  %v428_v46 = vmul.f32 %v5412_v33, %v5929_v15  ;;  %4959 = vmatprep.subr.mxu1 %v7622_v19  ;;  %4921 = vmatpush3.msra.mxu0 %v812_v57 }
 0x190   :  { %5425 = vrsqrt.f32 %v398_v30  ;;  %v377_v36 = vmul.f32 0.03125, %v349_v43  ;;  %v367_v47 = vmul.f32 0.03125, %v319_v44  ;;  %4887 = vmatmul.mubr.msk.f32.gmra.mxu1 %vm158_vm0, %v489_v34  ;;  %v464_v50 = vmul.f32 %v6052_v42, %v438_v39  ;;  %4922 = vmatprep.subr.mxu0 %v7622_v19 }
 0x191   :  { %v5414_v3 = vpop.eup %5413  ;;  %5427 = vrsqrt.f32 %v388_v12  ;;  %4849 = vmatmul.mubr.msk.f32.gmra.mxu0 %vm158_vm0, %v479_v16  ;;  %4889 = vmatprep.mubr.msk.f32.mxu1 %vm5618_vm2, %v7622_v19  ;;  %v454_v15 = vmul.f32 %v6052_v42, %v428_v46 }
 0x192   :  { %v5416_v53 = vpop.eup %5415  ;;  %v399_v54 = vadd.f32 1e-05, %v377_v36  ;;  %v389_v20 = vadd.f32 1e-05, %v367_v47  ;;  %4851 = vmatprep.mubr.msk.f32.mxu0 %vm5618_vm2, %v7622_v19  ;;  %v490_v40 = vadd.f32 %v6055_v37, %v464_v50  ;;  %v439_v41 = vmul.f32 %v5414_v3, %v5932_v9  ;;  %4960 = vmatpush3.msra.mxu1 %v813_v4 }
 0x193   :  { %v352_v58 = vpop.xlane.xlu1 %351  ;;  %v322_v59 = vpop.xlane.xlu0 %321  ;;  %v480_v48 = vadd.f32 %v6055_v37, %v454_v15  ;;  %v429_v60 = vmul.f32 %v5416_v53, %v5941_v31  ;;  %4961 = vmatprep.subr.mxu1 %v7622_v19 }
 0x194   :  { %5429 = vrsqrt.f32 %v399_v54  ;;  %v378_v61 = vmul.f32 0.03125, %v352_v58  ;;  %v368_v62 = vmul.f32 0.03125, %v322_v59  ;;  %4890 = vmatmul.mubr.msk.f32.gmra.mxu1 %vm158_vm0, %v490_v40  ;;  %v465_v63 = vmul.f32 %v6052_v42, %v439_v41 }
 0x195   :  { %v5418_v0 = vpop.eup %5417  ;;  %5431 = vrsqrt.f32 %v389_v20  ;;  %4852 = vmatmul.mubr.msk.f32.gmra.mxu0 %vm158_vm0, %v480_v48  ;;  %4892 = vmatprep.mubr.msk.f32.mxu1 %vm5618_vm2, %v7622_v19  ;;  %v455_v9 = vmul.f32 %v6052_v42, %v429_v60 }
 0x196   :  { %v5420_v24 = vpop.eup %5419  ;;  %v400_v31 = vadd.f32 1e-05, %v378_v61  ;;  %v390_v4 = vadd.f32 1e-05, %v368_v62  ;;  %4854 = vmatprep.mubr.msk.f32.mxu0 %vm5618_vm2, %v7622_v19  ;;  %v491_v56 = vadd.f32 %v6055_v37, %v465_v63  ;;  %v440_v5 = vmul.f32 %v5418_v0, %v5944_v13  ;;  %4962 = vmatpush3.msra.mxu1 %v812_v57 }
 0x197   :  { %v355_v49 = vpop.xlane.xlu1 %354  ;;  %v325_v6 = vpop.xlane.xlu0 %324  ;;  %v481_v7 = vadd.f32 %v6055_v37, %v455_v9  ;;  %v430_v10 = vmul.f32 %v5420_v24, %v5953_v45  ;;  %4963 = vmatprep.subr.mxu1 %v7622_v19 }
 0x198   :  { %5433 = vrsqrt.f32 %v400_v31  ;;  %v379_v11 = vmul.f32 0.03125, %v355_v49  ;;  %v369_v14 = vmul.f32 0.03125, %v325_v6  ;;  %4893 = vmatmul.mubr.msk.f32.gmra.mxu1 %vm158_vm0, %v491_v56  ;;  %v466_v28 = vmul.f32 %v6052_v42, %v440_v5 }
 0x199   :  { %v5422_v18 = vpop.eup %5421  ;;  %5435 = vrsqrt.f32 %v390_v4  ;;  %4855 = vmatmul.mubr.msk.f32.gmra.mxu0 %vm158_vm0, %v481_v7  ;;  %4895 = vmatprep.mubr.msk.f32.mxu1 %vm5618_vm2, %v7622_v19  ;;  %v456_v13 = vmul.f32 %v6052_v42, %v430_v10 }
 0x19a   :  { %v5424_v22 = vpop.eup %5423  ;;  %v401_v45 = vadd.f32 1e-05, %v379_v11  ;;  %v391_v23 = vadd.f32 1e-05, %v369_v14  ;;  %4857 = vmatprep.mubr.msk.f32.mxu0 %vm5618_vm2, %v7622_v19  ;;  %v492_v26 = vadd.f32 %v6055_v37, %v466_v28  ;;  %v441_v32 = vmul.f32 %v5422_v18, %v5956_v17 }
 0x19b   :  { %v358_v57 = vpop.xlane.xlu1 %357  ;;  %v482_v27 = vadd.f32 %v6055_v37, %v456_v13  ;;  %v431_v2 = vmul.f32 %v5424_v22, %v5965_v55 }
 0x19c   :  { %5437 = vrsqrt.f32 %v401_v45  ;;  %v380_v33 = vmul.f32 0.03125, %v358_v57  ;;  %4896 = vmatmul.mubr.msk.f32.gmra.mxu1 %vm158_vm0, %v492_v26  ;;  %v467_v30 = vmul.f32 %v6052_v42, %v441_v32 }
 0x19d   :  { %v5426_v12 = vpop.eup %5425  ;;  %5439 = vrsqrt.f32 %v391_v23  ;;  %4858 = vmatmul.mubr.msk.f32.gmra.mxu0 %vm158_vm0, %v482_v27  ;;  %4898 = vmatprep.mubr.msk.f32.mxu1 %vm5618_vm2, %v7622_v19  ;;  %v457_v17 = vmul.f32 %v6052_v42, %v431_v2 }
 0x19e   :  { %v5428_v34 = vpop.eup %5427  ;;  %v402_v39 = vadd.f32 1e-05, %v380_v33  ;;  %4860 = vmatprep.mubr.msk.f32.mxu0 %vm5618_vm2, %v7622_v19  ;;  %v493_v55 = vadd.f32 %v6055_v37, %v467_v30  ;;  %v442_v43 = vmul.f32 %v5426_v12, %v5968_v21 }
 0x19f   :  { %v483_v44 = vadd.f32 %v6055_v37, %v457_v17  ;;  %v432_v16 = vmul.f32 %v5428_v34, %v5977_v1 }
 0x1a0   :  { %5441 = vrsqrt.f32 %v402_v39  ;;  %4899 = vmatmul.mubr.msk.f32.gmra.mxu1 %vm158_vm0, %v493_v55  ;;  %v468_v46 = vmul.f32 %v6052_v42, %v442_v43 }
 0x1a1   :  { %v5430_v36 = vpop.eup %5429  ;;  %4861 = vmatmul.mubr.msk.f32.gmra.mxu0 %vm158_vm0, %v483_v44  ;;  %4901 = vmatprep.mubr.msk.f32.mxu1 %vm5618_vm2, %v7622_v19  ;;  %v458_v47 = vmul.f32 %v6052_v42, %v432_v16 }
 0x1a2   :  { %v5432_v50 = vpop.eup %5431  ;;  %4863 = vmatprep.mubr.msk.f32.mxu0 %vm5618_vm2, %v7622_v19  ;;  %v494_v21 = vadd.f32 %v6055_v37, %v468_v46  ;;  %v443_v1 = vmul.f32 %v5430_v36, %v5980_v25 }
 0x1a3   :  { %v484_v3 = vadd.f32 %v6055_v37, %v458_v47  ;;  %v433_v15 = vmul.f32 %v5432_v50, %v5989_v8 }
 0x1a4   :  { %4902 = vmatmul.mubr.msk.f32.gmra.mxu1 %vm158_vm0, %v494_v21  ;;  %v469_v53 = vmul.f32 %v6052_v42, %v443_v1 }
 0x1a5   :  { %v5434_v54 = vpop.eup %5433  ;;  %4864 = vmatmul.mubr.msk.f32.gmra.mxu0 %vm158_vm0, %v484_v3  ;;  %4904 = vmatprep.mubr.msk.f32.mxu1 %vm5618_vm2, %v7622_v19  ;;  %v459_v20 = vmul.f32 %v6052_v42, %v433_v15 }
 0x1a6   :  { %v5436_v40 = vpop.eup %5435  ;;  %4866 = vmatprep.mubr.msk.f32.mxu0 %vm5618_vm2, %v7622_v19  ;;  %v495_v25 = vadd.f32 %v6055_v37, %v469_v53  ;;  %v444_v8 = vmul.f32 %v5434_v54, %v5992_v29 }
 0x1a7   :  { %v485_v41 = vadd.f32 %v6055_v37, %v459_v20  ;;  %v434_v58 = vmul.f32 %v5436_v40, %v6011_v35 }
 0x1a8   :  { %4905 = vmatmul.mubr.msk.f32.gmra.mxu1 %vm158_vm0, %v495_v25  ;;  %v470_v59 = vmul.f32 %v6052_v42, %v444_v8 }
 0x1a9   :  { %v5438_v48 = vpop.eup %5437  ;;  %4867 = vmatmul.mubr.msk.f32.gmra.mxu0 %vm158_vm0, %v485_v41  ;;  %4907 = vmatprep.mubr.msk.f32.mxu1 %vm5618_vm2, %v7622_v19  ;;  %v460_v60 = vmul.f32 %v6052_v42, %v434_v58 }
 0x1aa   :  { %v5440_v61 = vpop.eup %5439  ;;  %4869 = vmatprep.mubr.msk.f32.mxu0 %vm5618_vm2, %v7622_v19  ;;  %v496_v29 = vadd.f32 %v6055_v37, %v470_v59  ;;  %v445_v35 = vmul.f32 %v5438_v48, %v6014_v38 }
 0x1ab   :  { %v486_v62 = vadd.f32 %v6055_v37, %v460_v60  ;;  %v435_v63 = vmul.f32 %v5440_v61, %v6031_v51 }
 0x1ac   :  { %4908 = vmatmul.mubr.msk.f32.gmra.mxu1 %vm158_vm0, %v496_v29  ;;  %v471_v0 = vmul.f32 %v6052_v42, %v445_v35 }
 0x1ad   :  { %v5442_v9 = vpop.eup %5441  ;;  %4870 = vmatmul.mubr.msk.f32.gmra.mxu0 %vm158_vm0, %v486_v62  ;;  %4910 = vmatprep.mubr.msk.f32.mxu1 %vm5618_vm2, %v7622_v19  ;;  %v461_v24 = vmul.f32 %v6052_v42, %v435_v63 }
 0x1ae   :  { %4872 = vmatprep.mubr.msk.f32.mxu0 %vm5618_vm2, %v7622_v19  ;;  %v497_v38 = vadd.f32 %v6055_v37, %v471_v0  ;;  %v446_v31 = vmul.f32 %v5442_v9, %v6034_v52  ;;  %v811_v52 = vld [vmem:[%s7606_s2] sm:$0xff]  ;;  %s809_s2 = sld [smem:[#allocation12]] }
 0x1af   :  { %v487_v51 = vadd.f32 %v6055_v37, %v461_v24  ;;  %4923 = vmatpush3.msra.mxu0 %v811_v52  ;;  %4964 = vmatpush3.msra.mxu1 %v811_v52 }
 0x1b0   :  { %4911 = vmatmul.mubr.msk.f32.gmra.mxu1 %vm158_vm0, %v497_v38  ;;  %v472_v4 = vmul.f32 %v6052_v42, %v446_v31  ;;  %4998 = vmatprep.subr.mxu0 %v7622_v19 }
 0x1b1   :  { %4873 = vmatmul.mubr.msk.f32.gmra.mxu0 %vm158_vm0, %v487_v51  ;;  %4913 = vmatprep.mubr.msk.f32.mxu1 %vm5618_vm2, %v7622_v19 }
 0x1b2   :  { %v498_v56 = vadd.f32 %v6055_v37, %v472_v4  ;;  %4924 = vmatprep.mubr.msk.f32.mxu0 %vm5618_vm2, %v7622_v19  ;;  %5039 = vmatprep.subr.mxu1 %v7622_v19 }
 0x1b4   :  { %4914 = vmatmul.mubr.msk.f32.gmra.mxu1 %vm158_vm0, %v498_v56 }
 0x1b5   :  { %4965 = vmatprep.mubr.msk.f32.mxu1 %vm5618_vm2, %v7622_v19 }
 0x248   :  { %v6208_v42 = vpop.f32.mrf.mxu0 }
 0x249   :  { %7639 = vst [vmem:[#allocation19_spill] sm:$0xff] %v6208_v42  ;;  %4925 = vmatmul.mubr.msk.f32.vlgmr.msra.gmra.mxu0 %vm158_vm0, %v6208_v42 }
 0x24a   :  { %v4844_v37 = vpop.f32.mrf.mxu0  ;;  %4927 = vmatprep.mubr.msk.f32.mxu0 %vm5618_vm2, %v7622_v19 }
 0x24c   :  { %v6214_v5 = vpop.f32.mrf.mxu1 }
 0x24d   :  { %7640 = vst [vmem:[#allocation20_spill] sm:$0xff] %v6214_v5  ;;  %v6216_v49 = vpop.f32.mrf.mxu0  ;;  %4966 = vmatmul.mubr.msk.f32.vlgmr.msra.gmra.mxu1 %vm158_vm0, %v6214_v5 }
 0x24e   :  { %7641 = vst [vmem:[#allocation21_spill] sm:$0xff] %v6216_v49  ;;  %4928 = vmatmul.mubr.msk.f32.gmra.mxu0 %vm158_vm0, %v6216_v49  ;;  %v4885_v6 = vpop.f32.mrf.mxu1  ;;  %4968 = vmatprep.mubr.msk.f32.mxu1 %vm5618_vm2, %v7622_v19 }
 0x24f   :  { %v4847_v7 = vpop.f32.mrf.mxu0  ;;  %4930 = vmatprep.mubr.msk.f32.mxu0 %vm5618_vm2, %v7622_v19 }
 0x250   :  { %v6226_v10 = vpop.f32.mrf.mxu1 }
 0x251   :  { %7642 = vst [vmem:[#allocation22_spill] sm:$0xff] %v6226_v10  ;;  %v6228_v11 = vpop.f32.mrf.mxu0  ;;  %4969 = vmatmul.mubr.msk.f32.gmra.mxu1 %vm158_vm0, %v6226_v10 }
 0x252   :  { %7643 = vst [vmem:[#allocation23_spill] sm:$0xff] %v6228_v11  ;;  %4931 = vmatmul.mubr.msk.f32.gmra.mxu0 %vm158_vm0, %v6228_v11  ;;  %v4888_v14 = vpop.f32.mrf.mxu1  ;;  %4971 = vmatprep.mubr.msk.f32.mxu1 %vm5618_vm2, %v7622_v19 }
 0x253   :  { %v4850_v28 = vpop.f32.mrf.mxu0  ;;  %4933 = vmatprep.mubr.msk.f32.mxu0 %vm5618_vm2, %v7622_v19 }
 0x254   :  { %v6238_v18 = vpop.f32.mrf.mxu1 }
 0x255   :  { %7644 = vst [vmem:[#allocation24_spill] sm:$0xff] %v6238_v18  ;;  %v6240_v13 = vpop.f32.mrf.mxu0  ;;  %4972 = vmatmul.mubr.msk.f32.gmra.mxu1 %vm158_vm0, %v6238_v18 }
 0x256   :  { %7645 = vst [vmem:[#allocation25_spill] sm:$0xff] %v6240_v13  ;;  %4934 = vmatmul.mubr.msk.f32.gmra.mxu0 %vm158_vm0, %v6240_v13  ;;  %v4891_v22 = vpop.f32.mrf.mxu1  ;;  %4974 = vmatprep.mubr.msk.f32.mxu1 %vm5618_vm2, %v7622_v19 }
 0x257   :  { %v4853_v45 = vpop.f32.mrf.mxu0  ;;  %4936 = vmatprep.mubr.msk.f32.mxu0 %vm5618_vm2, %v7622_v19 }
 0x258   :  { %v6250_v23 = vpop.f32.mrf.mxu1 }
 0x259   :  { %7646 = vst [vmem:[#allocation26_spill] sm:$0xff] %v6250_v23  ;;  %v6252_v26 = vpop.f32.mrf.mxu0  ;;  %4975 = vmatmul.mubr.msk.f32.gmra.mxu1 %vm158_vm0, %v6250_v23 }
 0x25a   :  { %7647 = vst [vmem:[#allocation27_spill] sm:$0xff] %v6252_v26  ;;  %4937 = vmatmul.mubr.msk.f32.gmra.mxu0 %vm158_vm0, %v6252_v26  ;;  %v4894_v32 = vpop.f32.mrf.mxu1  ;;  %4977 = vmatprep.mubr.msk.f32.mxu1 %vm5618_vm2, %v7622_v19 }
 0x25b   :  { %v4856_v57 = vpop.f32.mrf.mxu0  ;;  %4939 = vmatprep.mubr.msk.f32.mxu0 %vm5618_vm2, %v7622_v19 }
 0x25c   :  { %v6262_v27 = vpop.f32.mrf.mxu1 }
 0x25d   :  { %7648 = vst [vmem:[#allocation28_spill] sm:$0xff] %v6262_v27  ;;  %v6264_v2 = vpop.f32.mrf.mxu0  ;;  %4978 = vmatmul.mubr.msk.f32.gmra.mxu1 %vm158_vm0, %v6262_v27 }
 0x25e   :  { %7649 = vst [vmem:[#allocation29_spill] sm:$0xff] %v6264_v2  ;;  %4940 = vmatmul.mubr.msk.f32.gmra.mxu0 %vm158_vm0, %v6264_v2  ;;  %v4897_v33 = vpop.f32.mrf.mxu1  ;;  %4980 = vmatprep.mubr.msk.f32.mxu1 %vm5618_vm2, %v7622_v19 }
 0x25f   :  { %v4859_v30 = vpop.f32.mrf.mxu0  ;;  %4942 = vmatprep.mubr.msk.f32.mxu0 %vm5618_vm2, %v7622_v19 }
 0x260   :  { %v6274_v12 = vpop.f32.mrf.mxu1 }
 0x261   :  { %7650 = vst [vmem:[#allocation30_spill] sm:$0xff] %v6274_v12  ;;  %v6276_v17 = vpop.f32.mrf.mxu0  ;;  %4981 = vmatmul.mubr.msk.f32.gmra.mxu1 %vm158_vm0, %v6274_v12 }
 0x262   :  { %4943 = vmatmul.mubr.msk.f32.gmra.mxu0 %vm158_vm0, %v6276_v17  ;;  %v4900_v34 = vpop.f32.mrf.mxu1  ;;  %4983 = vmatprep.mubr.msk.f32.mxu1 %vm5618_vm2, %v7622_v19 }
 0x263   :  { %v4862_v39 = vpop.f32.mrf.mxu0  ;;  %4945 = vmatprep.mubr.msk.f32.mxu0 %vm5618_vm2, %v7622_v19 }
 0x264   :  { %v6286_v55 = vpop.f32.mrf.mxu1 }
 0x265   :  { %7651 = vst [vmem:[#allocation31_spill] sm:$0xff] %v6286_v55  ;;  %v6288_v43 = vpop.f32.mrf.mxu0  ;;  %4984 = vmatmul.mubr.msk.f32.gmra.mxu1 %vm158_vm0, %v6286_v55 }
 0x266   :  { %4946 = vmatmul.mubr.msk.f32.gmra.mxu0 %vm158_vm0, %v6288_v43  ;;  %v4903_v44 = vpop.f32.mrf.mxu1  ;;  %4986 = vmatprep.mubr.msk.f32.mxu1 %vm5618_vm2, %v7622_v19 }
 0x267   :  { %v4865_v16 = vpop.f32.mrf.mxu0  ;;  %4948 = vmatprep.mubr.msk.f32.mxu0 %vm5618_vm2, %v7622_v19 }
 0x268   :  { %v6298_v46 = vpop.f32.mrf.mxu1 }
 0x269   :  { %v6300_v36 = vpop.f32.mrf.mxu0  ;;  %4987 = vmatmul.mubr.msk.f32.gmra.mxu1 %vm158_vm0, %v6298_v46 }
 0x26a   :  { %4949 = vmatmul.mubr.msk.f32.gmra.mxu0 %vm158_vm0, %v6300_v36  ;;  %v4906_v47 = vpop.f32.mrf.mxu1  ;;  %4989 = vmatprep.mubr.msk.f32.mxu1 %vm5618_vm2, %v7622_v19 }
 0x26b   :  { %v4868_v50 = vpop.f32.mrf.mxu0  ;;  %4951 = vmatprep.mubr.msk.f32.mxu0 %vm5618_vm2, %v7622_v19 }
 0x26c   :  { %v6310_v21 = vpop.f32.mrf.mxu1 }
 0x26d   :  { %v6312_v1 = vpop.f32.mrf.mxu0  ;;  %4990 = vmatmul.mubr.msk.f32.gmra.mxu1 %vm158_vm0, %v6310_v21 }
 0x26e   :  { %4952 = vmatmul.mubr.msk.f32.gmra.mxu0 %vm158_vm0, %v6312_v1  ;;  %v4909_v3 = vpop.f32.mrf.mxu1  ;;  %4992 = vmatprep.mubr.msk.f32.mxu1 %vm5618_vm2, %v7622_v19 }
 0x26f   :  { %v4871_v15 = vpop.f32.mrf.mxu0  ;;  %4954 = vmatprep.mubr.msk.f32.mxu0 %vm5618_vm2, %v7622_v19 }
 0x270   :  { %v6322_v53 = vpop.f32.mrf.mxu1 }
 0x271   :  { %v6324_v54 = vpop.f32.mrf.mxu0  ;;  %4993 = vmatmul.mubr.msk.f32.gmra.mxu1 %vm158_vm0, %v6322_v53 }
 0x272   :  { %4955 = vmatmul.mubr.msk.f32.gmra.mxu0 %vm158_vm0, %v6324_v54  ;;  %v4912_v20 = vpop.f32.mrf.mxu1  ;;  %4995 = vmatprep.mubr.msk.f32.mxu1 %vm5618_vm2, %v7622_v19 }
 0x273   :  { %v4874_v40 = vpop.f32.mrf.mxu0  ;;  %5006 = vmatprep.mubr.msk.f32.mxu0 %vm5618_vm2, %v7622_v19 }
 0x274   :  { %v6334_v25 = vpop.f32.mrf.mxu1 }
 0x275   :  { %4996 = vmatmul.mubr.msk.f32.gmra.mxu1 %vm158_vm0, %v6334_v25 }
 0x276   :  { %v4915_v8 = vpop.f32.mrf.mxu1  ;;  %5047 = vmatprep.mubr.msk.f32.mxu1 %vm5618_vm2, %v7622_v19 }
 0x309   :  { %v6340_v41 = vpop.f32.mrf.mxu0 }
 0x30a   :  { %v1123_v58 = vsel %vm158_vm0, %v6340_v41, 0.0 }
 0x30b   :  { %1124 = vadd.xlane.f32.xlu0 %v1123_v58  ;;  %v4926_v59 = vpop.f32.mrf.mxu0 }
 0x30d   :  { %v6344_v48 = vpop.f32.mrf.mxu1 }
 0x30e   :  { %v6346_v60 = vpop.f32.mrf.mxu0  ;;  %v1156_v61 = vsel %vm158_vm0, %v6344_v48, 0.0 }
 0x30f   :  { %v4967_v29 = vpop.f32.mrf.mxu1  ;;  %1157 = vadd.xlane.f32.xlu0 %v1156_v61  ;;  %v1126_v35 = vsel %vm158_vm0, %v6346_v60, 0.0 }
 0x310   :  { %1127 = vadd.xlane.f32.xlu1 %v1126_v35  ;;  %v4929_v62 = vpop.f32.mrf.mxu0 }
 0x311   :  { %v6352_v63 = vpop.f32.mrf.mxu1 }
 0x312   :  { %v6354_v0 = vpop.f32.mrf.mxu0  ;;  %v1159_v9 = vsel %vm158_vm0, %v6352_v63, 0.0 }
 0x313   :  { %v4970_v24 = vpop.f32.mrf.mxu1  ;;  %v1129_v38 = vsel %vm158_vm0, %v6354_v0, 0.0 }
 0x314   :  { %1160 = vadd.xlane.f32.xlu1 %v1159_v9  ;;  %1130 = vadd.xlane.f32.xlu0 %v1129_v38  ;;  %v4932_v31 = vpop.f32.mrf.mxu0 }
 0x315   :  { %v6360_v51 = vpop.f32.mrf.mxu1 }
 0x316   :  { %v6362_v4 = vpop.f32.mrf.mxu0  ;;  %v1162_v56 = vsel %vm158_vm0, %v6360_v51, 0.0 }
 0x317   :  { %v4973_v52 = vpop.f32.mrf.mxu1  ;;  %v1132_v37 = vsel %vm158_vm0, %v6362_v4, 0.0 }
 0x318   :  { %1163 = vadd.xlane.f32.xlu1 %v1162_v56  ;;  %1133 = vadd.xlane.f32.xlu0 %v1132_v37  ;;  %v4935_v6 = vpop.f32.mrf.mxu0 }
 0x319   :  { %v6368_v7 = vpop.f32.mrf.mxu1 }
 0x31a   :  { %v6370_v14 = vpop.f32.mrf.mxu0  ;;  %v1165_v28 = vsel %vm158_vm0, %v6368_v7, 0.0 }
 0x31b   :  { %v4976_v22 = vpop.f32.mrf.mxu1  ;;  %v1135_v45 = vsel %vm158_vm0, %v6370_v14, 0.0 }
 0x31c   :  { %1166 = vadd.xlane.f32.xlu1 %v1165_v28  ;;  %1136 = vadd.xlane.f32.xlu0 %v1135_v45  ;;  %v4938_v32 = vpop.f32.mrf.mxu0 }
 0x31d   :  { %v6376_v57 = vpop.f32.mrf.mxu1 }
 0x31e   :  { %v6378_v33 = vpop.f32.mrf.mxu0  ;;  %v1168_v30 = vsel %vm158_vm0, %v6376_v57, 0.0 }
 0x31f   :  { %v4979_v34 = vpop.f32.mrf.mxu1  ;;  %v1138_v39 = vsel %vm158_vm0, %v6378_v33, 0.0 }
 0x320   :  { %1169 = vadd.xlane.f32.xlu1 %v1168_v30  ;;  %1139 = vadd.xlane.f32.xlu0 %v1138_v39  ;;  %v4941_v44 = vpop.f32.mrf.mxu0 }
 0x321   :  { %v6384_v16 = vpop.f32.mrf.mxu1 }
 0x322   :  { %v6386_v47 = vpop.f32.mrf.mxu0  ;;  %v1171_v50 = vsel %vm158_vm0, %v6384_v16, 0.0 }
 0x323   :  { %v4982_v3 = vpop.f32.mrf.mxu1  ;;  %v1141_v15 = vsel %vm158_vm0, %v6386_v47, 0.0 }
 0x324   :  { %1172 = vadd.xlane.f32.xlu1 %v1171_v50  ;;  %1142 = vadd.xlane.f32.xlu0 %v1141_v15  ;;  %v4944_v20 = vpop.f32.mrf.mxu0 }
 0x325   :  { %v6392_v40 = vpop.f32.mrf.mxu1 }
 0x326   :  { %v6394_v8 = vpop.f32.mrf.mxu0  ;;  %v1174_v58 = vsel %vm158_vm0, %v6392_v40, 0.0 }
 0x327   :  { %v4985_v59 = vpop.f32.mrf.mxu1  ;;  %v1144_v61 = vsel %vm158_vm0, %v6394_v8, 0.0 }
 0x328   :  { %1175 = vadd.xlane.f32.xlu1 %v1174_v58  ;;  %1145 = vadd.xlane.f32.xlu0 %v1144_v61  ;;  %v4947_v29 = vpop.f32.mrf.mxu0 }
 0x329   :  { %v6400_v35 = vpop.f32.mrf.mxu1 }
 0x32a   :  { %v6402_v62 = vpop.f32.mrf.mxu0  ;;  %v1177_v9 = vsel %vm158_vm0, %v6400_v35, 0.0 }
 0x32b   :  { %v4988_v24 = vpop.f32.mrf.mxu1  ;;  %v1147_v38 = vsel %vm158_vm0, %v6402_v62, 0.0 }
 0x32c   :  { %1178 = vadd.xlane.f32.xlu1 %v1177_v9  ;;  %1148 = vadd.xlane.f32.xlu0 %v1147_v38  ;;  %v4950_v31 = vpop.f32.mrf.mxu0 }
 0x32d   :  { %v6408_v56 = vpop.f32.mrf.mxu1 }
 0x32e   :  { %v6410_v52 = vpop.f32.mrf.mxu0  ;;  %v1180_v37 = vsel %vm158_vm0, %v6408_v56, 0.0 }
 0x32f   :  { %v4991_v6 = vpop.f32.mrf.mxu1  ;;  %v1150_v28 = vsel %vm158_vm0, %v6410_v52, 0.0 }
 0x330   :  { %1181 = vadd.xlane.f32.xlu1 %v1180_v37  ;;  %1151 = vadd.xlane.f32.xlu0 %v1150_v28  ;;  %v4953_v22 = vpop.f32.mrf.mxu0 }
 0x331   :  { %v6416_v45 = vpop.f32.mrf.mxu1 }
 0x332   :  { %v6418_v32 = vpop.f32.mrf.mxu0  ;;  %v1183_v30 = vsel %vm158_vm0, %v6416_v45, 0.0 }
 0x333   :  { %v4994_v34 = vpop.f32.mrf.mxu1  ;;  %v1153_v39 = vsel %vm189_vm1, %v6418_v32, 0.0 }
 0x334   :  { %1184 = vadd.xlane.f32.xlu1 %v1183_v30  ;;  %1154 = vadd.xlane.f32.xlu0 %v1153_v39  ;;  %v4956_v44 = vpop.f32.mrf.mxu0 }
 0x335   :  { %v6424_v50 = vpop.f32.mrf.mxu1 }
 0x336   :  { %v1186_v3 = vsel %vm189_vm1, %v6424_v50, 0.0 }
 0x337   :  { %v4997_v15 = vpop.f32.mrf.mxu1 }
 0x338   :  { %1187 = vadd.xlane.f32.xlu1 %v1186_v3 }
 0x394   :  { %v1125_v20 = vpop.xlane.xlu0 %1124 }
 0x398   :  { %v1158_v58 = vpop.xlane.xlu0 %1157 }
 0x399   :  { %v1128_v59 = vpop.xlane.xlu1 %1127 }
 0x39a   :  { %v1189_v28 = vadd.f32 %v1128_v59, %v1125_v20 }
 0x39d   :  { %v1161_v61 = vpop.xlane.xlu1 %1160  ;;  %v1131_v29 = vpop.xlane.xlu0 %1130 }
 0x39e   :  { %v1190_v34 = vadd.f32 %v1189_v28, %v1131_v29  ;;  %v1207_v39 = vadd.f32 %v1161_v61, %v1158_v58 }
 0x3a1   :  { %v1164_v9 = vpop.xlane.xlu1 %1163  ;;  %v1134_v24 = vpop.xlane.xlu0 %1133 }
 0x3a2   :  { %v1191_v44 = vadd.f32 %v1190_v34, %v1134_v24  ;;  %v1208_v3 = vadd.f32 %v1207_v39, %v1164_v9 }
 0x3a5   :  { %v1167_v38 = vpop.xlane.xlu1 %1166  ;;  %v1137_v31 = vpop.xlane.xlu0 %1136 }
 0x3a6   :  { %v1192_v5 = vadd.f32 %v1191_v44, %v1137_v31  ;;  %v1209_v42 = vadd.f32 %v1208_v3, %v1167_v38 }
 0x3a9   :  { %v1170_v37 = vpop.xlane.xlu1 %1169  ;;  %v1140_v6 = vpop.xlane.xlu0 %1139 }
 0x3aa   :  { %v1193_v10 = vadd.f32 %v1192_v5, %v1140_v6  ;;  %v1210_v11 = vadd.f32 %v1209_v42, %v1170_v37 }
 0x3ad   :  { %v1173_v22 = vpop.xlane.xlu1 %1172  ;;  %v1143_v30 = vpop.xlane.xlu0 %1142 }
 0x3ae   :  { %v1194_v23 = vadd.f32 %v1193_v10, %v1143_v30  ;;  %v1211_v13 = vadd.f32 %v1210_v11, %v1173_v22 }
 0x3b1   :  { %v1176_v19 = vpop.xlane.xlu1 %1175  ;;  %v1146_v15 = vpop.xlane.xlu0 %1145 }
 0x3b2   :  { %v1195_v27 = vadd.f32 %v1194_v23, %v1146_v15  ;;  %v1212_v20 = vadd.f32 %v1211_v13, %v1176_v19 }
 0x3b5   :  { %v1179_v49 = vpop.xlane.xlu1 %1178  ;;  %v1149_v18 = vpop.xlane.xlu0 %1148 }
 0x3b6   :  { %v1196_v59 = vadd.f32 %v1195_v27, %v1149_v18  ;;  %v1213_v29 = vadd.f32 %v1212_v20, %v1179_v49 }
 0x3b9   :  { %v1182_v26 = vpop.xlane.xlu1 %1181  ;;  %v1152_v12 = vpop.xlane.xlu0 %1151 }
 0x3ba   :  { %v1197_v58 = vadd.f32 %v1196_v59, %v1152_v12  ;;  %v1214_v31 = vadd.f32 %v1213_v29, %v1182_v26 }
 0x3bd   :  { %v1185_v61 = vpop.xlane.xlu1 %1184  ;;  %v1155_v24 = vpop.xlane.xlu0 %1154 }
 0x3be   :  { %v1199_v9 = vsel %vm1198_vm3, %v1155_v24, 0.0  ;;  %v1215_v5 = vadd.f32 %v1214_v31, %v1185_v61 }
 0x3bf   :  { %v1200_v38 = vadd.f32 %v1199_v9, %v1197_v58 }
 0x3c1   :  { %v1201_v6 = vrot.slane %v1200_v38, 4  ;;  %v1188_v28 = vpop.xlane.xlu1 %1187 }
 0x3c2   :  { %v1216_v42 = vsel %vm1198_vm3, %v1188_v28, 0.0 }
 0x3c3   :  { %v1202_v10 = vadd.f32 %v1201_v6, %v1200_v38  ;;  %v1217_v11 = vadd.f32 %v1216_v42, %v1215_v5 }
 0x3c5   :  { %v1203_v23 = vrot.slane %v1202_v10, 2  ;;  %v1218_v37 = vrot.slane %v1217_v11, 4 }
 0x3c7   :  { %v1204_v19 = vadd.f32 %v1203_v23, %v1202_v10  ;;  %v1219_v18 = vadd.f32 %v1218_v37, %v1217_v11 }
 0x3c9   :  { %v1205_v13 = vrot.slane %v1204_v19, 1  ;;  %v1220_v49 = vrot.slane %v1219_v18, 2 }
 0x3cb   :  { %v1206_v27 = vadd.f32 %v1205_v13, %v1204_v19  ;;  %v1221_v12 = vadd.f32 %v1220_v49, %v1219_v18 }
 0x3cd   :  { %v6430_v22 = vmul.f32 0.00038580247, %v1206_v27  ;;  %v1222_v30 = vrot.slane %v1221_v12, 1 }
 0x3cf   :  { %v1223_v26 = vadd.f32 %v1222_v30, %v1221_v12  ;;  %v6434_v34 = vsub.f32 %v6346_v60, %v6430_v22  ;;  %v6438_v39 = vsub.f32 %v6340_v41, %v6430_v22  ;;  %v6448_v20 = vsub.f32 %v6354_v0, %v6430_v22 }
 0x3d0   :  { %v6472_v24 = vsub.f32 %v6362_v4, %v6430_v22  ;;  %v6486_v4 = vsub.f32 %v6370_v14, %v6430_v22  ;;  %v6500_v14 = vsub.f32 %v6378_v33, %v6430_v22  ;;  %v6514_v33 = vsub.f32 %v6386_v47, %v6430_v22 }
 0x3d1   :  { %v6440_v44 = vmul.f32 0.00038580247, %v1223_v26  ;;  %v1249_v15 = vmul.f32 %v6434_v34, %v6434_v34  ;;  %v1248_v3 = vmul.f32 %v6438_v39, %v6438_v39 }
 0x3d2   :  { %v1251_v38 = vmul.f32 %v6472_v24, %v6472_v24  ;;  %v1252_v42 = vmul.f32 %v6486_v4, %v6486_v4  ;;  %v1253_v37 = vmul.f32 %v6500_v14, %v6500_v14  ;;  %v1254_v27 = vmul.f32 %v6514_v33, %v6514_v33 }
 0x3d3   :  { %v1273_v59 = vsel %vm158_vm0, %v1249_v15, 0.0  ;;  %v1270_v60 = vsel %vm158_vm0, %v1248_v3, 0.0  ;;  %v6454_v41 = vsub.f32 %v6352_v63, %v6440_v44  ;;  %v6458_v29 = vsub.f32 %v6344_v48, %v6440_v44 }
 0x3d4   :  { %1274 = vadd.xlane.f32.xlu1 %v1273_v59  ;;  %1271 = vadd.xlane.f32.xlu0 %v1270_v60  ;;  %v6462_v58 = vsub.f32 %v6360_v51, %v6440_v44  ;;  %v1250_v63 = vmul.f32 %v6448_v20, %v6448_v20  ;;  %v6480_v31 = vsub.f32 %v6368_v7, %v6440_v44  ;;  %v1279_v11 = vsel %vm158_vm0, %v1251_v38, 0.0 }
 0x3d5   :  { %v1260_v0 = vmul.f32 %v6454_v41, %v6454_v41  ;;  %v1259_v61 = vmul.f32 %v6458_v29, %v6458_v29  ;;  %v6494_v7 = vsub.f32 %v6376_v57, %v6440_v44  ;;  %v6508_v57 = vsub.f32 %v6384_v16, %v6440_v44 }
 0x3d6   :  { %v1261_v51 = vmul.f32 %v6462_v58, %v6462_v58  ;;  %v1276_v6 = vsel %vm158_vm0, %v1250_v63, 0.0  ;;  %v1262_v28 = vmul.f32 %v6480_v31, %v6480_v31  ;;  %v1282_v18 = vsel %vm158_vm0, %v1252_v42, 0.0 }
 0x3d7   :  { %v1306_v48 = vsel %vm158_vm0, %v1260_v0, 0.0  ;;  %v1303_v9 = vsel %vm158_vm0, %v1259_v61, 0.0  ;;  %v1263_v23 = vmul.f32 %v6494_v7, %v6494_v7  ;;  %v1264_v13 = vmul.f32 %v6508_v57, %v6508_v57 }
 0x3d8   :  { %1307 = vadd.xlane.f32.xlu1 %v1306_v48  ;;  %1304 = vadd.xlane.f32.xlu0 %v1303_v9  ;;  %v1309_v5 = vsel %vm158_vm0, %v1261_v51, 0.0  ;;  %v1312_v10 = vsel %vm158_vm0, %v1262_v28, 0.0  ;;  %v6522_v16 = vsub.f32 %v6392_v40, %v6440_v44  ;;  %v1285_v49 = vsel %vm158_vm0, %v1253_v37, 0.0 }
 0x3d9   :  { %v1315_v19 = vsel %vm158_vm0, %v1263_v23, 0.0  ;;  %v1318_v47 = vsel %vm158_vm0, %v1264_v13, 0.0  ;;  %v6532_v30 = vsub.f32 %v6400_v35, %v6440_v44  ;;  %v6536_v40 = vsub.f32 %v6394_v8, %v6430_v22  ;;  %v1517_v23 = vld [vmem:[#allocation2] sm:$0xff] }
 0x3da   :  { %v1265_v12 = vmul.f32 %v6522_v16, %v6522_v16  ;;  %v1288_v26 = vsel %vm158_vm0, %v1254_v27, 0.0  ;;  %v6541_v15 = vsub.f32 %v6408_v56, %v6440_v44  ;;  %v6550_v8 = vsub.f32 %v6402_v62, %v6430_v22 }
 0x3db   :  { %v1266_v59 = vmul.f32 %v6532_v30, %v6532_v30  ;;  %v1255_v35 = vmul.f32 %v6536_v40, %v6536_v40  ;;  %v6554_v60 = vsub.f32 %v6416_v45, %v6440_v44  ;;  %v6558_v56 = vsub.f32 %v6410_v52, %v6430_v22 }
 0x3dc   :  { %1310 = vadd.xlane.f32.xlu1 %v1309_v5  ;;  %1277 = vadd.xlane.f32.xlu0 %v1276_v6  ;;  %v1321_v3 = vsel %vm158_vm0, %v1265_v12, 0.0  ;;  %v1267_v63 = vmul.f32 %v6541_v15, %v6541_v15  ;;  %v1256_v62 = vmul.f32 %v6550_v8, %v6550_v8  ;;  %v6574_v51 = vsub.f32 %v6424_v50, %v6440_v44 }
 0x3dd   :  { %v1324_v0 = vsel %vm158_vm0, %v1266_v59, 0.0  ;;  %v1291_v61 = vsel %vm158_vm0, %v1255_v35, 0.0  ;;  %v1268_v45 = vmul.f32 %v6554_v60, %v6554_v60  ;;  %v1257_v48 = vmul.f32 %v6558_v56, %v6558_v56 }
 0x3de   :  { %v1327_v52 = vsel %vm158_vm0, %v1267_v63, 0.0  ;;  %v1294_v9 = vsel %vm158_vm0, %v1256_v62, 0.0  ;;  %v6578_v38 = vsub.f32 %v6418_v32, %v6430_v22  ;;  %v1269_v28 = vmul.f32 %v6574_v51, %v6574_v51  ;;  %v1520_v32 = vld [vmem:[#allocation2 + $0x18] sm:$0xff]  ;;  %v1519_v22 = vld [vmem:[#allocation2 + $0x10] sm:$0xff] }
 0x3df   :  { %v1330_v5 = vsel %vm158_vm0, %v1268_v45, 0.0  ;;  %v1297_v6 = vsel %vm158_vm0, %v1257_v48, 0.0  ;;  %4999 = vmatpush3.msra.mxu0 %v1520_v32  ;;  %5040 = vmatpush3.msra.mxu1 %v1520_v32 }
 0x3e0   :  { %1313 = vadd.xlane.f32.xlu1 %v1312_v10  ;;  %1280 = vadd.xlane.f32.xlu0 %v1279_v11  ;;  %v1258_v42 = vmul.f32 %v6578_v38, %v6578_v38  ;;  %v1333_v50 = vsel %vm189_vm1, %v1269_v28, 0.0  ;;  %v7652_v10 = vmov 0.0   ;;  %v1518_v11 = vld [vmem:[#allocation2 + $0x8] sm:$0xff] }
 0x3e1   :  { %5000 = vmatprep.subr.mxu0 %v7652_v10  ;;  %5041 = vmatprep.subr.mxu1 %v7652_v10 }
 0x3e2   :  { %v1300_v44 = vsel %vm189_vm1, %v1258_v42, 0.0  ;;  %5001 = vmatpush3.msra.mxu0 %v1519_v22  ;;  %5042 = vmatpush3.msra.mxu1 %v1519_v22 }
 0x3e3   :  { %5002 = vmatprep.subr.mxu0 %v7652_v10  ;;  %5043 = vmatprep.subr.mxu1 %v7652_v10 }
 0x3e4   :  { %1316 = vadd.xlane.f32.xlu1 %v1315_v19  ;;  %1283 = vadd.xlane.f32.xlu0 %v1282_v18 }
 0x3e5   :  { %5003 = vmatpush3.msra.mxu0 %v1518_v11  ;;  %5044 = vmatpush3.msra.mxu1 %v1518_v11 }
 0x3e6   :  { %5004 = vmatprep.subr.mxu0 %v7652_v10  ;;  %5045 = vmatprep.subr.mxu1 %v7652_v10 }
 0x3e7   :  { %5005 = vmatpush3.msra.mxu0 %v1517_v23  ;;  %5046 = vmatpush3.msra.mxu1 %v1517_v23 }
 0x3e8   :  { %1319 = vadd.xlane.f32.xlu1 %v1318_v47  ;;  %1286 = vadd.xlane.f32.xlu0 %v1285_v49 }
 0x3ec   :  { %1322 = vadd.xlane.f32.xlu1 %v1321_v3  ;;  %1289 = vadd.xlane.f32.xlu0 %v1288_v26 }
 0x3f0   :  { %1325 = vadd.xlane.f32.xlu1 %v1324_v0  ;;  %1292 = vadd.xlane.f32.xlu0 %v1291_v61 }
 0x3f4   :  { %1328 = vadd.xlane.f32.xlu1 %v1327_v52  ;;  %1295 = vadd.xlane.f32.xlu0 %v1294_v9 }
 0x3f8   :  { %1331 = vadd.xlane.f32.xlu1 %v1330_v5  ;;  %1298 = vadd.xlane.f32.xlu0 %v1297_v6 }
 0x3fc   :  { %1334 = vadd.xlane.f32.xlu1 %v1333_v50  ;;  %1301 = vadd.xlane.f32.xlu0 %v1300_v44 }
 0x45d   :  { %v1275_v37 = vpop.xlane.xlu1 %1274  ;;  %v1272_v19 = vpop.xlane.xlu0 %1271 }
 0x45e   :  { %v1336_v0 = vadd.f32 %v1275_v37, %v1272_v19 }
 0x461   :  { %v1308_v18 = vpop.xlane.xlu1 %1307  ;;  %v1305_v13 = vpop.xlane.xlu0 %1304 }
 0x462   :  { %v1353_v61 = vadd.f32 %v1308_v18, %v1305_v13 }
 0x465   :  { %v1311_v49 = vpop.xlane.xlu1 %1310  ;;  %v1278_v27 = vpop.xlane.xlu0 %1277 }
 0x466   :  { %v1354_v45 = vadd.f32 %v1353_v61, %v1311_v49  ;;  %v1337_v48 = vadd.f32 %v1336_v0, %v1278_v27 }
 0x469   :  { %v1314_v47 = vpop.xlane.xlu1 %1313  ;;  %v1281_v12 = vpop.xlane.xlu0 %1280 }
 0x46a   :  { %v1355_v52 = vadd.f32 %v1354_v45, %v1314_v47  ;;  %v1338_v9 = vadd.f32 %v1337_v48, %v1281_v12 }
 0x46d   :  { %v1317_v26 = vpop.xlane.xlu1 %1316  ;;  %v1284_v3 = vpop.xlane.xlu0 %1283 }
 0x46e   :  { %v1356_v28 = vadd.f32 %v1355_v52, %v1317_v26  ;;  %v1339_v42 = vadd.f32 %v1338_v9, %v1284_v3 }
 0x471   :  { %v1320_v59 = vpop.xlane.xlu1 %1319  ;;  %v1287_v35 = vpop.xlane.xlu0 %1286 }
 0x472   :  { %v1357_v50 = vadd.f32 %v1356_v28, %v1320_v59  ;;  %v1340_v44 = vadd.f32 %v1339_v42, %v1287_v35 }
 0x475   :  { %v1323_v63 = vpop.xlane.xlu1 %1322  ;;  %v1290_v62 = vpop.xlane.xlu0 %1289 }
 0x476   :  { %v1358_v11 = vadd.f32 %v1357_v50, %v1323_v63  ;;  %v1341_v23 = vadd.f32 %v1340_v44, %v1290_v62 }
 0x479   :  { %v1326_v5 = vpop.xlane.xlu1 %1325  ;;  %v1293_v6 = vpop.xlane.xlu0 %1292 }
 0x47a   :  { %v1359_v2 = vadd.f32 %v1358_v11, %v1326_v5  ;;  %v1342_v55 = vadd.f32 %v1341_v23, %v1293_v6 }
 0x47d   :  { %v1329_v32 = vpop.xlane.xlu1 %1328  ;;  %v1296_v22 = vpop.xlane.xlu0 %1295 }
 0x47e   :  { %v1360_v18 = vadd.f32 %v1359_v2, %v1329_v32  ;;  %v1343_v13 = vadd.f32 %v1342_v55, %v1296_v22  ;;  %v6598_v22 = vld [vmem:[#allocation9 + $0x2] ss:$0 sm:$0xff] }
 0x481   :  { %v1332_v37 = vpop.xlane.xlu1 %1331  ;;  %v1299_v19 = vpop.xlane.xlu0 %1298 }
 0x482   :  { %v1361_v49 = vadd.f32 %v1360_v18, %v1332_v37  ;;  %v1344_v27 = vadd.f32 %v1343_v13, %v1299_v19  ;;  %v6608_v18 = vld [vmem:[#allocation9 + $0x3] ss:$0 sm:$0xff] }
 0x485   :  { %v1335_v47 = vpop.xlane.xlu1 %1334  ;;  %v1302_v12 = vpop.xlane.xlu0 %1301 }
 0x486   :  { %v1362_v0 = vsel %vm1198_vm3, %v1335_v47, 0.0  ;;  %v1345_v26 = vsel %vm1198_vm3, %v1302_v12, 0.0 }
 0x487   :  { %v1363_v3 = vadd.f32 %v1362_v0, %v1361_v49  ;;  %v1346_v59 = vadd.f32 %v1345_v26, %v1344_v27  ;;  %v6623_v0 = vstv %s809_s2 }
 0x489   :  { %v1364_v35 = vrot.slane %v1363_v3, 4  ;;  %v1347_v61 = vrot.slane %v1346_v59, 4 }
 0x48b   :  { %v1365_v63 = vadd.f32 %v1364_v35, %v1363_v3  ;;  %v1348_v62 = vadd.f32 %v1347_v61, %v1346_v59 }
 0x48d   :  { %v1366_v45 = vrot.slane %v1365_v63, 2  ;;  %v1349_v48 = vrot.slane %v1348_v62, 2 }
 0x48f   :  { %v1367_v52 = vadd.f32 %v1366_v45, %v1365_v63  ;;  %v1350_v9 = vadd.f32 %v1349_v48, %v1348_v62 }
 0x491   :  { %v1368_v2 = vrot.slane %v1367_v52, 1  ;;  %v1351_v55 = vrot.slane %v1350_v9, 1 }
 0x493   :  { %v1369_v5 = vadd.f32 %v1368_v2, %v1367_v52  ;;  %v1352_v6 = vadd.f32 %v1351_v55, %v1350_v9 }
 0x495   :  { %v1371_v28 = vmul.f32 0.00038580247, %v1369_v5  ;;  %v1370_v42 = vmul.f32 0.00038580247, %v1352_v6 }
 0x497   :  { %v1373_v50 = vadd.f32 1e-08, %v1371_v28  ;;  %v1372_v44 = vadd.f32 1e-08, %v1370_v42 }
 0x499   :  { %5443 = vrsqrt.f32 %v1373_v50 }
 0x49a   :  { %5445 = vrsqrt.f32 %v1372_v44 }
 0x4a6   :  { %v6596_v32 = vpop.eup %5443 }
 0x4a7   :  { %v6600_v11 = vpop.eup %5445  ;;  %v1387_v23 = vmul.f32 %v6596_v32, %v6458_v29  ;;  %v1388_v37 = vmul.f32 %v6596_v32, %v6454_v41  ;;  %v1389_v19 = vmul.f32 %v6596_v32, %v6462_v58  ;;  %v1390_v58 = vmul.f32 %v6596_v32, %v6480_v31 }
 0x4a8   :  { %v1376_v13 = vmul.f32 %v6600_v11, %v6438_v39  ;;  %v1377_v49 = vmul.f32 %v6600_v11, %v6434_v34  ;;  %v1378_v27 = vmul.f32 %v6600_v11, %v6448_v20  ;;  %v1379_v41 = vmul.f32 %v6600_v11, %v6472_v24 }
 0x4a9   :  { %v1413_v47 = vmul.f32 %v6598_v22, %v1387_v23  ;;  %v1414_v29 = vmul.f32 %v6598_v22, %v1388_v37  ;;  %v1415_v3 = vmul.f32 %v6598_v22, %v1389_v19  ;;  %v1416_v61 = vmul.f32 %v6598_v22, %v1390_v58 }
 0x4aa   :  { %v1402_v12 = vmul.f32 %v6598_v22, %v1376_v13  ;;  %v1403_v39 = vmul.f32 %v6598_v22, %v1377_v49  ;;  %v1404_v34 = vmul.f32 %v6598_v22, %v1378_v27  ;;  %v1405_v35 = vmul.f32 %v6598_v22, %v1379_v41 }
 0x4ab   :  { %v1439_v20 = vadd.f32 %v6608_v18, %v1413_v47  ;;  %v1440_v26 = vadd.f32 %v6608_v18, %v1414_v29  ;;  %v1441_v9 = vadd.f32 %v6608_v18, %v1415_v3  ;;  %v1442_v5 = vadd.f32 %v6608_v18, %v1416_v61 }
 0x4ac   :  { %v1428_v59 = vadd.f32 %v6608_v18, %v1402_v12  ;;  %v1429_v24 = vadd.f32 %v6608_v18, %v1403_v39  ;;  %v1430_v45 = vadd.f32 %v6608_v18, %v1404_v34  ;;  %v1431_v55 = vadd.f32 %v6608_v18, %v1405_v35 }
 0x4ad   :  { %vm1461_vm4 = vcmp.ge.f32.partialorder %v1439_v20, 0.0  ;;  %v1484_v31 = vmul.f32 %v6623_v0, %v1439_v20  ;;  %v1485_v62 = vmul.f32 %v6623_v0, %v1440_v26  ;;  %vm1462_vm6 = vcmp.ge.f32.partialorder %v1440_v26, 0.0 }
 0x4ae   :  { %vm1450_vm5 = vcmp.ge.f32.partialorder %v1428_v59, 0.0  ;;  %v1473_v63 = vmul.f32 %v6623_v0, %v1428_v59  ;;  %v1474_v52 = vmul.f32 %v6623_v0, %v1429_v24  ;;  %vm1451_vm7 = vcmp.ge.f32.partialorder %v1429_v24, 0.0 }
 0x4af   :  { %v1506_v48 = vsel %vm1461_vm4, %v1439_v20, %v1484_v31  ;;  %v1507_v6 = vsel %vm1462_vm6, %v1440_v26, %v1485_v62  ;;  %vm1452_vm8 = vcmp.ge.f32.partialorder %v1430_v45, 0.0  ;;  %v1380_v28 = vmul.f32 %v6600_v11, %v6486_v4 }
 0x4b0   :  { %v1495_v2 = vsel %vm1450_vm5, %v1428_v59, %v1473_v63  ;;  %5048 = vmatmul.mubr.msk.f32.vlgmr.msra.gmra.mxu1 %vm158_vm0, %v1506_v48  ;;  %v1391_v42 = vmul.f32 %v6596_v32, %v6494_v7  ;;  %v1496_v50 = vsel %vm1451_vm7, %v1429_v24, %v1474_v52  ;;  %v1475_v44 = vmul.f32 %v6623_v0, %v1430_v45 }
 0x4b1   :  { %5007 = vmatmul.mubr.msk.f32.vlgmr.msra.gmra.mxu0 %vm158_vm0, %v1495_v2  ;;  %5050 = vmatprep.mubr.msk.f32.mxu1 %vm5618_vm2, %v7652_v10  ;;  %v1486_v23 = vmul.f32 %v6623_v0, %v1441_v9  ;;  %v1392_v37 = vmul.f32 %v6596_v32, %v6508_v57  ;;  %vm1463_vm9 = vcmp.ge.f32.partialorder %v1441_v9, 0.0  ;;  %v1406_v19 = vmul.f32 %v6598_v22, %v1380_v28 }
 0x4b2   :  { %5009 = vmatprep.mubr.msk.f32.mxu0 %vm5618_vm2, %v7652_v10  ;;  %v1417_v13 = vmul.f32 %v6598_v22, %v1391_v42  ;;  %v1381_v4 = vmul.f32 %v6600_v11, %v6500_v14  ;;  %v1382_v7 = vmul.f32 %v6600_v11, %v6514_v33  ;;  %v1393_v49 = vmul.f32 %v6596_v32, %v6522_v16 }
 0x4b3   :  { %v1418_v57 = vmul.f32 %v6598_v22, %v1392_v37  ;;  %v1497_v27 = vsel %vm1452_vm8, %v1430_v45, %v1475_v44  ;;  %v1508_v47 = vsel %vm1463_vm9, %v1441_v9, %v1486_v23  ;;  %v1487_v14 = vmul.f32 %v6623_v0, %v1442_v5 }
 0x4b4   :  { %5051 = vmatmul.mubr.msk.f32.gmra.mxu1 %vm158_vm0, %v1507_v6  ;;  %v1443_v29 = vadd.f32 %v6608_v18, %v1417_v13  ;;  %v1476_v41 = vmul.f32 %v6623_v0, %v1431_v55  ;;  %vm1464_vm10 = vcmp.ge.f32.partialorder %v1442_v5, 0.0  ;;  %v1432_v33 = vadd.f32 %v6608_v18, %v1406_v19 }
 0x4b5   :  { %5010 = vmatmul.mubr.msk.f32.gmra.mxu0 %vm158_vm0, %v1496_v50  ;;  %5053 = vmatprep.mubr.msk.f32.mxu1 %vm5618_vm2, %v7652_v10  ;;  %v1407_v58 = vmul.f32 %v6598_v22, %v1381_v4  ;;  %vm1453_vm11 = vcmp.ge.f32.partialorder %v1431_v55, 0.0  ;;  %v1408_v16 = vmul.f32 %v6598_v22, %v1382_v7  ;;  %v1444_v12 = vadd.f32 %v6608_v18, %v1418_v57 }
 0x4b6   :  { %5012 = vmatprep.mubr.msk.f32.mxu0 %vm5618_vm2, %v7652_v10  ;;  %v1419_v39 = vmul.f32 %v6598_v22, %v1393_v49  ;;  %v1383_v34 = vmul.f32 %v6600_v11, %v6536_v40  ;;  %v1509_v20 = vsel %vm1464_vm10, %v1442_v5, %v1487_v14  ;;  %v1488_v26 = vmul.f32 %v6623_v0, %v1443_v29 }
 0x4b7   :  { %v1394_v3 = vmul.f32 %v6596_v32, %v6532_v30  ;;  %v1498_v59 = vsel %vm1453_vm11, %v1431_v55, %v1476_v41  ;;  %v1477_v24 = vmul.f32 %v6623_v0, %v1432_v33  ;;  %vm1465_vm12 = vcmp.ge.f32.partialorder %v1443_v29, 0.0 }
 0x4b8   :  { %5054 = vmatmul.mubr.msk.f32.gmra.mxu1 %vm158_vm0, %v1508_v47  ;;  %v1433_v31 = vadd.f32 %v6608_v18, %v1407_v58  ;;  %vm1454_vm13 = vcmp.ge.f32.partialorder %v1432_v33, 0.0  ;;  %v1434_v40 = vadd.f32 %v6608_v18, %v1408_v16  ;;  %v1489_v30 = vmul.f32 %v6623_v0, %v1444_v12 }
 0x4b9   :  { %5013 = vmatmul.mubr.msk.f32.gmra.mxu0 %vm158_vm0, %v1497_v27  ;;  %5056 = vmatprep.mubr.msk.f32.mxu1 %vm5618_vm2, %v7652_v10  ;;  %v1445_v35 = vadd.f32 %v6608_v18, %v1419_v39  ;;  %v1409_v61 = vmul.f32 %v6598_v22, %v1383_v34  ;;  %v1510_v63 = vsel %vm1465_vm12, %v1443_v29, %v1488_v26  ;;  %vm1466_vm14 = vcmp.ge.f32.partialorder %v1444_v12, 0.0 }
 0x4ba   :  { %5015 = vmatprep.mubr.msk.f32.mxu0 %vm5618_vm2, %v7652_v10  ;;  %v1420_v62 = vmul.f32 %v6598_v22, %v1394_v3  ;;  %v1395_v45 = vmul.f32 %v6596_v32, %v6541_v15  ;;  %v1499_v48 = vsel %vm1454_vm13, %v1432_v33, %v1477_v24  ;;  %v1478_v52 = vmul.f32 %v6623_v0, %v1433_v31 }
 0x4bb   :  { %v1384_v9 = vmul.f32 %v6600_v11, %v6550_v8  ;;  %vm1455_vm15 = vcmp.ge.f32.partialorder %v1433_v31, 0.0  ;;  %vm1456_vm4 = vcmp.ge.f32.partialorder %v1434_v40, 0.0  ;;  %v1511_v2 = vsel %vm1466_vm14, %v1444_v12, %v1489_v30 }
 0x4bc   :  { %5057 = vmatmul.mubr.msk.f32.gmra.mxu1 %vm158_vm0, %v1509_v20  ;;  %v1479_v15 = vmul.f32 %v6623_v0, %v1434_v40  ;;  %v1490_v55 = vmul.f32 %v6623_v0, %v1445_v35  ;;  %v1435_v5 = vadd.f32 %v6608_v18, %v1409_v61  ;;  %vm1467_vm5 = vcmp.ge.f32.partialorder %v1445_v35, 0.0 }
 0x4bd   :  { %5016 = vmatmul.mubr.msk.f32.gmra.mxu0 %vm158_vm0, %v1498_v59  ;;  %5059 = vmatprep.mubr.msk.f32.mxu1 %vm5618_vm2, %v7652_v10  ;;  %v1446_v8 = vadd.f32 %v6608_v18, %v1420_v62  ;;  %v1421_v6 = vmul.f32 %v6598_v22, %v1395_v45  ;;  %v1396_v28 = vmul.f32 %v6596_v32, %v6554_v60  ;;  %vm2248_vm14 = vcmask 662528  }
 0x4be   :  { %5018 = vmatprep.mubr.msk.f32.mxu0 %vm5618_vm2, %v7652_v10  ;;  %v1500_v42 = vsel %vm1455_vm15, %v1433_v31, %v1478_v52  ;;  %v1410_v50 = vmul.f32 %v6598_v22, %v1384_v9  ;;  %v1385_v44 = vmul.f32 %v6600_v11, %v6558_v56  ;;  %v1501_v23 = vsel %vm1456_vm4, %v1434_v40, %v1479_v15 }
 0x4bf   :  { %v1512_v37 = vsel %vm1467_vm5, %v1445_v35, %v1490_v55  ;;  %vm1457_vm6 = vcmp.ge.f32.partialorder %v1435_v5, 0.0  ;;  %v1480_v60 = vmul.f32 %v6623_v0, %v1435_v5  ;;  %v1491_v19 = vmul.f32 %v6623_v0, %v1446_v8 }
 0x4c0   :  { %5060 = vmatmul.mubr.msk.f32.gmra.mxu1 %vm158_vm0, %v1510_v63  ;;  %v1447_v13 = vadd.f32 %v6608_v18, %v1421_v6  ;;  %v1422_v56 = vmul.f32 %v6598_v22, %v1396_v28  ;;  %v1397_v4 = vmul.f32 %v6596_v32, %v6574_v51  ;;  %vm1468_vm7 = vcmp.ge.f32.partialorder %v1446_v8, 0.0 }
 0x4c1   :  { %5019 = vmatmul.mubr.msk.f32.gmra.mxu0 %vm158_vm0, %v1499_v48  ;;  %5062 = vmatprep.mubr.msk.f32.mxu1 %vm5618_vm2, %v7652_v10  ;;  %v1436_v7 = vadd.f32 %v6608_v18, %v1410_v50  ;;  %v1411_v57 = vmul.f32 %v6598_v22, %v1385_v44  ;;  %v1386_v49 = vmul.f32 %v6600_v11, %v6578_v38 }
 0x4c2   :  { %5021 = vmatprep.mubr.msk.f32.mxu0 %vm5618_vm2, %v7652_v10  ;;  %v1502_v27 = vsel %vm1457_vm6, %v1435_v5, %v1480_v60  ;;  %v1513_v51 = vsel %vm1468_vm7, %v1446_v8, %v1491_v19  ;;  %v1492_v32 = vmul.f32 %v6623_v0, %v1447_v13  ;;  %v1448_v47 = vadd.f32 %v6608_v18, %v1422_v56 }
 0x4c3   :  { %v1423_v14 = vmul.f32 %v6598_v22, %v1397_v4  ;;  %v1481_v38 = vmul.f32 %v6623_v0, %v1436_v7  ;;  %vm1469_vm8 = vcmp.ge.f32.partialorder %v1447_v13, 0.0  ;;  %v1437_v11 = vadd.f32 %v6608_v18, %v1411_v57 }
 0x4c4   :  { %5063 = vmatmul.mubr.msk.f32.gmra.mxu1 %vm158_vm0, %v1511_v2  ;;  %v1412_v29 = vmul.f32 %v6598_v22, %v1386_v49  ;;  %vm1458_vm9 = vcmp.ge.f32.partialorder %v1436_v7, 0.0  ;;  %v1514_v41 = vsel %vm1469_vm8, %v1447_v13, %v1492_v32  ;;  %v1493_v33 = vmul.f32 %v6623_v0, %v1448_v47 }
 0x4c5   :  { %5022 = vmatmul.mubr.msk.f32.gmra.mxu0 %vm158_vm0, %v1500_v42  ;;  %5065 = vmatprep.mubr.msk.f32.mxu1 %vm5618_vm2, %v7652_v10  ;;  %v1449_v58 = vadd.f32 %v6608_v18, %v1423_v14  ;;  %v1503_v16 = vsel %vm1458_vm9, %v1436_v7, %v1481_v38  ;;  %v1482_v12 = vmul.f32 %v6623_v0, %v1437_v11  ;;  %vm1470_vm10 = vcmp.ge.f32.partialorder %v1448_v47, 0.0 }
 0x4c6   :  { %5024 = vmatprep.mubr.msk.f32.mxu0 %vm5618_vm2, %v7652_v10  ;;  %v1438_v22 = vadd.f32 %v6608_v18, %v1412_v29  ;;  %vm1459_vm11 = vcmp.ge.f32.partialorder %v1437_v11, 0.0  ;;  %v1515_v39 = vsel %vm1470_vm10, %v1448_v47, %v1493_v33 }
 0x4c7   :  { %v1494_v34 = vmul.f32 %v6623_v0, %v1449_v58  ;;  %v1504_v20 = vsel %vm1459_vm11, %v1437_v11, %v1482_v12  ;;  %vm1471_vm12 = vcmp.ge.f32.partialorder %v1449_v58, 0.0 }
 0x4c8   :  { %5066 = vmatmul.mubr.msk.f32.gmra.mxu1 %vm158_vm0, %v1512_v37  ;;  %v1483_v26 = vmul.f32 %v6623_v0, %v1438_v22  ;;  %vm1460_vm13 = vcmp.ge.f32.partialorder %v1438_v22, 0.0 }
 0x4c9   :  { %5025 = vmatmul.mubr.msk.f32.gmra.mxu0 %vm158_vm0, %v1501_v23  ;;  %5068 = vmatprep.mubr.msk.f32.mxu1 %vm5618_vm2, %v7652_v10  ;;  %v1516_v18 = vsel %vm1471_vm12, %v1449_v58, %v1494_v34 }
 0x4ca   :  { %5027 = vmatprep.mubr.msk.f32.mxu0 %vm5618_vm2, %v7652_v10  ;;  %v1505_v3 = vsel %vm1460_vm13, %v1438_v22, %v1483_v26 }
 0x4cc   :  { %5069 = vmatmul.mubr.msk.f32.gmra.mxu1 %vm158_vm0, %v1513_v51 }
 0x4cd   :  { %5028 = vmatmul.mubr.msk.f32.gmra.mxu0 %vm158_vm0, %v1502_v27  ;;  %5071 = vmatprep.mubr.msk.f32.mxu1 %vm5618_vm2, %v7652_v10 }
 0x4ce   :  { %5030 = vmatprep.mubr.msk.f32.mxu0 %vm5618_vm2, %v7652_v10 }
 0x4d0   :  { %5072 = vmatmul.mubr.msk.f32.gmra.mxu1 %vm158_vm0, %v1514_v41 }
 0x4d1   :  { %5031 = vmatmul.mubr.msk.f32.gmra.mxu0 %vm158_vm0, %v1503_v16  ;;  %5074 = vmatprep.mubr.msk.f32.mxu1 %vm5618_vm2, %v7652_v10 }
 0x4d2   :  { %5033 = vmatprep.mubr.msk.f32.mxu0 %vm5618_vm2, %v7652_v10 }
 0x4d4   :  { %5075 = vmatmul.mubr.msk.f32.gmra.mxu1 %vm158_vm0, %v1515_v39 }
 0x4d5   :  { %5034 = vmatmul.mubr.msk.f32.gmra.mxu0 %vm158_vm0, %v1504_v20  ;;  %5077 = vmatprep.mubr.msk.f32.mxu1 %vm5618_vm2, %v7652_v10 }
 0x4d6   :  { %5036 = vmatprep.mubr.msk.f32.mxu0 %vm5618_vm2, %v7652_v10 }
 0x4d8   :  { %5078 = vmatmul.mubr.msk.f32.gmra.mxu1 %vm158_vm0, %v1516_v18 }
 0x4d9   :  { %5037 = vmatmul.mubr.msk.f32.gmra.mxu0 %vm158_vm0, %v1505_v3 }
 0x570   :  { %v6780_v59 = vpop.f32.mrf.mxu1 }
 0x571   :  { %v6782_v24 = vpop.f32.mrf.mxu0  ;;  %v1862_v63 = vsel %vm158_vm0, %v6780_v59, 0.0 }
 0x572   :  { %v5049_v0 = vpop.f32.mrf.mxu1  ;;  %v1829_v31 = vsel %vm158_vm0, %v6782_v24, 0.0 }
 0x573   :  { %1830 = vadd.xlane.f32.xlu0 %v1829_v31  ;;  %v5008_v40 = vpop.f32.mrf.mxu0 }
 0x574   :  { %v6786_v30 = vpop.f32.mrf.mxu1 }
 0x575   :  { %v6788_v35 = vpop.f32.mrf.mxu0  ;;  %v1865_v2 = vsel %vm158_vm0, %v6786_v30, 0.0 }
 0x576   :  { %v5052_v61 = vpop.f32.mrf.mxu1  ;;  %v1832_v62 = vsel %vm158_vm0, %v6788_v35, 0.0 }
 0x577   :  { %1863 = vadd.xlane.f32.xlu0 %v1862_v63  ;;  %1833 = vadd.xlane.f32.xlu1 %v1832_v62  ;;  %v5011_v45 = vpop.f32.mrf.mxu0 }
 0x578   :  { %v6794_v48 = vpop.f32.mrf.mxu1 }
 0x579   :  { %v6796_v52 = vpop.f32.mrf.mxu0  ;;  %v1868_v28 = vsel %vm158_vm0, %v6794_v48, 0.0 }
 0x57a   :  { %v5055_v9 = vpop.f32.mrf.mxu1  ;;  %v1835_v15 = vsel %vm158_vm0, %v6796_v52, 0.0 }
 0x57b   :  { %1866 = vadd.xlane.f32.xlu1 %v1865_v2  ;;  %1836 = vadd.xlane.f32.xlu0 %v1835_v15  ;;  %v5014_v55 = vpop.f32.mrf.mxu0 }
 0x57c   :  { %v6802_v5 = vpop.f32.mrf.mxu1 }
 0x57d   :  { %v6804_v8 = vpop.f32.mrf.mxu0  ;;  %v1871_v60 = vsel %vm158_vm0, %v6802_v5, 0.0 }
 0x57e   :  { %v5058_v6 = vpop.f32.mrf.mxu1  ;;  %v1838_v42 = vsel %vm158_vm0, %v6804_v8, 0.0 }
 0x57f   :  { %1869 = vadd.xlane.f32.xlu1 %v1868_v28  ;;  %1839 = vadd.xlane.f32.xlu0 %v1838_v42  ;;  %v5017_v50 = vpop.f32.mrf.mxu0 }
 0x580   :  { %v6810_v44 = vpop.f32.mrf.mxu1 }
 0x581   :  { %v6812_v23 = vpop.f32.mrf.mxu0  ;;  %v1874_v57 = vsel %vm158_vm0, %v6810_v44, 0.0 }
 0x582   :  { %v5061_v37 = vpop.f32.mrf.mxu1  ;;  %v1841_v19 = vsel %vm158_vm0, %v6812_v23, 0.0 }
 0x583   :  { %1872 = vadd.xlane.f32.xlu1 %v1871_v60  ;;  %1842 = vadd.xlane.f32.xlu0 %v1841_v19  ;;  %v5020_v13 = vpop.f32.mrf.mxu0 }
 0x584   :  { %v6818_v56 = vpop.f32.mrf.mxu1 }
 0x585   :  { %v6820_v4 = vpop.f32.mrf.mxu0  ;;  %v1877_v14 = vsel %vm158_vm0, %v6818_v56, 0.0 }
 0x586   :  { %v5064_v7 = vpop.f32.mrf.mxu1  ;;  %v1844_v49 = vsel %vm158_vm0, %v6820_v4, 0.0 }
 0x587   :  { %1875 = vadd.xlane.f32.xlu1 %v1874_v57  ;;  %1845 = vadd.xlane.f32.xlu0 %v1844_v49  ;;  %v5023_v27 = vpop.f32.mrf.mxu0 }
 0x588   :  { %v6826_v51 = vpop.f32.mrf.mxu1 }
 0x589   :  { %v6828_v32 = vpop.f32.mrf.mxu0  ;;  %v1880_v58 = vsel %vm158_vm0, %v6826_v51, 0.0 }
 0x58a   :  { %v5067_v47 = vpop.f32.mrf.mxu1  ;;  %v1847_v38 = vsel %vm158_vm0, %v6828_v32, 0.0 }
 0x58b   :  { %1878 = vadd.xlane.f32.xlu1 %v1877_v14  ;;  %1848 = vadd.xlane.f32.xlu0 %v1847_v38  ;;  %v5026_v11 = vpop.f32.mrf.mxu0 }
 0x58c   :  { %v6834_v29 = vpop.f32.mrf.mxu1 }
 0x58d   :  { %v6836_v41 = vpop.f32.mrf.mxu0  ;;  %v1883_v20 = vsel %vm158_vm0, %v6834_v29, 0.0 }
 0x58e   :  { %v5070_v33 = vpop.f32.mrf.mxu1  ;;  %v1850_v16 = vsel %vm158_vm0, %v6836_v41, 0.0 }
 0x58f   :  { %1881 = vadd.xlane.f32.xlu1 %v1880_v58  ;;  %1851 = vadd.xlane.f32.xlu0 %v1850_v16  ;;  %v5029_v12 = vpop.f32.mrf.mxu0 }
 0x590   :  { %v6842_v22 = vpop.f32.mrf.mxu1 }
 0x591   :  { %v6844_v39 = vpop.f32.mrf.mxu0  ;;  %v1886_v40 = vsel %vm158_vm0, %v6842_v22, 0.0 }
 0x592   :  { %v5073_v34 = vpop.f32.mrf.mxu1  ;;  %v1853_v26 = vsel %vm158_vm0, %v6844_v39, 0.0 }
 0x593   :  { %1884 = vadd.xlane.f32.xlu1 %v1883_v20  ;;  %1854 = vadd.xlane.f32.xlu0 %v1853_v26  ;;  %v5032_v18 = vpop.f32.mrf.mxu0 }
 0x594   :  { %v6850_v3 = vpop.f32.mrf.mxu1 }
 0x595   :  { %v6852_v0 = vpop.f32.mrf.mxu0  ;;  %v1889_v2 = vsel %vm158_vm0, %v6850_v3, 0.0 }
 0x596   :  { %v5076_v31 = vpop.f32.mrf.mxu1  ;;  %v1856_v61 = vsel %vm158_vm0, %v6852_v0, 0.0 }
 0x597   :  { %1887 = vadd.xlane.f32.xlu1 %v1886_v40  ;;  %1857 = vadd.xlane.f32.xlu0 %v1856_v61  ;;  %v5035_v63 = vpop.f32.mrf.mxu0 }
 0x598   :  { %v6858_v62 = vpop.f32.mrf.mxu1 }
 0x599   :  { %v6860_v45 = vpop.f32.mrf.mxu0  ;;  %v1892_v6 = vsel %vm189_vm1, %v6858_v62, 0.0 }
 0x59a   :  { %v5079_v9 = vpop.f32.mrf.mxu1  ;;  %v1859_v15 = vsel %vm189_vm1, %v6860_v45, 0.0 }
 0x59b   :  { %1890 = vadd.xlane.f32.xlu1 %v1889_v2  ;;  %1860 = vadd.xlane.f32.xlu0 %v1859_v15  ;;  %v5038_v55 = vpop.f32.mrf.mxu0 }
 0x59f   :  { %1893 = vadd.xlane.f32.xlu1 %v1892_v6 }
 0x5fc   :  { %v1831_v28 = vpop.xlane.xlu0 %1830 }
 0x600   :  { %v1864_v42 = vpop.xlane.xlu0 %1863  ;;  %v1834_v50 = vpop.xlane.xlu1 %1833 }
 0x601   :  { %v1895_v47 = vadd.f32 %v1834_v50, %v1831_v28 }
 0x604   :  { %v1867_v37 = vpop.xlane.xlu1 %1866  ;;  %v1837_v60 = vpop.xlane.xlu0 %1836 }
 0x605   :  { %v1896_v11 = vadd.f32 %v1895_v47, %v1837_v60  ;;  %v1912_v33 = vadd.f32 %v1867_v37, %v1864_v42 }
 0x608   :  { %v1870_v19 = vpop.xlane.xlu1 %1869  ;;  %v1840_v13 = vpop.xlane.xlu0 %1839 }
 0x609   :  { %v1897_v58 = vadd.f32 %v1896_v11, %v1840_v13  ;;  %v1913_v34 = vadd.f32 %v1912_v33, %v1870_v19 }
 0x60c   :  { %v1873_v7 = vpop.xlane.xlu1 %1872  ;;  %v1843_v57 = vpop.xlane.xlu0 %1842 }
 0x60d   :  { %v1898_v20 = vadd.f32 %v1897_v58, %v1843_v57  ;;  %v1914_v26 = vadd.f32 %v1913_v34, %v1873_v7 }
 0x610   :  { %v1876_v49 = vpop.xlane.xlu1 %1875  ;;  %v1846_v27 = vpop.xlane.xlu0 %1845 }
 0x611   :  { %v1899_v18 = vadd.f32 %v1898_v20, %v1846_v27  ;;  %v1915_v61 = vadd.f32 %v1914_v26, %v1876_v49 }
 0x614   :  { %v1879_v14 = vpop.xlane.xlu1 %1878  ;;  %v1849_v38 = vpop.xlane.xlu0 %1848 }
 0x615   :  { %v1900_v63 = vadd.f32 %v1899_v18, %v1849_v38  ;;  %v1916_v9 = vadd.f32 %v1915_v61, %v1879_v14 }
 0x618   :  { %v1882_v16 = vpop.xlane.xlu1 %1881  ;;  %v1852_v12 = vpop.xlane.xlu0 %1851 }
 0x619   :  { %v1901_v2 = vadd.f32 %v1900_v63, %v1852_v12  ;;  %v1917_v6 = vadd.f32 %v1916_v9, %v1882_v16 }
 0x61c   :  { %v1885_v31 = vpop.xlane.xlu1 %1884  ;;  %v1855_v40 = vpop.xlane.xlu0 %1854 }
 0x61d   :  { %v1902_v28 = vadd.f32 %v1901_v2, %v1855_v40  ;;  %v1918_v50 = vadd.f32 %v1917_v6, %v1885_v31 }
 0x620   :  { %v1888_v15 = vpop.xlane.xlu1 %1887  ;;  %v1858_v55 = vpop.xlane.xlu0 %1857 }
 0x621   :  { %v1903_v60 = vadd.f32 %v1902_v28, %v1858_v55  ;;  %v1919_v19 = vadd.f32 %v1918_v50, %v1888_v15 }
 0x624   :  { %v1891_v42 = vpop.xlane.xlu1 %1890  ;;  %v1861_v37 = vpop.xlane.xlu0 %1860 }
 0x625   :  { %v1904_v13 = vsel %vm1198_vm3, %v1861_v37, 0.0  ;;  %v1920_v7 = vadd.f32 %v1919_v19, %v1891_v42 }
 0x626   :  { %v1905_v57 = vadd.f32 %v1904_v13, %v1903_v60 }
 0x628   :  { %v1906_v27 = vrot.slane %v1905_v57, 4  ;;  %v1894_v47 = vpop.xlane.xlu1 %1893 }
 0x629   :  { %v1921_v49 = vsel %vm1198_vm3, %v1894_v47, 0.0 }
 0x62a   :  { %v1907_v38 = vadd.f32 %v1906_v27, %v1905_v57  ;;  %v1922_v14 = vadd.f32 %v1921_v49, %v1920_v7 }
 0x62c   :  { %v1908_v11 = vrot.slane %v1907_v38, 2  ;;  %v1923_v33 = vrot.slane %v1922_v14, 4 }
 0x62e   :  { %v1909_v58 = vadd.f32 %v1908_v11, %v1907_v38  ;;  %v1924_v16 = vadd.f32 %v1923_v33, %v1922_v14 }
 0x630   :  { %v1910_v12 = vrot.slane %v1909_v58, 1  ;;  %v1925_v34 = vrot.slane %v1924_v16, 2 }
 0x632   :  { %v1911_v20 = vadd.f32 %v1910_v12, %v1909_v58  ;;  %v1926_v26 = vadd.f32 %v1925_v34, %v1924_v16 }
 0x634   :  { %v6870_v18 = vmul.f32 0.00038580247, %v1911_v20  ;;  %v1927_v31 = vrot.slane %v1926_v26, 1 }
 0x636   :  { %v1928_v40 = vadd.f32 %v1927_v31, %v1926_v26  ;;  %v6874_v61 = vsub.f32 %v6788_v35, %v6870_v18  ;;  %v6878_v63 = vsub.f32 %v6782_v24, %v6870_v18  ;;  %v6888_v55 = vsub.f32 %v6796_v52, %v6870_v18 }
 0x637   :  { %v6912_v42 = vsub.f32 %v6804_v8, %v6870_v18  ;;  %v6926_v8 = vsub.f32 %v6812_v23, %v6870_v18  ;;  %v6940_v23 = vsub.f32 %v6820_v4, %v6870_v18  ;;  %v6954_v4 = vsub.f32 %v6828_v32, %v6870_v18 }
 0x638   :  { %v6880_v9 = vmul.f32 0.00038580247, %v1928_v40  ;;  %v1954_v2 = vmul.f32 %v6874_v61, %v6874_v61  ;;  %v1953_v15 = vmul.f32 %v6878_v63, %v6878_v63 }
 0x639   :  { %v1956_v19 = vmul.f32 %v6912_v42, %v6912_v42  ;;  %v1957_v47 = vmul.f32 %v6926_v8, %v6926_v8  ;;  %v1958_v11 = vmul.f32 %v6940_v23, %v6940_v23  ;;  %v1959_v34 = vmul.f32 %v6954_v4, %v6954_v4 }
 0x63a   :  { %v1978_v6 = vsel %vm158_vm0, %v1954_v2, 0.0  ;;  %v1975_v35 = vsel %vm158_vm0, %v1953_v15, 0.0  ;;  %v6894_v24 = vsub.f32 %v6786_v30, %v6880_v9  ;;  %v6898_v28 = vsub.f32 %v6780_v59, %v6880_v9 }
 0x63b   :  { %1979 = vadd.xlane.f32.xlu1 %v1978_v6  ;;  %1976 = vadd.xlane.f32.xlu0 %v1975_v35  ;;  %v6902_v50 = vsub.f32 %v6794_v48, %v6880_v9  ;;  %v1955_v30 = vmul.f32 %v6888_v55, %v6888_v55  ;;  %v6920_v13 = vsub.f32 %v6802_v5, %v6880_v9  ;;  %v1984_v38 = vsel %vm158_vm0, %v1956_v19, 0.0 }
 0x63c   :  { %v1965_v52 = vmul.f32 %v6894_v24, %v6894_v24  ;;  %v1964_v60 = vmul.f32 %v6898_v28, %v6898_v28  ;;  %v6934_v5 = vsub.f32 %v6810_v44, %v6880_v9  ;;  %v6948_v44 = vsub.f32 %v6818_v56, %v6880_v9 }
 0x63d   :  { %v1966_v48 = vmul.f32 %v6902_v50, %v6902_v50  ;;  %v1981_v7 = vsel %vm158_vm0, %v1955_v30, 0.0  ;;  %v1967_v27 = vmul.f32 %v6920_v13, %v6920_v13  ;;  %v1987_v58 = vsel %vm158_vm0, %v1957_v47, 0.0 }
 0x63e   :  { %v2011_v59 = vsel %vm158_vm0, %v1965_v52, 0.0  ;;  %v2008_v37 = vsel %vm158_vm0, %v1964_v60, 0.0  ;;  %v1968_v14 = vmul.f32 %v6934_v5, %v6934_v5  ;;  %v1969_v16 = vmul.f32 %v6948_v44, %v6948_v44 }
 0x63f   :  { %2012 = vadd.xlane.f32.xlu1 %v2011_v59  ;;  %2009 = vadd.xlane.f32.xlu0 %v2008_v37  ;;  %v2014_v57 = vsel %vm158_vm0, %v1966_v48, 0.0  ;;  %v2017_v49 = vsel %vm158_vm0, %v1967_v27, 0.0  ;;  %v6962_v56 = vsub.f32 %v6826_v51, %v6880_v9  ;;  %v1990_v12 = vsel %vm158_vm0, %v1958_v11, 0.0 }
 0x640   :  { %v2020_v33 = vsel %vm158_vm0, %v1968_v14, 0.0  ;;  %v2023_v32 = vsel %vm158_vm0, %v1969_v16, 0.0  ;;  %v6972_v26 = vsub.f32 %v6834_v29, %v6880_v9  ;;  %v6976_v51 = vsub.f32 %v6836_v41, %v6870_v18 }
 0x641   :  { %v1970_v20 = vmul.f32 %v6962_v56, %v6962_v56  ;;  %v1993_v31 = vsel %vm158_vm0, %v1959_v34, 0.0  ;;  %v6981_v40 = vsub.f32 %v6842_v22, %v6880_v9  ;;  %v6990_v41 = vsub.f32 %v6844_v39, %v6870_v18 }
 0x642   :  { %v1971_v15 = vmul.f32 %v6972_v26, %v6972_v26  ;;  %v1960_v29 = vmul.f32 %v6976_v51, %v6976_v51  ;;  %v6994_v6 = vsub.f32 %v6850_v3, %v6880_v9  ;;  %v6998_v22 = vsub.f32 %v6852_v0, %v6870_v18 }
 0x643   :  { %2015 = vadd.xlane.f32.xlu1 %v2014_v57  ;;  %1982 = vadd.xlane.f32.xlu0 %v1981_v7  ;;  %v2026_v2 = vsel %vm158_vm0, %v1970_v20, 0.0  ;;  %v1972_v60 = vmul.f32 %v6981_v40, %v6981_v40  ;;  %v1961_v39 = vmul.f32 %v6990_v41, %v6990_v41  ;;  %v7014_v37 = vsub.f32 %v6858_v62, %v6880_v9 }
 0x644   :  { %v2029_v35 = vsel %vm158_vm0, %v1971_v15, 0.0  ;;  %v1996_v52 = vsel %vm158_vm0, %v1960_v29, 0.0  ;;  %v1973_v3 = vmul.f32 %v6994_v6, %v6994_v6  ;;  %v1962_v30 = vmul.f32 %v6998_v22, %v6998_v22 }
 0x645   :  { %v2032_v0 = vsel %vm158_vm0, %v1972_v60, 0.0  ;;  %v1999_v59 = vsel %vm158_vm0, %v1961_v39, 0.0  ;;  %v7018_v48 = vsub.f32 %v6860_v45, %v6870_v18  ;;  %v1974_v7 = vmul.f32 %v7014_v37, %v7014_v37  ;;  %v2244_v45 = vld [vmem:[%s7615_s11] sm:$0xff] }
 0x646   :  { %v2035_v19 = vsel %vm158_vm0, %v1973_v3, 0.0  ;;  %v2002_v57 = vsel %vm158_vm0, %v1962_v30, 0.0  ;;  %5102 = vmatprep.mubr.msk.f32.mxu0 %vm2248_vm14, %v2244_v45  ;;  %5130 = vmatprep.mubr.msk.f32.mxu1 %vm2248_vm14, %v2244_v45 }
 0x647   :  { %2018 = vadd.xlane.f32.xlu1 %v2017_v49  ;;  %1985 = vadd.xlane.f32.xlu0 %v1984_v38  ;;  %v1963_v27 = vmul.f32 %v7018_v48, %v7018_v48  ;;  %v2038_v62 = vsel %vm189_vm1, %v1974_v7, 0.0 }
 0x649   :  { %v2005_v9 = vsel %vm189_vm1, %v1963_v27, 0.0 }
 0x64b   :  { %2021 = vadd.xlane.f32.xlu1 %v2020_v33  ;;  %1988 = vadd.xlane.f32.xlu0 %v1987_v58 }
 0x64f   :  { %2024 = vadd.xlane.f32.xlu1 %v2023_v32  ;;  %1991 = vadd.xlane.f32.xlu0 %v1990_v12 }
 0x653   :  { %2027 = vadd.xlane.f32.xlu1 %v2026_v2  ;;  %1994 = vadd.xlane.f32.xlu0 %v1993_v31 }
 0x657   :  { %2030 = vadd.xlane.f32.xlu1 %v2029_v35  ;;  %1997 = vadd.xlane.f32.xlu0 %v1996_v52 }
 0x65b   :  { %2033 = vadd.xlane.f32.xlu1 %v2032_v0  ;;  %2000 = vadd.xlane.f32.xlu0 %v1999_v59 }
 0x65f   :  { %2036 = vadd.xlane.f32.xlu1 %v2035_v19  ;;  %2003 = vadd.xlane.f32.xlu0 %v2002_v57 }
 0x663   :  { %2039 = vadd.xlane.f32.xlu1 %v2038_v62  ;;  %2006 = vadd.xlane.f32.xlu0 %v2005_v9 }
 0x6c4   :  { %v1980_v18 = vpop.xlane.xlu1 %1979  ;;  %v1977_v47 = vpop.xlane.xlu0 %1976 }
 0x6c5   :  { %v2041_v20 = vadd.f32 %v1980_v18, %v1977_v47 }
 0x6c8   :  { %v2013_v49 = vpop.xlane.xlu1 %2012  ;;  %v2010_v38 = vpop.xlane.xlu0 %2009 }
 0x6c9   :  { %v2058_v31 = vadd.f32 %v2013_v49, %v2010_v38 }
 0x6cc   :  { %v2016_v14 = vpop.xlane.xlu1 %2015  ;;  %v1983_v11 = vpop.xlane.xlu0 %1982 }
 0x6cd   :  { %v2059_v29 = vadd.f32 %v2058_v31, %v2016_v14  ;;  %v2042_v35 = vadd.f32 %v2041_v20, %v1983_v11 }
 0x6d0   :  { %v2019_v33 = vpop.xlane.xlu1 %2018  ;;  %v1986_v58 = vpop.xlane.xlu0 %1985 }
 0x6d1   :  { %v2060_v52 = vadd.f32 %v2059_v29, %v2019_v33  ;;  %v2043_v60 = vadd.f32 %v2042_v35, %v1986_v58 }
 0x6d4   :  { %v2022_v16 = vpop.xlane.xlu1 %2021  ;;  %v1989_v12 = vpop.xlane.xlu0 %1988 }
 0x6d5   :  { %v2061_v30 = vadd.f32 %v2060_v52, %v2022_v16  ;;  %v2044_v0 = vadd.f32 %v2043_v60, %v1989_v12 }
 0x6d8   :  { %v2025_v34 = vpop.xlane.xlu1 %2024  ;;  %v1992_v32 = vpop.xlane.xlu0 %1991 }
 0x6d9   :  { %v2062_v59 = vadd.f32 %v2061_v30, %v2025_v34  ;;  %v2045_v19 = vadd.f32 %v2044_v0, %v1992_v32 }
 0x6dc   :  { %v2028_v2 = vpop.xlane.xlu1 %2027  ;;  %v1995_v15 = vpop.xlane.xlu0 %1994 }
 0x6dd   :  { %v2063_v27 = vadd.f32 %v2062_v59, %v2028_v2  ;;  %v2046_v62 = vadd.f32 %v2045_v19, %v1995_v15 }
 0x6e0   :  { %v2031_v39 = vpop.xlane.xlu1 %2030  ;;  %v1998_v3 = vpop.xlane.xlu0 %1997 }
 0x6e1   :  { %v2064_v9 = vadd.f32 %v2063_v27, %v2031_v39  ;;  %v2047_v45 = vadd.f32 %v2046_v62, %v1998_v3  ;;  %v7037_v62 = vld [vmem:[#allocation9 + $0x4] ss:$0 sm:$0xff] }
 0x6e4   :  { %v2034_v57 = vpop.xlane.xlu1 %2033  ;;  %v2001_v7 = vpop.xlane.xlu0 %2000 }
 0x6e5   :  { %v2065_v49 = vadd.f32 %v2064_v9, %v2034_v57  ;;  %v2048_v38 = vadd.f32 %v2047_v45, %v2001_v7  ;;  %v7039_v9 = vstv %s4467_s20 }
 0x6e8   :  { %v2037_v18 = vpop.xlane.xlu1 %2036  ;;  %v2004_v47 = vpop.xlane.xlu0 %2003 }
 0x6e9   :  { %v2066_v14 = vadd.f32 %v2065_v49, %v2037_v18  ;;  %v2049_v11 = vadd.f32 %v2048_v38, %v2004_v47 }
 0x6ec   :  { %v2040_v33 = vpop.xlane.xlu1 %2039  ;;  %v2007_v58 = vpop.xlane.xlu0 %2006 }
 0x6ed   :  { %v2067_v20 = vsel %vm1198_vm3, %v2040_v33, 0.0  ;;  %v2050_v16 = vsel %vm1198_vm3, %v2007_v58, 0.0 }
 0x6ee   :  { %v2068_v12 = vadd.f32 %v2067_v20, %v2066_v14  ;;  %v2051_v34 = vadd.f32 %v2050_v16, %v2049_v11  ;;  %v7051_v14 = vld [vmem:[#allocation9 + $0x5] ss:$0 sm:$0xff] }
 0x6f0   :  { %v2069_v32 = vrot.slane %v2068_v12, 4  ;;  %v2052_v31 = vrot.slane %v2051_v34, 4 }
 0x6f2   :  { %v2070_v2 = vadd.f32 %v2069_v32, %v2068_v12  ;;  %v2053_v15 = vadd.f32 %v2052_v31, %v2051_v34 }
 0x6f4   :  { %v2071_v29 = vrot.slane %v2070_v2, 2  ;;  %v2054_v35 = vrot.slane %v2053_v15, 2 }
 0x6f6   :  { %v2072_v52 = vadd.f32 %v2071_v29, %v2070_v2  ;;  %v2055_v60 = vadd.f32 %v2054_v35, %v2053_v15 }
 0x6f8   :  { %v2073_v39 = vrot.slane %v2072_v52, 1  ;;  %v2056_v3 = vrot.slane %v2055_v60, 1 }
 0x6fa   :  { %v2074_v30 = vadd.f32 %v2073_v39, %v2072_v52  ;;  %v2057_v0 = vadd.f32 %v2056_v3, %v2055_v60 }
 0x6fc   :  { %v2076_v59 = vmul.f32 0.00038580247, %v2074_v30  ;;  %v2075_v19 = vmul.f32 0.00038580247, %v2057_v0 }
 0x6fe   :  { %v2078_v57 = vadd.f32 1e-08, %v2076_v59  ;;  %v2077_v7 = vadd.f32 1e-08, %v2075_v19 }
 0x700   :  { %5447 = vrsqrt.f32 %v2078_v57 }
 0x701   :  { %5449 = vrsqrt.f32 %v2077_v7 }
 0x70d   :  { %v7035_v27 = vpop.eup %5447 }
 0x70e   :  { %v7041_v45 = vpop.eup %5449  ;;  %v2102_v18 = vmul.f32 %v7035_v27, %v7014_v37  ;;  %v2101_v47 = vmul.f32 %v7035_v27, %v6994_v6  ;;  %v2100_v49 = vmul.f32 %v7035_v27, %v6981_v40  ;;  %v2099_v38 = vmul.f32 %v7035_v27, %v6972_v26 }
 0x70f   :  { %v2091_v11 = vmul.f32 %v7041_v45, %v7018_v48  ;;  %v2090_v33 = vmul.f32 %v7041_v45, %v6998_v22  ;;  %v2089_v37 = vmul.f32 %v7041_v45, %v6990_v41  ;;  %v2088_v6 = vmul.f32 %v7041_v45, %v6976_v51 }
 0x710   :  { %v2128_v58 = vmul.f32 %v7037_v62, %v2102_v18  ;;  %v2127_v40 = vmul.f32 %v7037_v62, %v2101_v47  ;;  %v2126_v26 = vmul.f32 %v7037_v62, %v2100_v49  ;;  %v2125_v20 = vmul.f32 %v7037_v62, %v2099_v38 }
 0x711   :  { %v2117_v16 = vmul.f32 %v7037_v62, %v2091_v11  ;;  %v2116_v48 = vmul.f32 %v7037_v62, %v2090_v33  ;;  %v2115_v22 = vmul.f32 %v7037_v62, %v2089_v37  ;;  %v2114_v12 = vmul.f32 %v7037_v62, %v2088_v6 }
 0x712   :  { %v2154_v41 = vadd.f32 %v7051_v14, %v2128_v58  ;;  %v2153_v51 = vadd.f32 %v7051_v14, %v2127_v40  ;;  %v2152_v34 = vadd.f32 %v7051_v14, %v2126_v26  ;;  %v2151_v32 = vadd.f32 %v7051_v14, %v2125_v20 }
 0x713   :  { %v2143_v31 = vadd.f32 %v7051_v14, %v2117_v16  ;;  %v2142_v2 = vadd.f32 %v7051_v14, %v2116_v48  ;;  %v2141_v15 = vadd.f32 %v7051_v14, %v2115_v22  ;;  %v2140_v29 = vadd.f32 %v7051_v14, %v2114_v12 }
 0x714   :  { %v2176_v35 = vadd.f32 %v2154_v41, %v6334_v25  ;;  %v2175_v52 = vadd.f32 %v2153_v51, %v6322_v53  ;;  %v2174_v60 = vadd.f32 %v2152_v34, %v6310_v21  ;;  %v2173_v39 = vadd.f32 %v2151_v32, %v6298_v46  ;;  %v7653_v34 = vld [vmem:[#allocation31_spill] sm:$0xff]  ;;  %v7654_v32 = vld [vmem:[#allocation29_spill] sm:$0xff] }
 0x715   :  { %v2165_v3 = vadd.f32 %v2143_v31, %v6324_v54  ;;  %v2164_v30 = vadd.f32 %v2142_v2, %v6312_v1  ;;  %v2163_v0 = vadd.f32 %v2141_v15, %v6300_v36  ;;  %v2162_v59 = vadd.f32 %v2140_v29, %v6288_v43 }
 0x716   :  { %vm2198_vm15 = vcmp.ge.f32.partialorder %v2176_v35, 0.0  ;;  %v2221_v19 = vmul.f32 %v7039_v9, %v2176_v35  ;;  %vm2197_vm4 = vcmp.ge.f32.partialorder %v2175_v52, 0.0  ;;  %v2220_v25 = vmul.f32 %v7039_v9, %v2175_v52 }
 0x717   :  { %vm2187_vm5 = vcmp.ge.f32.partialorder %v2165_v3, 0.0  ;;  %v2210_v53 = vmul.f32 %v7039_v9, %v2165_v3  ;;  %vm2186_vm6 = vcmp.ge.f32.partialorder %v2164_v30, 0.0  ;;  %v2209_v46 = vmul.f32 %v7039_v9, %v2164_v30 }
 0x718   :  { %v2243_v21 = vsel %vm2198_vm15, %v2176_v35, %v2221_v19  ;;  %v2242_v54 = vsel %vm2197_vm4, %v2175_v52, %v2220_v25  ;;  %vm2185_vm7 = vcmp.ge.f32.partialorder %v2163_v0, 0.0  ;;  %v2208_v1 = vmul.f32 %v7039_v9, %v2163_v0  ;;  %v7657_v19 = vld [vmem:[#allocation28_spill] sm:$0xff] }
 0x719   :  { %v2232_v36 = vsel %vm2187_vm5, %v2165_v3, %v2210_v53  ;;  %5108 = vmatprep.subr.msk.mxu1 %vm1198_vm3, %v2243_v21  ;;  %v2231_v43 = vsel %vm2186_vm6, %v2164_v30, %v2209_v46  ;;  %vm2196_vm8 = vcmp.ge.f32.partialorder %v2174_v60, 0.0  ;;  %v2219_v57 = vmul.f32 %v7039_v9, %v2174_v60  ;;  %v7656_v30 = vld [vmem:[#allocation27_spill] sm:$0xff] }
 0x71a   :  { %5080 = vmatprep.subr.msk.mxu0 %vm1198_vm3, %v2232_v36  ;;  %5109 = vmatpush3.msk.msra.mxu1 %vm1198_vm3, %v2243_v21  ;;  %v2230_v7 = vsel %vm2185_vm7, %v2163_v0, %v2208_v1  ;;  %vm2184_vm9 = vcmp.ge.f32.partialorder %v2162_v59, 0.0  ;;  %v2207_v18 = vmul.f32 %v7039_v9, %v2162_v59  ;;  %vm2195_vm10 = vcmp.ge.f32.partialorder %v2173_v39, 0.0 }
 0x71b   :  { %5081 = vmatpush3.msk.msra.mxu0 %vm1198_vm3, %v2232_v36  ;;  %5110 = vmatprep.subr.mxu1 %v2242_v54  ;;  %v2241_v47 = vsel %vm2196_vm8, %v2174_v60, %v2219_v57  ;;  %v2218_v49 = vmul.f32 %v7039_v9, %v2173_v39  ;;  %v2087_v38 = vmul.f32 %v7041_v45, %v6954_v4 }
 0x71c   :  { %5082 = vmatprep.subr.mxu0 %v2231_v43  ;;  %5111 = vmatpush3.msra.mxu1 %v2242_v54  ;;  %v2229_v11 = vsel %vm2184_vm9, %v2162_v59, %v2207_v18  ;;  %v2098_v33 = vmul.f32 %v7035_v27, %v6962_v56  ;;  %v2086_v37 = vmul.f32 %v7041_v45, %v6940_v23 }
 0x71d   :  { %5083 = vmatpush3.msra.mxu0 %v2231_v43  ;;  %5112 = vmatprep.subr.mxu1 %v2241_v47  ;;  %v2240_v6 = vsel %vm2195_vm10, %v2173_v39, %v2218_v49  ;;  %v2113_v58 = vmul.f32 %v7037_v62, %v2087_v38  ;;  %v2097_v40 = vmul.f32 %v7035_v27, %v6948_v44  ;;  %v7658_v49 = vld [vmem:[#allocation25_spill] sm:$0xff] }
 0x71e   :  { %5084 = vmatprep.subr.mxu0 %v2230_v7  ;;  %5113 = vmatpush3.msra.mxu1 %v2241_v47  ;;  %v2124_v4 = vmul.f32 %v7037_v62, %v2098_v33  ;;  %v2112_v26 = vmul.f32 %v7037_v62, %v2086_v37  ;;  %v2085_v56 = vmul.f32 %v7041_v45, %v6926_v8  ;;  %v7659_v33 = vld [vmem:[#allocation26_spill] sm:$0xff] }
 0x71f   :  { %5085 = vmatpush3.msra.mxu0 %v2230_v7  ;;  %5114 = vmatprep.subr.mxu1 %v2240_v6  ;;  %v2139_v23 = vadd.f32 %v7051_v14, %v2113_v58  ;;  %v2123_v20 = vmul.f32 %v7037_v62, %v2097_v40  ;;  %v2096_v16 = vmul.f32 %v7035_v27, %v6934_v5 }
 0x720   :  { %5086 = vmatprep.subr.mxu0 %v2229_v11  ;;  %5115 = vmatpush3.msra.mxu1 %v2240_v6  ;;  %v2150_v44 = vadd.f32 %v7051_v14, %v2124_v4  ;;  %v2138_v48 = vadd.f32 %v7051_v14, %v2112_v26  ;;  %v2111_v22 = vmul.f32 %v7037_v62, %v2085_v56 }
 0x721   :  { %5087 = vmatpush3.msra.mxu0 %v2229_v11  ;;  %v2161_v8 = vadd.f32 %v2139_v23, %v6276_v17  ;;  %v2149_v12 = vadd.f32 %v7051_v14, %v2123_v20  ;;  %v2122_v41 = vmul.f32 %v7037_v62, %v2096_v16  ;;  %v2084_v51 = vmul.f32 %v7041_v45, %v6912_v42  ;;  %v7655_v17 = vld [vmem:[#allocation30_spill] sm:$0xff]  ;;  %v7660_v20 = vld [vmem:[#allocation23_spill] sm:$0xff] }
 0x722   :  { %v2172_v5 = vadd.f32 %v2150_v44, %v7653_v34  ;;  %v2160_v31 = vadd.f32 %v2138_v48, %v7654_v32  ;;  %v2137_v2 = vadd.f32 %v7051_v14, %v2111_v22  ;;  %v2095_v15 = vmul.f32 %v7035_v27, %v6920_v13  ;;  %v7661_v22 = vld [vmem:[#allocation24_spill] sm:$0xff] }
 0x723   :  { %vm2183_vm11 = vcmp.ge.f32.partialorder %v2161_v8, 0.0  ;;  %v2206_v29 = vmul.f32 %v7039_v9, %v2161_v8  ;;  %v2171_v35 = vadd.f32 %v2149_v12, %v7655_v17  ;;  %v2148_v52 = vadd.f32 %v7051_v14, %v2122_v41 }
 0x724   :  { %vm2194_vm12 = vcmp.ge.f32.partialorder %v2172_v5, 0.0  ;;  %v2217_v60 = vmul.f32 %v7039_v9, %v2172_v5  ;;  %vm2182_vm13 = vcmp.ge.f32.partialorder %v2160_v31, 0.0  ;;  %v2205_v42 = vmul.f32 %v7039_v9, %v2160_v31 }
 0x725   :  { %v2228_v39 = vsel %vm2183_vm11, %v2161_v8, %v2206_v29  ;;  %vm2193_vm15 = vcmp.ge.f32.partialorder %v2171_v35, 0.0  ;;  %v2216_v3 = vmul.f32 %v7039_v9, %v2171_v35  ;;  %v2159_v0 = vadd.f32 %v2137_v2, %v7656_v30  ;;  %v7663_v2 = vld [vmem:[#allocation22_spill] sm:$0xff] }
 0x726   :  { %5088 = vmatprep.subr.mxu0 %v2228_v39  ;;  %v2239_v13 = vsel %vm2194_vm12, %v2172_v5, %v2217_v60  ;;  %v2227_v59 = vsel %vm2182_vm13, %v2160_v31, %v2205_v42  ;;  %v2170_v25 = vadd.f32 %v2148_v52, %v7657_v19  ;;  %v2110_v53 = vmul.f32 %v7037_v62, %v2084_v51  ;;  %v7664_v52 = vld [vmem:[#allocation19_spill] sm:$0xff]  ;;  %v7665_v42 = vld [vmem:[#allocation20_spill] sm:$0xff] }
 0x727   :  { %5116 = vmatprep.subr.mxu1 %v2239_v13  ;;  %5089 = vmatpush3.msra.mxu0 %v2228_v39  ;;  %v2238_v46 = vsel %vm2193_vm15, %v2171_v35, %v2216_v3  ;;  %vm2181_vm4 = vcmp.ge.f32.partialorder %v2159_v0, 0.0  ;;  %v2204_v21 = vmul.f32 %v7039_v9, %v2159_v0  ;;  %v2121_v54 = vmul.f32 %v7037_v62, %v2095_v15  ;;  %v2246_v19 = vld [vmem:[%s7615_s11 + $0x10] sm:$0xff] }
 0x728   :  { %5117 = vmatpush3.msra.mxu1 %v2239_v13  ;;  %5090 = vmatprep.subr.mxu0 %v2227_v59  ;;  %vm2192_vm5 = vcmp.ge.f32.partialorder %v2170_v25, 0.0  ;;  %v2215_v1 = vmul.f32 %v7039_v9, %v2170_v25  ;;  %v2136_v36 = vadd.f32 %v7051_v14, %v2110_v53  ;;  %v2083_v43 = vmul.f32 %v7041_v45, %v6888_v55  ;;  %v2245_v13 = vld [vmem:[%s7615_s11 + $0x8] sm:$0xff]  ;;  %v2441_v53 = vld [vmem:[#allocation6 + $0x10] sm:$0xff] }
 0x729   :  { %5118 = vmatprep.subr.mxu1 %v2238_v46  ;;  %5091 = vmatpush3.msra.mxu0 %v2227_v59  ;;  %v2226_v57 = vsel %vm2181_vm4, %v2159_v0, %v2204_v21  ;;  %v2147_v7 = vadd.f32 %v7051_v14, %v2121_v54  ;;  %v2094_v18 = vmul.f32 %v7035_v27, %v6902_v50  ;;  %v2439_v21 = vld [vmem:[#allocation6] sm:$0xff]  ;;  %vm2649_vm15 = vcmask 518144  }
 0x72a   :  { %5119 = vmatpush3.msra.mxu1 %v2238_v46  ;;  %5092 = vmatprep.subr.mxu0 %v2226_v57  ;;  %v2237_v47 = vsel %vm2192_vm5, %v2170_v25, %v2215_v1  ;;  %v2158_v38 = vadd.f32 %v2136_v36, %v7658_v49  ;;  %v2109_v11 = vmul.f32 %v7037_v62, %v2083_v43  ;;  %v2442_v25 = vld [vmem:[#allocation6 + $0x18] sm:$0xff]  ;;  %v2440_v46 = vld [vmem:[#allocation6 + $0x8] sm:$0xff]  ;;  %vm2667_vm4 = vcmask 1042432  }
 0x72b   :  { %5120 = vmatprep.subr.mxu1 %v2237_v47  ;;  %5093 = vmatpush3.msra.mxu0 %v2226_v57  ;;  %v2169_v37 = vadd.f32 %v2147_v7, %v7659_v33  ;;  %v2120_v55 = vmul.f32 %v7037_v62, %v2094_v18  ;;  %v2082_v6 = vmul.f32 %v7041_v45, %v6874_v61 }
 0x72c   :  { %5121 = vmatpush3.msra.mxu1 %v2237_v47  ;;  %vm2180_vm6 = vcmp.ge.f32.partialorder %v2158_v38, 0.0  ;;  %v2203_v50 = vmul.f32 %v7039_v9, %v2158_v38  ;;  %v2135_v58 = vadd.f32 %v7051_v14, %v2109_v11  ;;  %v2093_v40 = vmul.f32 %v7035_v27, %v6894_v24 }
 0x72d   :  { %vm2191_vm7 = vcmp.ge.f32.partialorder %v2169_v37, 0.0  ;;  %v2214_v4 = vmul.f32 %v7039_v9, %v2169_v37  ;;  %v2146_v26 = vadd.f32 %v7051_v14, %v2120_v55  ;;  %v2108_v56 = vmul.f32 %v7037_v62, %v2082_v6 }
 0x72e   :  { %v2225_v23 = vsel %vm2180_vm6, %v2158_v38, %v2203_v50  ;;  %v2157_v16 = vadd.f32 %v2135_v58, %v7660_v20  ;;  %v2119_v61 = vmul.f32 %v7037_v62, %v2093_v40  ;;  %v2081_v44 = vmul.f32 %v7041_v45, %v6878_v63  ;;  %v7662_v45 = vld [vmem:[#allocation21_spill] sm:$0xff] }
 0x72f   :  { %5094 = vmatprep.subr.mxu0 %v2225_v23  ;;  %v2236_v48 = vsel %vm2191_vm7, %v2169_v37, %v2214_v4  ;;  %v2168_v8 = vadd.f32 %v2146_v26, %v7661_v22  ;;  %v2134_v24 = vadd.f32 %v7051_v14, %v2108_v56  ;;  %v2092_v12 = vmul.f32 %v7035_v27, %v6898_v28 }
 0x730   :  { %5122 = vmatprep.subr.mxu1 %v2236_v48  ;;  %5095 = vmatpush3.msra.mxu0 %v2225_v23  ;;  %vm2179_vm8 = vcmp.ge.f32.partialorder %v2157_v16, 0.0  ;;  %v2202_v41 = vmul.f32 %v7039_v9, %v2157_v16  ;;  %v2145_v51 = vadd.f32 %v7051_v14, %v2119_v61  ;;  %v2107_v34 = vmul.f32 %v7037_v62, %v2081_v44 }
 0x731   :  { %5123 = vmatpush3.msra.mxu1 %v2236_v48  ;;  %vm2190_vm9 = vcmp.ge.f32.partialorder %v2168_v8, 0.0  ;;  %v2213_v63 = vmul.f32 %v7039_v9, %v2168_v8  ;;  %v2156_v5 = vadd.f32 %v2134_v24, %v7662_v45  ;;  %v2118_v32 = vmul.f32 %v7037_v62, %v2092_v12 }
 0x732   :  { %v2224_v31 = vsel %vm2179_vm8, %v2157_v16, %v2202_v41  ;;  %v2167_v28 = vadd.f32 %v2145_v51, %v7663_v2  ;;  %v2133_v27 = vadd.f32 %v7051_v14, %v2107_v34 }
 0x733   :  { %5096 = vmatprep.subr.mxu0 %v2224_v31  ;;  %v2235_v15 = vsel %vm2190_vm9, %v2168_v8, %v2213_v63  ;;  %vm2178_vm10 = vcmp.ge.f32.partialorder %v2156_v5, 0.0  ;;  %v2201_v29 = vmul.f32 %v7039_v9, %v2156_v5  ;;  %v2144_v17 = vadd.f32 %v7051_v14, %v2118_v32 }
 0x734   :  { %5124 = vmatprep.subr.mxu1 %v2235_v15  ;;  %5097 = vmatpush3.msra.mxu0 %v2224_v31  ;;  %vm2189_vm11 = vcmp.ge.f32.partialorder %v2167_v28, 0.0  ;;  %v2212_v35 = vmul.f32 %v7039_v9, %v2167_v28  ;;  %v2155_v60 = vadd.f32 %v2133_v27, %v7664_v52 }
 0x735   :  { %5125 = vmatpush3.msra.mxu1 %v2235_v15  ;;  %v2223_v62 = vsel %vm2178_vm10, %v2156_v5, %v2201_v29  ;;  %v2166_v39 = vadd.f32 %v2144_v17, %v7665_v42 }
 0x736   :  { %5098 = vmatprep.subr.mxu0 %v2223_v62  ;;  %v2234_v3 = vsel %vm2189_vm11, %v2167_v28, %v2212_v35  ;;  %vm2177_vm12 = vcmp.ge.f32.partialorder %v2155_v60, 0.0  ;;  %v2200_v30 = vmul.f32 %v7039_v9, %v2155_v60 }
 0x737   :  { %5126 = vmatprep.subr.mxu1 %v2234_v3  ;;  %5099 = vmatpush3.msra.mxu0 %v2223_v62  ;;  %vm2188_vm13 = vcmp.ge.f32.partialorder %v2166_v39, 0.0  ;;  %v2211_v14 = vmul.f32 %v7039_v9, %v2166_v39  ;;  %v2247_v9 = vld [vmem:[%s7615_s11 + $0x18] sm:$0x7] }
 0x738   :  { %5127 = vmatpush3.msra.mxu1 %v2234_v3  ;;  %v2222_v0 = vsel %vm2177_vm12, %v2155_v60, %v2200_v30 }
 0x739   :  { %5100 = vmatprep.subr.mxu0 %v2222_v0  ;;  %v2233_v59 = vsel %vm2188_vm13, %v2166_v39, %v2211_v14 }
 0x73a   :  { %5128 = vmatprep.subr.mxu1 %v2233_v59  ;;  %5101 = vmatpush3.msra.mxu0 %v2222_v0 }
 0x73b   :  { %5129 = vmatpush3.msra.mxu1 %v2233_v59  ;;  %5103 = vmatmul.mubr.msk.f32.vlgmr.msra.gmra.mxu0 %vm2248_vm14, %v2245_v13 }
 0x73c   :  { %5131 = vmatmul.mubr.msk.f32.vlgmr.msra.gmra.mxu1 %vm2248_vm14, %v2245_v13  ;;  %5105 = vmatprep.mubr.msk.f32.mxu0 %vm2248_vm14, %v2246_v19 }
 0x73d   :  { %5133 = vmatprep.mubr.msk.f32.mxu1 %vm2248_vm14, %v2246_v19  ;;  %5136 = vmatprep.subr.mxu0 %v2442_v25 }
 0x73e   :  { %5137 = vmatpush3.msra.mxu0 %v2442_v25  ;;  %5150 = vmatprep.subr.mxu1 %v2442_v25 }
 0x73f   :  { %5106 = vmatmul.mubr.msk.f32.gmra.mxu0 %vm2248_vm14, %v2247_v9  ;;  %5138 = vmatprep.subr.mxu0 %v2441_v53 }
 0x740   :  { %5134 = vmatmul.mubr.msk.f32.gmra.mxu1 %vm2248_vm14, %v2247_v9  ;;  %5139 = vmatpush3.msra.mxu0 %v2441_v53  ;;  %vm2639_vm14 = vcmask 523264  }
 0x741   :  { %5151 = vmatpush3.msra.mxu1 %v2442_v25  ;;  %5140 = vmatprep.subr.mxu0 %v2440_v46 }
 0x742   :  { %5152 = vmatprep.subr.mxu1 %v2441_v53  ;;  %5141 = vmatpush3.msra.mxu0 %v2440_v46 }
 0x743   :  { %5153 = vmatpush3.msra.mxu1 %v2441_v53  ;;  %5142 = vmatprep.subr.mxu0 %v2439_v21 }
 0x744   :  { %5154 = vmatprep.subr.mxu1 %v2440_v46  ;;  %5143 = vmatpush3.msra.mxu0 %v2439_v21 }
 0x745   :  { %5155 = vmatpush3.msra.mxu1 %v2440_v46 }
 0x746   :  { %5156 = vmatprep.subr.mxu1 %v2439_v21 }
 0x747   :  { %5157 = vmatpush3.msra.mxu1 %v2439_v21 }
 0x7fb   :  { %v7196_v54 = vpop.f32.mrf.mxu0 }
 0x7fc   :  { %v7198_v1 = vpop.f32.mrf.mxu1 }
 0x7fd   :  { %v7200_v36 = vpop.f32.mrf.mxu0 }
 0x7fe   :  { %5144 = vmatprep.mubr.msk.f32.mxu0 %vm158_vm0, %v7200_v36  ;;  %v7204_v43 = vpop.f32.mrf.mxu1 }
 0x7ff   :  { %5145 = vmatmul.mubr.msk.f32.vlgmr.msra.gmra.mxu0 %vm158_vm0, %v7196_v54  ;;  %5158 = vmatprep.mubr.msk.f32.mxu1 %vm158_vm0, %v7204_v43  ;;  %v7210_v57 = vpop.f32.mrf.mxu0 }
 0x800   :  { %v7212_v7 = vpop.f32.mrf.mxu1  ;;  %5159 = vmatmul.mubr.msk.f32.vlgmr.msra.gmra.mxu1 %vm158_vm0, %v7198_v1 }
 0x801   :  { %v7216_v18 = vpop.f32.mrf.mxu0 }
 0x802   :  { %v7218_v47 = vpop.f32.mrf.mxu1  ;;  %5147 = vmatprep.mubr.msk.f32.mxu0 %vm158_vm0, %v7216_v18 }
 0x803   :  { %5161 = vmatprep.mubr.msk.f32.mxu1 %vm158_vm0, %v7218_v47  ;;  %5148 = vmatmul.mubr.msk.f32.gmra.mxu0 %vm158_vm0, %v7210_v57 }
 0x804   :  { %5162 = vmatmul.mubr.msk.f32.gmra.mxu1 %vm158_vm0, %v7212_v7 }
 0x8bf   :  { %v5146_v49 = vpop.f32.mrf.mxu0 }
 0x8c0   :  { %v5160_v38 = vpop.f32.mrf.mxu1  ;;  %v2643_v11 = vsel %vm2639_vm14, %v5146_v49, 0.0 }
 0x8c1   :  { %2644 = vadd.xlane.f32.xlu1 %v2643_v11  ;;  %v2521_v33 = vpop.f32.mrf.mxu0  ;;  %v2656_v58 = vsel %vm2639_vm14, %v5160_v38, 0.0 }
 0x8c2   :  { %v2618_v37 = vpop.f32.mrf.mxu1  ;;  %v2640_v55 = vsel %vm2639_vm14, %v2521_v33, 0.0 }
 0x8c3   :  { %2641 = vadd.xlane.f32.xlu0 %v2640_v55  ;;  %v7230_v6 = vpop.f32.mrf.mxu0  ;;  %v2653_v4 = vsel %vm2639_vm14, %v2618_v37, 0.0 }
 0x8c4   :  { %v5163_v50 = vpop.f32.mrf.mxu1  ;;  %v2650_v16 = vsel %vm2649_vm15, %v7230_v6, 0.0 }
 0x8c5   :  { %2657 = vadd.xlane.f32.xlu1 %v2656_v58  ;;  %v2531_v56 = vpop.f32.mrf.mxu0  ;;  %v2662_v20 = vsel %vm2649_vm15, %v5163_v50, 0.0 }
 0x8c6   :  { %v2628_v40 = vpop.f32.mrf.mxu1  ;;  %v2646_v23 = vsel %vm2639_vm14, %v2531_v56, 0.0 }
 0x8c7   :  { %2654 = vadd.xlane.f32.xlu0 %v2653_v4  ;;  %v2659_v26 = vsel %vm2639_vm14, %v2628_v40, 0.0 }
 0x8c9   :  { %2660 = vadd.xlane.f32.xlu1 %v2659_v26 }
 0x8cb   :  { %2647 = vadd.xlane.f32.xlu0 %v2646_v23 }
 0x8cd   :  { %2663 = vadd.xlane.f32.xlu1 %v2662_v20 }
 0x8cf   :  { %2651 = vadd.xlane.f32.xlu0 %v2650_v16 }
 0x94a   :  { %v2645_v61 = vpop.xlane.xlu1 %2644 }
 0x94c   :  { %v2642_v44 = vpop.xlane.xlu0 %2641 }
 0x94d   :  { %v2665_v41 = vadd.f32 %v2645_v61, %v2642_v44  ;;  %v2817_v61 = vld [vmem:[%s7609_s5 + $0x30] sm:$0xff]  ;;  %v2816_v44 = vld [vmem:[%s7609_s5 + $0x28] sm:$0xff] }
 0x94e   :  { %v2658_v48 = vpop.xlane.xlu1 %2657 }
 0x950   :  { %v2655_v22 = vpop.xlane.xlu0 %2654 }
 0x951   :  { %v2676_v8 = vadd.f32 %v2658_v48, %v2655_v22  ;;  %v2815_v48 = vld [vmem:[%s7609_s5 + $0x20] sm:$0xff]  ;;  %v2814_v22 = vld [vmem:[%s7609_s5 + $0x18] sm:$0xff] }
 0x952   :  { %v2661_v24 = vpop.xlane.xlu1 %2660 }
 0x953   :  { %v2677_v51 = vadd.f32 %v2676_v8, %v2661_v24  ;;  %v2813_v8 = vld [vmem:[%s7609_s5 + $0x10] sm:$0xff]  ;;  %v2812_v24 = vld [vmem:[%s7609_s5 + $0x8] sm:$0xff] }
 0x954   :  { %v2648_v12 = vpop.xlane.xlu0 %2647 }
 0x955   :  { %v2666_v45 = vadd.f32 %v2665_v41, %v2648_v12  ;;  %v2811_v12 = vld [vmem:[%s7609_s5] sm:$0xff]  ;;  %v7306_v41 = vld [vmem:[#allocation8 + $0x18] sm:$0xff] }
 0x956   :  { %v2664_v34 = vpop.xlane.xlu1 %2663 }
 0x957   :  { %v2678_v63 = vsel %vm2667_vm4, %v2664_v34, 0.0 }
 0x958   :  { %v2679_v5 = vadd.f32 %v2678_v63, %v2677_v51  ;;  %v2652_v32 = vpop.xlane.xlu0 %2651 }
 0x959   :  { %v2668_v31 = vsel %vm2667_vm4, %v2652_v32, 0.0 }
 0x95a   :  { %v2680_v2 = vrot.slane %v2679_v5, 4  ;;  %v2669_v28 = vadd.f32 %v2668_v31, %v2666_v45 }
 0x95c   :  { %v2681_v27 = vadd.f32 %v2680_v2, %v2679_v5  ;;  %v2670_v15 = vrot.slane %v2669_v28, 4 }
 0x95e   :  { %v2682_v29 = vrot.slane %v2681_v27, 2  ;;  %v2671_v17 = vadd.f32 %v2670_v15, %v2669_v28 }
 0x960   :  { %v2683_v35 = vadd.f32 %v2682_v29, %v2681_v27  ;;  %v2672_v52 = vrot.slane %v2671_v17, 2 }
 0x962   :  { %v2684_v60 = vrot.slane %v2683_v35, 1  ;;  %v2673_v62 = vadd.f32 %v2672_v52, %v2671_v17 }
 0x964   :  { %v2685_v42 = vadd.f32 %v2684_v60, %v2683_v35  ;;  %v2674_v39 = vrot.slane %v2673_v62, 1 }
 0x966   :  { %v2687_v3 = vmul.f32 0.0005787037, %v2685_v42  ;;  %v2675_v30 = vadd.f32 %v2674_v39, %v2673_v62 }
 0x968   :  { %v2686_v14 = vmul.f32 0.0005787037, %v2675_v30  ;;  %v7241_v0 = vsub.f32 %v5160_v38, %v2687_v3  ;;  %v7247_v19 = vsub.f32 %v2618_v37, %v2687_v3  ;;  %v7255_v46 = vsub.f32 %v2628_v40, %v2687_v3 }
 0x969   :  { %v7265_v37 = vsub.f32 %v5163_v50, %v2687_v3 }
 0x96a   :  { %v7243_v13 = vsub.f32 %v5146_v49, %v2686_v14  ;;  %v7245_v59 = vsub.f32 %v2521_v33, %v2686_v14  ;;  %v2701_v53 = vmul.f32 %v7241_v0, %v7241_v0  ;;  %v2700_v38 = vmul.f32 %v7247_v19, %v7247_v19 }
 0x96b   :  { %v7261_v11 = vsub.f32 %v2531_v56, %v2686_v14  ;;  %v2702_v33 = vmul.f32 %v7255_v46, %v7255_v46  ;;  %v7272_v4 = vsub.f32 %v7230_v6, %v2686_v14  ;;  %v2703_v50 = vmul.f32 %v7265_v37, %v7265_v37  ;;  %v2818_v6 = vld [vmem:[%s7609_s5 + $0x38] sm:$0xff]  ;;  %s4526_s5 = sld [smem:[#allocation12 + $0x2]] }
 0x96c   :  { %v2697_v25 = vmul.f32 %v7243_v13, %v7243_v13  ;;  %v2696_v9 = vmul.f32 %v7245_v59, %v7245_v59  ;;  %v2719_v55 = vsel %vm2639_vm14, %v2701_v53, 0.0  ;;  %v2716_v58 = vsel %vm2639_vm14, %v2700_v38, 0.0  ;;  %5164 = vmatprep.subr.mxu0 %v2818_v6  ;;  %5186 = vmatprep.subr.mxu1 %v2818_v6 }
 0x96d   :  { %v2698_v40 = vmul.f32 %v7261_v11, %v7261_v11  ;;  %v2722_v26 = vsel %vm2639_vm14, %v2702_v33, 0.0  ;;  %v2699_v23 = vmul.f32 %v7272_v4, %v7272_v4  ;;  %v2725_v20 = vsel %vm2649_vm15, %v2703_v50, 0.0  ;;  %5165 = vmatpush3.msra.mxu0 %v2818_v6  ;;  %5187 = vmatpush3.msra.mxu1 %v2818_v6 }
 0x96e   :  { %v2707_v21 = vsel %vm2639_vm14, %v2697_v25, 0.0  ;;  %v2704_v49 = vsel %vm2639_vm14, %v2696_v9, 0.0  ;;  %5166 = vmatprep.subr.mxu0 %v2817_v61  ;;  %5188 = vmatprep.subr.mxu1 %v2817_v61 }
 0x96f   :  { %2708 = vadd.xlane.f32.xlu1 %v2707_v21  ;;  %2705 = vadd.xlane.f32.xlu0 %v2704_v49  ;;  %v2710_v56 = vsel %vm2639_vm14, %v2698_v40, 0.0  ;;  %v2713_v16 = vsel %vm2649_vm15, %v2699_v23, 0.0 }
 0x970   :  { %5167 = vmatpush3.msra.mxu0 %v2817_v61  ;;  %5189 = vmatpush3.msra.mxu1 %v2817_v61 }
 0x971   :  { %5168 = vmatprep.subr.mxu0 %v2816_v44  ;;  %5190 = vmatprep.subr.mxu1 %v2816_v44  ;;  %v2794_v50 = vstv %s4526_s5 }
 0x972   :  { %5169 = vmatpush3.msra.mxu0 %v2816_v44  ;;  %5191 = vmatpush3.msra.mxu1 %v2816_v44  ;;  %v4537_v44 = vld [vmem:[#allocation9 + $0x7] ss:$0 sm:$0xff] }
 0x973   :  { %2720 = vadd.xlane.f32.xlu1 %v2719_v55  ;;  %2717 = vadd.xlane.f32.xlu0 %v2716_v58 }
 0x974   :  { %5170 = vmatprep.subr.mxu0 %v2815_v48  ;;  %5192 = vmatprep.subr.mxu1 %v2815_v48 }
 0x975   :  { %5171 = vmatpush3.msra.mxu0 %v2815_v48  ;;  %5193 = vmatpush3.msra.mxu1 %v2815_v48 }
 0x976   :  { %5172 = vmatprep.subr.mxu0 %v2814_v22  ;;  %5194 = vmatprep.subr.mxu1 %v2814_v22 }
 0x977   :  { %2723 = vadd.xlane.f32.xlu1 %v2722_v26  ;;  %2711 = vadd.xlane.f32.xlu0 %v2710_v56  ;;  %v4536_v56 = vld [vmem:[#allocation9 + $0x6] ss:$0 sm:$0xff] }
 0x978   :  { %5173 = vmatpush3.msra.mxu0 %v2814_v22  ;;  %5195 = vmatpush3.msra.mxu1 %v2814_v22 }
 0x979   :  { %5174 = vmatprep.subr.mxu0 %v2813_v8  ;;  %5196 = vmatprep.subr.mxu1 %v2813_v8 }
 0x97a   :  { %5175 = vmatpush3.msra.mxu0 %v2813_v8  ;;  %5197 = vmatpush3.msra.mxu1 %v2813_v8 }
 0x97b   :  { %2726 = vadd.xlane.f32.xlu1 %v2725_v20  ;;  %2714 = vadd.xlane.f32.xlu0 %v2713_v16 }
 0x97c   :  { %5176 = vmatprep.subr.mxu0 %v2812_v24  ;;  %5198 = vmatprep.subr.mxu1 %v2812_v24 }
 0x97d   :  { %5177 = vmatpush3.msra.mxu0 %v2812_v24  ;;  %5199 = vmatpush3.msra.mxu1 %v2812_v24 }
 0x97e   :  { %5178 = vmatprep.subr.mxu0 %v2811_v12  ;;  %5200 = vmatprep.subr.mxu1 %v2811_v12 }
 0x97f   :  { %5179 = vmatpush3.msra.mxu0 %v2811_v12  ;;  %5201 = vmatpush3.msra.mxu1 %v2811_v12 }
 0x980   :  { %5208 = vmatprep.subr.mxu0 %v7306_v41  ;;  %5222 = vmatprep.subr.mxu1 %v7306_v41 }
 0x9f8   :  { %v2709_v51 = vpop.xlane.xlu1 %2708  ;;  %v2706_v34 = vpop.xlane.xlu0 %2705 }
 0x9f9   :  { %v2728_v31 = vadd.f32 %v2709_v51, %v2706_v34 }
 0x9fc   :  { %v2721_v63 = vpop.xlane.xlu1 %2720  ;;  %v2718_v45 = vpop.xlane.xlu0 %2717 }
 0x9fd   :  { %v2738_v2 = vadd.f32 %v2721_v63, %v2718_v45 }
 0xa00   :  { %v2724_v5 = vpop.xlane.xlu1 %2723  ;;  %v2712_v32 = vpop.xlane.xlu0 %2711 }
 0xa01   :  { %v2739_v28 = vadd.f32 %v2738_v2, %v2724_v5  ;;  %v2729_v27 = vadd.f32 %v2728_v31, %v2712_v32 }
 0xa04   :  { %v2727_v15 = vpop.xlane.xlu1 %2726  ;;  %v2715_v29 = vpop.xlane.xlu0 %2714 }
 0xa05   :  { %v2740_v17 = vsel %vm2667_vm4, %v2727_v15, 0.0  ;;  %v2730_v35 = vsel %vm2667_vm4, %v2715_v29, 0.0 }
 0xa06   :  { %v2741_v52 = vadd.f32 %v2740_v17, %v2739_v28  ;;  %v2731_v60 = vadd.f32 %v2730_v35, %v2729_v27 }
 0xa08   :  { %v2742_v62 = vrot.slane %v2741_v52, 4  ;;  %v2732_v42 = vrot.slane %v2731_v60, 4 }
 0xa0a   :  { %v2743_v39 = vadd.f32 %v2742_v62, %v2741_v52  ;;  %v2733_v3 = vadd.f32 %v2732_v42, %v2731_v60 }
 0xa0c   :  { %v2744_v30 = vrot.slane %v2743_v39, 2  ;;  %v2734_v14 = vrot.slane %v2733_v3, 2 }
 0xa0e   :  { %v2745_v25 = vadd.f32 %v2744_v30, %v2743_v39  ;;  %v2735_v9 = vadd.f32 %v2734_v14, %v2733_v3  ;;  %v3161_v39 = vld [vmem:[#allocation8 + $0x10] sm:$0xff] }
 0xa10   :  { %v2746_v53 = vrot.slane %v2745_v25, 1  ;;  %v2736_v21 = vrot.slane %v2735_v9, 1 }
 0xa12   :  { %v2747_v49 = vadd.f32 %v2746_v53, %v2745_v25  ;;  %v2737_v38 = vadd.f32 %v2736_v21, %v2735_v9  ;;  %v3160_v25 = vld [vmem:[#allocation8 + $0x8] sm:$0xff]  ;;  %v3159_v21 = vld [vmem:[#allocation8] sm:$0xff] }
 0xa14   :  { %v2749_v33 = vmul.f32 0.0005787037, %v2747_v49  ;;  %v2748_v55 = vmul.f32 0.0005787037, %v2737_v38 }
 0xa16   :  { %v2751_v58 = vadd.f32 1e-08, %v2749_v33  ;;  %v2750_v40 = vadd.f32 1e-08, %v2748_v55 }
 0xa18   :  { %5451 = vrsqrt.f32 %v2751_v58 }
 0xa19   :  { %5453 = vrsqrt.f32 %v2750_v40 }
 0xa25   :  { %v5452_v26 = vpop.eup %5451 }
 0xa26   :  { %v5454_v23 = vpop.eup %5453  ;;  %v2758_v20 = vmul.f32 %v5452_v26, %v7247_v19  ;;  %v2759_v16 = vmul.f32 %v5452_v26, %v7241_v0  ;;  %v2760_v6 = vmul.f32 %v5452_v26, %v7255_v46  ;;  %v2761_v61 = vmul.f32 %v5452_v26, %v7265_v37 }
 0xa27   :  { %v2754_v48 = vmul.f32 %v5454_v23, %v7245_v59  ;;  %v2755_v22 = vmul.f32 %v5454_v23, %v7243_v13  ;;  %v2756_v8 = vmul.f32 %v5454_v23, %v7261_v11  ;;  %v2757_v24 = vmul.f32 %v5454_v23, %v7272_v4 }
 0xa28   :  { %v2770_v12 = vmul.f32 %v4536_v56, %v2758_v20  ;;  %v2771_v51 = vmul.f32 %v4536_v56, %v2759_v16  ;;  %v2772_v34 = vmul.f32 %v4536_v56, %v2760_v6  ;;  %v2773_v63 = vmul.f32 %v4536_v56, %v2761_v61 }
 0xa29   :  { %v2766_v19 = vmul.f32 %v4536_v56, %v2754_v48  ;;  %v2767_v45 = vmul.f32 %v4536_v56, %v2755_v22  ;;  %v2768_v0 = vmul.f32 %v4536_v56, %v2756_v8  ;;  %v2769_v5 = vmul.f32 %v4536_v56, %v2757_v24 }
 0xa2a   :  { %v2782_v46 = vadd.f32 %v4537_v44, %v2770_v12  ;;  %v2783_v32 = vadd.f32 %v4537_v44, %v2771_v51  ;;  %v2784_v37 = vadd.f32 %v4537_v44, %v2772_v34  ;;  %v2785_v31 = vadd.f32 %v4537_v44, %v2773_v63 }
 0xa2b   :  { %v2778_v2 = vadd.f32 %v4537_v44, %v2766_v19  ;;  %v2779_v59 = vadd.f32 %v4537_v44, %v2767_v45  ;;  %v2780_v28 = vadd.f32 %v4537_v44, %v2768_v0  ;;  %v2781_v13 = vadd.f32 %v4537_v44, %v2769_v5 }
 0xa2c   :  { %vm2790_vm5 = vcmp.ge.f32.partialorder %v2782_v46, 0.0  ;;  %v2799_v11 = vmul.f32 %v2794_v50, %v2782_v46  ;;  %vm2791_vm6 = vcmp.ge.f32.partialorder %v2783_v32, 0.0  ;;  %v2800_v4 = vmul.f32 %v2794_v50, %v2783_v32 }
 0xa2d   :  { %vm2786_vm7 = vcmp.ge.f32.partialorder %v2778_v2, 0.0  ;;  %v2795_v27 = vmul.f32 %v2794_v50, %v2778_v2  ;;  %vm2787_vm8 = vcmp.ge.f32.partialorder %v2779_v59, 0.0  ;;  %v2796_v15 = vmul.f32 %v2794_v50, %v2779_v59 }
 0xa2e   :  { %v2807_v29 = vsel %vm2790_vm5, %v2782_v46, %v2799_v11  ;;  %v2808_v17 = vsel %vm2791_vm6, %v2783_v32, %v2800_v4  ;;  %vm2788_vm9 = vcmp.ge.f32.partialorder %v2780_v28, 0.0  ;;  %v2797_v35 = vmul.f32 %v2794_v50, %v2780_v28 }
 0xa2f   :  { %v2803_v52 = vsel %vm2786_vm7, %v2778_v2, %v2795_v27  ;;  %5202 = vmatprep.mubr.msk.f32.mxu1 %vm2639_vm14, %v2807_v29  ;;  %v2804_v60 = vsel %vm2787_vm8, %v2779_v59, %v2796_v15  ;;  %vm2792_vm10 = vcmp.ge.f32.partialorder %v2784_v37, 0.0  ;;  %v2801_v62 = vmul.f32 %v2794_v50, %v2784_v37 }
 0xa30   :  { %5180 = vmatprep.mubr.msk.f32.mxu0 %vm2639_vm14, %v2803_v52  ;;  %5203 = vmatmul.mubr.msk.f32.vlgmr.msra.gmra.mxu1 %vm2639_vm14, %v2808_v17  ;;  %v2805_v42 = vsel %vm2788_vm9, %v2780_v28, %v2797_v35  ;;  %v2798_v30 = vmul.f32 %v2794_v50, %v2781_v13  ;;  %vm2793_vm11 = vcmp.ge.f32.partialorder %v2785_v31, 0.0  ;;  %v2802_v14 = vmul.f32 %v2794_v50, %v2785_v31 }
 0xa31   :  { %5181 = vmatmul.mubr.msk.f32.vlgmr.msra.gmra.mxu0 %vm2639_vm14, %v2804_v60  ;;  %v2809_v3 = vsel %vm2792_vm10, %v2784_v37, %v2801_v62  ;;  %5223 = vmatpush3.msra.mxu1 %v7306_v41  ;;  %vm2789_vm12 = vcmp.ge.f32.partialorder %v2781_v13, 0.0 }
 0xa32   :  { %5183 = vmatprep.mubr.msk.f32.mxu0 %vm2639_vm14, %v2805_v42  ;;  %5205 = vmatprep.mubr.msk.f32.mxu1 %vm2639_vm14, %v2809_v3  ;;  %v2810_v9 = vsel %vm2793_vm11, %v2785_v31, %v2802_v14  ;;  %v2806_v53 = vsel %vm2789_vm12, %v2781_v13, %v2798_v30 }
 0xa33   :  { %5209 = vmatpush3.msra.mxu0 %v7306_v41  ;;  %5224 = vmatprep.subr.mxu1 %v3161_v39 }
 0xa34   :  { %5210 = vmatprep.subr.mxu0 %v3161_v39  ;;  %5225 = vmatpush3.msra.mxu1 %v3161_v39 }
 0xa35   :  { %5211 = vmatpush3.msra.mxu0 %v3161_v39  ;;  %5206 = vmatmul.mubr.msk.f32.gmra.mxu1 %vm2639_vm14, %v2810_v9 }
 0xa36   :  { %5184 = vmatmul.mubr.msk.f32.gmra.mxu0 %vm2639_vm14, %v2806_v53  ;;  %5212 = vmatprep.subr.mxu0 %v3160_v25 }
 0xa37   :  { %5226 = vmatprep.subr.mxu1 %v3160_v25  ;;  %5213 = vmatpush3.msra.mxu0 %v3160_v25 }
 0xa38   :  { %5216 = vmatprep.mubr.msk.f32.mxu0 %vm158_vm0, %v7200_v36  ;;  %5227 = vmatpush3.msra.mxu1 %v3160_v25 }
 0xa39   :  { %5230 = vmatprep.mubr.msk.f32.mxu1 %vm158_vm0, %v7204_v43  ;;  %5214 = vmatprep.subr.mxu0 %v3159_v21 }
 0xa3a   :  { %5228 = vmatprep.subr.mxu1 %v3159_v21  ;;  %5215 = vmatpush3.msra.mxu0 %v3159_v21 }
 0xa3b   :  { %5229 = vmatpush3.msra.mxu1 %v3159_v21  ;;  %5217 = vmatmul.mubr.msk.f32.vlgmr.msra.gmra.mxu0 %vm158_vm0, %v7196_v54 }
 0xa3c   :  { %5231 = vmatmul.mubr.msk.f32.vlgmr.msra.gmra.mxu1 %vm158_vm0, %v7198_v1  ;;  %5219 = vmatprep.mubr.msk.f32.mxu0 %vm158_vm0, %v7216_v18 }
 0xa3d   :  { %5233 = vmatprep.mubr.msk.f32.mxu1 %vm158_vm0, %v7218_v47 }
 0xa3f   :  { %5220 = vmatmul.mubr.msk.f32.gmra.mxu0 %vm158_vm0, %v7210_v57 }
 0xa40   :  { %5234 = vmatmul.mubr.msk.f32.gmra.mxu1 %vm158_vm0, %v7212_v7  ;;  %vm3368_vm0 = vcmask 220160  }
 0xaf0   :  { %v5204_v36 = vpop.f32.mrf.mxu1 }
 0xaf1   :  { %v5182_v43 = vpop.f32.mrf.mxu0  ;;  %v3030_v47 = vsel %vm2639_vm14, %v5204_v36, 0.0 }
 0xaf2   :  { %v2994_v41 = vpop.f32.mrf.mxu1  ;;  %v3018_v54 = vsel %vm2639_vm14, %v5182_v43, 0.0 }
 0xaf3   :  { %3019 = vadd.xlane.f32.xlu1 %v3018_v54  ;;  %v2897_v49 = vpop.f32.mrf.mxu0  ;;  %v3027_v57 = vsel %vm2639_vm14, %v2994_v41, 0.0 }
 0xaf4   :  { %v3015_v1 = vsel %vm2639_vm14, %v2897_v49, 0.0 }
 0xaf5   :  { %v5207_v38 = vpop.f32.mrf.mxu1  ;;  %3016 = vadd.xlane.f32.xlu0 %v3015_v1 }
 0xaf6   :  { %v7348_v18 = vpop.f32.mrf.mxu0  ;;  %v3036_v40 = vsel %vm2649_vm15, %v5207_v38, 0.0 }
 0xaf7   :  { %v3004_v33 = vpop.f32.mrf.mxu1  ;;  %3031 = vadd.xlane.f32.xlu1 %v3030_v47  ;;  %v3024_v26 = vsel %vm2649_vm15, %v7348_v18, 0.0 }
 0xaf8   :  { %v2907_v7 = vpop.f32.mrf.mxu0  ;;  %v3033_v55 = vsel %vm2639_vm14, %v3004_v33, 0.0 }
 0xaf9   :  { %3028 = vadd.xlane.f32.xlu0 %v3027_v57  ;;  %v3021_v58 = vsel %vm2639_vm14, %v2907_v7, 0.0 }
 0xafb   :  { %3034 = vadd.xlane.f32.xlu1 %v3033_v55 }
 0xafd   :  { %3022 = vadd.xlane.f32.xlu0 %v3021_v58 }
 0xaff   :  { %3037 = vadd.xlane.f32.xlu1 %v3036_v40 }
 0xb01   :  { %3025 = vadd.xlane.f32.xlu0 %v3024_v26 }
 0xb7c   :  { %v3020_v56 = vpop.xlane.xlu1 %3019 }
 0xb7e   :  { %v3017_v50 = vpop.xlane.xlu0 %3016 }
 0xb7f   :  { %v3039_v44 = vadd.f32 %v3020_v56, %v3017_v50 }
 0xb80   :  { %v3032_v23 = vpop.xlane.xlu1 %3031 }
 0xb82   :  { %v3029_v20 = vpop.xlane.xlu0 %3028 }
 0xb83   :  { %v3049_v16 = vadd.f32 %v3032_v23, %v3029_v20 }
 0xb84   :  { %v3035_v6 = vpop.xlane.xlu1 %3034 }
 0xb85   :  { %v3050_v48 = vadd.f32 %v3049_v16, %v3035_v6 }
 0xb86   :  { %v3023_v61 = vpop.xlane.xlu0 %3022 }
 0xb87   :  { %v3040_v24 = vadd.f32 %v3039_v44, %v3023_v61 }
 0xb88   :  { %v3038_v22 = vpop.xlane.xlu1 %3037 }
 0xb89   :  { %v3051_v8 = vsel %vm2667_vm4, %v3038_v22, 0.0 }
 0xb8a   :  { %v3052_v12 = vadd.f32 %v3051_v8, %v3050_v48  ;;  %v3026_v51 = vpop.xlane.xlu0 %3025 }
 0xb8b   :  { %v3041_v34 = vsel %vm2667_vm4, %v3026_v51, 0.0 }
 0xb8c   :  { %v3053_v63 = vrot.slane %v3052_v12, 4  ;;  %v3042_v19 = vadd.f32 %v3041_v34, %v3040_v24 }
 0xb8e   :  { %v3054_v45 = vadd.f32 %v3053_v63, %v3052_v12  ;;  %v3043_v0 = vrot.slane %v3042_v19, 4 }
 0xb90   :  { %v3055_v5 = vrot.slane %v3054_v45, 2  ;;  %v3044_v46 = vadd.f32 %v3043_v0, %v3042_v19 }
 0xb92   :  { %v3056_v32 = vadd.f32 %v3055_v5, %v3054_v45  ;;  %v3045_v37 = vrot.slane %v3044_v46, 2 }
 0xb94   :  { %v3057_v31 = vrot.slane %v3056_v32, 1  ;;  %v3046_v2 = vadd.f32 %v3045_v37, %v3044_v46 }
 0xb96   :  { %v3058_v59 = vadd.f32 %v3057_v31, %v3056_v32  ;;  %v3047_v28 = vrot.slane %v3046_v2, 1 }
 0xb98   :  { %v3060_v13 = vmul.f32 0.0005787037, %v3058_v59  ;;  %v3048_v11 = vadd.f32 %v3047_v28, %v3046_v2  ;;  %v5232_v2 = vpop.f32.mrf.mxu1  ;;  %v5218_v59 = vpop.f32.mrf.mxu0 }
 0xb9a   :  { %v3059_v4 = vmul.f32 0.0005787037, %v3048_v11  ;;  %v7359_v27 = vsub.f32 %v5204_v36, %v3060_v13  ;;  %v7365_v17 = vsub.f32 %v2994_v41, %v3060_v13  ;;  %v7373_v62 = vsub.f32 %v3004_v33, %v3060_v13  ;;  %v3314_v28 = vpop.f32.mrf.mxu1 }
 0xb9b   :  { %v7383_v25 = vsub.f32 %v5207_v38, %v3060_v13  ;;  %v3229_v13 = vpop.f32.mrf.mxu0 }
 0xb9c   :  { %v7361_v15 = vsub.f32 %v5182_v43, %v3059_v4  ;;  %v7363_v29 = vsub.f32 %v2897_v49, %v3059_v4  ;;  %v3074_v60 = vmul.f32 %v7359_v27, %v7359_v27  ;;  %v3073_v3 = vmul.f32 %v7365_v17, %v7365_v17 }
 0xb9d   :  { %v7379_v30 = vsub.f32 %v2907_v7, %v3059_v4  ;;  %v3075_v14 = vmul.f32 %v7373_v62, %v7373_v62  ;;  %v7390_v36 = vsub.f32 %v7348_v18, %v3059_v4  ;;  %v3076_v54 = vmul.f32 %v7383_v25, %v7383_v25  ;;  %v3366_v18 = vld [vmem:[#allocation11] sm:$0xff]  ;;  %v4546_v4 = vld [vmem:[#allocation9 + $0x8] ss:$0 sm:$0xff] }
 0xb9e   :  { %v3070_v35 = vmul.f32 %v7361_v15, %v7361_v15  ;;  %v3069_v52 = vmul.f32 %v7363_v29, %v7363_v29  ;;  %v3092_v9 = vsel %vm2639_vm14, %v3074_v60, 0.0  ;;  %v3089_v53 = vsel %vm2639_vm14, %v3073_v3, 0.0  ;;  %5244 = vmatprep.mubr.msk.f32.mxu0 %vm3368_vm0, %v3366_v18  ;;  %5255 = vmatprep.mubr.msk.f32.mxu1 %vm3368_vm0, %v3366_v18 }
 0xb9f   :  { %v3071_v21 = vmul.f32 %v7379_v30, %v7379_v30  ;;  %v3095_v43 = vsel %vm2639_vm14, %v3075_v14, 0.0  ;;  %v3072_v49 = vmul.f32 %v7390_v36, %v7390_v36  ;;  %v3098_v1 = vsel %vm2649_vm15, %v3076_v54, 0.0  ;;  %v5235_v14 = vpop.f32.mrf.mxu1  ;;  %v5221_v54 = vpop.f32.mrf.mxu0 }
 0xba0   :  { %v3080_v42 = vsel %vm2639_vm14, %v3070_v35, 0.0  ;;  %v3077_v39 = vsel %vm2639_vm14, %v3069_v52, 0.0  ;;  %v3349_v35 = vstv %s4527_s14 }
 0xba1   :  { %3081 = vadd.xlane.f32.xlu1 %v3080_v42  ;;  %3078 = vadd.xlane.f32.xlu0 %v3077_v39  ;;  %v3083_v41 = vsel %vm2639_vm14, %v3071_v21, 0.0  ;;  %v3086_v38 = vsel %vm2649_vm15, %v3072_v49, 0.0 }
 0xba5   :  { %3093 = vadd.xlane.f32.xlu1 %v3092_v9  ;;  %3090 = vadd.xlane.f32.xlu0 %v3089_v53  ;;  %v4547_v9 = vld [vmem:[#allocation9 + $0x9] ss:$0 sm:$0xff] }
 0xba9   :  { %3096 = vadd.xlane.f32.xlu1 %v3095_v43  ;;  %3084 = vadd.xlane.f32.xlu0 %v3083_v41 }
 0xbad   :  { %3099 = vadd.xlane.f32.xlu1 %v3098_v1  ;;  %3087 = vadd.xlane.f32.xlu0 %v3086_v38 }
 0xc2a   :  { %v3082_v47 = vpop.xlane.xlu1 %3081  ;;  %v3079_v33 = vpop.xlane.xlu0 %3078 }
 0xc2b   :  { %v3101_v40 = vadd.f32 %v3082_v47, %v3079_v33 }
 0xc2e   :  { %v3094_v57 = vpop.xlane.xlu1 %3093  ;;  %v3091_v7 = vpop.xlane.xlu0 %3090 }
 0xc2f   :  { %v3111_v26 = vadd.f32 %v3094_v57, %v3091_v7 }
 0xc32   :  { %v3097_v55 = vpop.xlane.xlu1 %3096  ;;  %v3085_v58 = vpop.xlane.xlu0 %3084 }
 0xc33   :  { %v3112_v56 = vadd.f32 %v3111_v26, %v3097_v55  ;;  %v3102_v50 = vadd.f32 %v3101_v40, %v3085_v58  ;;  %v3239_v40 = vpop.f32.mrf.mxu0 }
 0xc36   :  { %v3100_v23 = vpop.xlane.xlu1 %3099  ;;  %v3088_v20 = vpop.xlane.xlu0 %3087 }
 0xc37   :  { %v3113_v16 = vsel %vm2667_vm4, %v3100_v23, 0.0  ;;  %v3103_v6 = vsel %vm2667_vm4, %v3088_v20, 0.0 }
 0xc38   :  { %v3114_v61 = vadd.f32 %v3113_v16, %v3112_v56  ;;  %v3104_v44 = vadd.f32 %v3103_v6, %v3102_v50 }
 0xc3a   :  { %v3115_v48 = vrot.slane %v3114_v61, 4  ;;  %v3105_v22 = vrot.slane %v3104_v44, 4 }
 0xc3c   :  { %v3116_v8 = vadd.f32 %v3115_v48, %v3114_v61  ;;  %v3106_v24 = vadd.f32 %v3105_v22, %v3104_v44 }
 0xc3e   :  { %v3117_v12 = vrot.slane %v3116_v8, 2  ;;  %v3107_v51 = vrot.slane %v3106_v24, 2 }
 0xc40   :  { %v3118_v34 = vadd.f32 %v3117_v12, %v3116_v8  ;;  %v3108_v63 = vadd.f32 %v3107_v51, %v3106_v24 }
 0xc42   :  { %v3119_v19 = vrot.slane %v3118_v34, 1  ;;  %v3109_v45 = vrot.slane %v3108_v63, 1 }
 0xc44   :  { %v3120_v0 = vadd.f32 %v3119_v19, %v3118_v34  ;;  %v3110_v5 = vadd.f32 %v3109_v45, %v3108_v63 }
 0xc46   :  { %v3122_v46 = vmul.f32 0.0005787037, %v3120_v0  ;;  %v3121_v32 = vmul.f32 0.0005787037, %v3110_v5 }
 0xc48   :  { %v3124_v37 = vadd.f32 1e-08, %v3122_v46  ;;  %v3123_v31 = vadd.f32 1e-08, %v3121_v32  ;;  %v3367_v32 = vld [vmem:[#allocation11 + $0x8] sm:$0x1] }
 0xc4a   :  { %5455 = vrsqrt.f32 %v3124_v37 }
 0xc4b   :  { %5457 = vrsqrt.f32 %v3123_v31  ;;  %v3540_v31 = vld [vmem:[%s7611_s7 + $0x38] sm:$0xff] }
 0xc57   :  { %v5456_v11 = vpop.eup %5455 }
 0xc58   :  { %v5458_v52 = vpop.eup %5457  ;;  %v3134_v60 = vmul.f32 %v5456_v11, %v7383_v25  ;;  %v3133_v42 = vmul.f32 %v5456_v11, %v7373_v62  ;;  %v3132_v39 = vmul.f32 %v5456_v11, %v7359_v27  ;;  %v3131_v3 = vmul.f32 %v5456_v11, %v7365_v17  ;;  %v3535_v11 = vld [vmem:[%s7611_s7 + $0x10] sm:$0xff] }
 0xc59   :  { %v3130_v53 = vmul.f32 %v5458_v52, %v7390_v36  ;;  %v3129_v21 = vmul.f32 %v5458_v52, %v7379_v30  ;;  %v3128_v43 = vmul.f32 %v5458_v52, %v7361_v15  ;;  %v3127_v41 = vmul.f32 %v5458_v52, %v7363_v29  ;;  %v3324_v36 = vpop.f32.mrf.mxu1 }
 0xc5a   :  { %v3146_v49 = vmul.f32 %v4546_v4, %v3134_v60  ;;  %v3145_v1 = vmul.f32 %v4546_v4, %v3133_v42  ;;  %v3144_v25 = vmul.f32 %v4546_v4, %v3132_v39  ;;  %v3143_v38 = vmul.f32 %v4546_v4, %v3131_v3 }
 0xc5b   :  { %v3142_v62 = vmul.f32 %v4546_v4, %v3130_v53  ;;  %v3141_v18 = vmul.f32 %v4546_v4, %v3129_v21  ;;  %v3140_v27 = vmul.f32 %v4546_v4, %v3128_v43  ;;  %v3139_v47 = vmul.f32 %v4546_v4, %v3127_v41  ;;  %v3534_v4 = vld [vmem:[%s7611_s7 + $0x8] sm:$0xff] }
 0xc5c   :  { %v3158_v17 = vadd.f32 %v4547_v9, %v3146_v49  ;;  %v3157_v33 = vadd.f32 %v4547_v9, %v3145_v1  ;;  %v3156_v57 = vadd.f32 %v4547_v9, %v3144_v25  ;;  %v3155_v7 = vadd.f32 %v4547_v9, %v3143_v38 }
 0xc5d   :  { %v3154_v55 = vadd.f32 %v4547_v9, %v3142_v62  ;;  %v3153_v30 = vadd.f32 %v4547_v9, %v3141_v18  ;;  %v3152_v58 = vadd.f32 %v4547_v9, %v3140_v27  ;;  %v3151_v15 = vadd.f32 %v4547_v9, %v3139_v47 }
 0xc5e   :  { %v3340_v29 = vadd.f32 %v5235_v14, %v3158_v17  ;;  %v3339_v26 = vadd.f32 %v3324_v36, %v3157_v33  ;;  %v3338_v56 = vadd.f32 %v5232_v2, %v3156_v57  ;;  %v3337_v16 = vadd.f32 %v3314_v28, %v3155_v7  ;;  %v3539_v2 = vld [vmem:[%s7611_s7 + $0x30] sm:$0xff]  ;;  %v3537_v28 = vld [vmem:[%s7611_s7 + $0x20] sm:$0xff] }
 0xc5f   :  { %v3336_v50 = vadd.f32 %v5221_v54, %v3154_v55  ;;  %v3335_v23 = vadd.f32 %v3239_v40, %v3153_v30  ;;  %v3334_v20 = vadd.f32 %v5218_v59, %v3152_v58  ;;  %v3333_v44 = vadd.f32 %v3229_v13, %v3151_v15  ;;  %v3538_v59 = vld [vmem:[%s7611_s7 + $0x28] sm:$0xff]  ;;  %v3536_v13 = vld [vmem:[%s7611_s7 + $0x18] sm:$0xff] }
 0xc60   :  { %vm3348_vm13 = vcmp.ge.f32.partialorder %v3340_v29, 0.0  ;;  %v3357_v6 = vmul.f32 %v3349_v35, %v3340_v29  ;;  %v3356_v61 = vmul.f32 %v3349_v35, %v3339_v26  ;;  %vm3347_vm5 = vcmp.ge.f32.partialorder %v3339_v26, 0.0 }
 0xc61   :  { %vm3344_vm15 = vcmp.ge.f32.partialorder %v3336_v50, 0.0  ;;  %v3353_v48 = vmul.f32 %v3349_v35, %v3336_v50  ;;  %v3352_v22 = vmul.f32 %v3349_v35, %v3335_v23  ;;  %vm3343_vm6 = vcmp.ge.f32.partialorder %v3335_v23, 0.0 }
 0xc62   :  { %v3365_v8 = vsel %vm3348_vm13, %v3340_v29, %v3357_v6  ;;  %v3351_v12 = vmul.f32 %v3349_v35, %v3334_v20  ;;  %vm3346_vm7 = vcmp.ge.f32.partialorder %v3338_v56, 0.0  ;;  %v3355_v51 = vmul.f32 %v3349_v35, %v3338_v56 }
 0xc63   :  { %v3361_v24 = vsel %vm3344_vm15, %v3336_v50, %v3353_v48  ;;  %5247 = vmatprep.subr.msk.mxu1 %vm2667_vm4, %v3365_v8  ;;  %v3364_v34 = vsel %vm3347_vm5, %v3339_v26, %v3356_v61  ;;  %vm3342_vm8 = vcmp.ge.f32.partialorder %v3334_v20, 0.0  ;;  %v3360_v63 = vsel %vm3343_vm6, %v3335_v23, %v3352_v22 }
 0xc64   :  { %5236 = vmatprep.subr.msk.mxu0 %vm2667_vm4, %v3361_v24  ;;  %5248 = vmatpush3.msk.msra.mxu1 %vm2667_vm4, %v3365_v8  ;;  %v3350_v19 = vmul.f32 %v3349_v35, %v3333_v44  ;;  %vm3345_vm9 = vcmp.ge.f32.partialorder %v3337_v16, 0.0  ;;  %v3354_v45 = vmul.f32 %v3349_v35, %v3337_v16  ;;  %v3363_v0 = vsel %vm3346_vm7, %v3338_v56, %v3355_v51  ;;  %v3533_v35 = vld [vmem:[%s7611_s7] sm:$0xff] }
 0xc65   :  { %5237 = vmatpush3.msk.msra.mxu0 %vm2667_vm4, %v3361_v24  ;;  %5249 = vmatprep.subr.mxu1 %v3364_v34  ;;  %vm3341_vm10 = vcmp.ge.f32.partialorder %v3333_v44, 0.0  ;;  %v3359_v5 = vsel %vm3342_vm8, %v3334_v20, %v3351_v12  ;;  %vm3708_vm4 = vcmask 516096   ;;  %vm4093_vm8 = vcmask 72704  }
 0xc66   :  { %5238 = vmatprep.subr.mxu0 %v3360_v63  ;;  %5250 = vmatpush3.msra.mxu1 %v3364_v34  ;;  %v3362_v46 = vsel %vm3345_vm9, %v3337_v16, %v3354_v45  ;;  %v3358_v37 = vsel %vm3341_vm10, %v3333_v44, %v3350_v19  ;;  %v3818_v34 = vld [vmem:[%s7612_s8 + $0x38] sm:$0xff]  ;;  %v3816_v19 = vld [vmem:[%s7612_s8 + $0x28] sm:$0xff]  ;;  %v3815_v45 = vld [vmem:[%s7612_s8 + $0x20] sm:$0xff] }
 0xc67   :  { %5239 = vmatpush3.msra.mxu0 %v3360_v63  ;;  %5251 = vmatprep.subr.mxu1 %v3363_v0  ;;  %v3817_v63 = vld [vmem:[%s7612_s8 + $0x30] sm:$0xff] }
 0xc68   :  { %5240 = vmatprep.subr.mxu0 %v3359_v5  ;;  %5252 = vmatpush3.msra.mxu1 %v3363_v0  ;;  %v3814_v0 = vld [vmem:[%s7612_s8 + $0x18] sm:$0xff] }
 0xc69   :  { %5241 = vmatpush3.msra.mxu0 %v3359_v5  ;;  %5253 = vmatprep.subr.mxu1 %v3362_v46  ;;  %v3813_v5 = vld [vmem:[%s7612_s8 + $0x10] sm:$0xff] }
 0xc6a   :  { %5242 = vmatprep.subr.mxu0 %v3358_v37  ;;  %5254 = vmatpush3.msra.mxu1 %v3362_v46  ;;  %v3812_v46 = vld [vmem:[%s7612_s8 + $0x8] sm:$0xff] }
 0xc6b   :  { %5243 = vmatpush3.msra.mxu0 %v3358_v37  ;;  %5256 = vmatmul.mubr.msk.f32.vlgmr.msra.gmra.mxu1 %vm3368_vm0, %v3367_v32 }
 0xc6c   :  { %5245 = vmatmul.mubr.msk.f32.vlgmr.msra.gmra.mxu0 %vm3368_vm0, %v3367_v32  ;;  %5258 = vmatprep.subr.mxu0 %v3540_v31  ;;  %v3811_v32 = vld [vmem:[%s7612_s8] sm:$0xff]  ;;  %s4562_s8 = sld [smem:[#allocation12 + $0x4]] }
 0xc6d   :  { %5277 = vmatprep.subr.mxu1 %v3540_v31  ;;  %5259 = vmatpush3.msra.mxu0 %v3540_v31 }
 0xc6e   :  { %5278 = vmatpush3.msra.mxu1 %v3540_v31  ;;  %5260 = vmatprep.subr.mxu0 %v3539_v2 }
 0xc6f   :  { %5279 = vmatprep.subr.mxu1 %v3539_v2  ;;  %5261 = vmatpush3.msra.mxu0 %v3539_v2 }
 0xc70   :  { %5280 = vmatpush3.msra.mxu1 %v3539_v2  ;;  %5262 = vmatprep.subr.mxu0 %v3538_v59 }
 0xc71   :  { %5281 = vmatprep.subr.mxu1 %v3538_v59  ;;  %5263 = vmatpush3.msra.mxu0 %v3538_v59 }
 0xc72   :  { %5282 = vmatpush3.msra.mxu1 %v3538_v59  ;;  %5264 = vmatprep.subr.mxu0 %v3537_v28 }
 0xc73   :  { %5283 = vmatprep.subr.mxu1 %v3537_v28  ;;  %5265 = vmatpush3.msra.mxu0 %v3537_v28 }
 0xc74   :  { %5284 = vmatpush3.msra.mxu1 %v3537_v28  ;;  %5266 = vmatprep.subr.mxu0 %v3536_v13 }
 0xc75   :  { %5285 = vmatprep.subr.mxu1 %v3536_v13  ;;  %5267 = vmatpush3.msra.mxu0 %v3536_v13 }
 0xc76   :  { %5286 = vmatpush3.msra.mxu1 %v3536_v13  ;;  %5268 = vmatprep.subr.mxu0 %v3535_v11 }
 0xc77   :  { %5287 = vmatprep.subr.mxu1 %v3535_v11  ;;  %5269 = vmatpush3.msra.mxu0 %v3535_v11 }
 0xc78   :  { %5288 = vmatpush3.msra.mxu1 %v3535_v11  ;;  %5270 = vmatprep.subr.mxu0 %v3534_v4 }
 0xc79   :  { %5289 = vmatprep.subr.mxu1 %v3534_v4  ;;  %5271 = vmatpush3.msra.mxu0 %v3534_v4 }
 0xc7a   :  { %5290 = vmatpush3.msra.mxu1 %v3534_v4  ;;  %5272 = vmatprep.subr.mxu0 %v3533_v35 }
 0xc7b   :  { %5291 = vmatprep.subr.mxu1 %v3533_v35  ;;  %5273 = vmatpush3.msra.mxu0 %v3533_v35 }
 0xc7c   :  { %5292 = vmatpush3.msra.mxu1 %v3533_v35  ;;  %5296 = vmatprep.subr.mxu0 %v3818_v34 }
 0xc7d   :  { %5315 = vmatprep.subr.mxu1 %v3818_v34 }
 0xd2b   :  { %v7442_v52 = vpop.f32.mrf.mxu1 }
 0xd2c   :  { %v7444_v60 = vpop.f32.mrf.mxu0 }
 0xd2d   :  { %v7446_v42 = vpop.f32.mrf.mxu1 }
 0xd2e   :  { %v7448_v39 = vpop.f32.mrf.mxu0  ;;  %5293 = vmatprep.mubr.msk.f32.mxu1 %vm2639_vm14, %v7446_v42 }
 0xd2f   :  { %5274 = vmatprep.mubr.msk.f32.mxu0 %vm2639_vm14, %v7448_v39  ;;  %5294 = vmatmul.mubr.msk.f32.vlgmr.msra.gmra.mxu1 %vm2639_vm14, %v7442_v52 }
 0xd30   :  { %5275 = vmatmul.mubr.msk.f32.vlgmr.msra.gmra.mxu0 %vm2639_vm14, %v7444_v60  ;;  %5316 = vmatpush3.msra.mxu1 %v3818_v34 }
 0xd31   :  { %5297 = vmatpush3.msra.mxu0 %v3818_v34  ;;  %5317 = vmatprep.subr.mxu1 %v3817_v63 }
 0xd32   :  { %5298 = vmatprep.subr.mxu0 %v3817_v63  ;;  %5318 = vmatpush3.msra.mxu1 %v3817_v63 }
 0xd33   :  { %5299 = vmatpush3.msra.mxu0 %v3817_v63  ;;  %5319 = vmatprep.subr.mxu1 %v3816_v19 }
 0xd34   :  { %5300 = vmatprep.subr.mxu0 %v3816_v19  ;;  %5320 = vmatpush3.msra.mxu1 %v3816_v19 }
 0xd35   :  { %5301 = vmatpush3.msra.mxu0 %v3816_v19  ;;  %5321 = vmatprep.subr.mxu1 %v3815_v45 }
 0xd36   :  { %5302 = vmatprep.subr.mxu0 %v3815_v45  ;;  %5322 = vmatpush3.msra.mxu1 %v3815_v45 }
 0xd37   :  { %5303 = vmatpush3.msra.mxu0 %v3815_v45  ;;  %5323 = vmatprep.subr.mxu1 %v3814_v0 }
 0xd38   :  { %5304 = vmatprep.subr.mxu0 %v3814_v0  ;;  %5324 = vmatpush3.msra.mxu1 %v3814_v0 }
 0xd39   :  { %5305 = vmatpush3.msra.mxu0 %v3814_v0  ;;  %5325 = vmatprep.subr.mxu1 %v3813_v5 }
 0xd3a   :  { %5306 = vmatprep.subr.mxu0 %v3813_v5  ;;  %5326 = vmatpush3.msra.mxu1 %v3813_v5 }
 0xd3b   :  { %5307 = vmatpush3.msra.mxu0 %v3813_v5  ;;  %5327 = vmatprep.subr.mxu1 %v3812_v46 }
 0xd3c   :  { %5308 = vmatprep.subr.mxu0 %v3812_v46  ;;  %5328 = vmatpush3.msra.mxu1 %v3812_v46 }
 0xd3d   :  { %5309 = vmatpush3.msra.mxu0 %v3812_v46  ;;  %5329 = vmatprep.subr.mxu1 %v3811_v32 }
 0xd3e   :  { %5310 = vmatprep.subr.mxu0 %v3811_v32  ;;  %5330 = vmatpush3.msra.mxu1 %v3811_v32 }
 0xd3f   :  { %5311 = vmatpush3.msra.mxu0 %v3811_v32  ;;  %5341 = vmatprep.subr.mxu1 %v7652_v10 }
 0xd40   :  { %5334 = vmatprep.subr.mxu0 %v7652_v10 }
 0xdef   :  { %v5295_v3 = vpop.f32.mrf.mxu1 }
 0xdf0   :  { %v5276_v14 = vpop.f32.mrf.mxu0  ;;  %v3715_v9 = vsel %vm3708_vm4, %v5295_v3, 0.0 }
 0xdf1   :  { %3716 = vadd.xlane.f32.xlu1 %v3715_v9  ;;  %v3709_v53 = vsel %vm3708_vm4, %v5276_v14, 0.0  ;;  %v3694_v21 = vpop.f32.mrf.mxu1 }
 0xdf2   :  { %3710 = vadd.xlane.f32.xlu0 %v3709_v53  ;;  %v3613_v43 = vpop.f32.mrf.mxu0  ;;  %v3712_v41 = vsel %vm2639_vm14, %v3694_v21, 0.0 }
 0xdf3   :  { %v3705_v54 = vsel %vm2639_vm14, %v3613_v43, 0.0 }
 0xdf5   :  { %3713 = vadd.xlane.f32.xlu1 %v3712_v41 }
 0xdf6   :  { %3706 = vadd.xlane.f32.xlu0 %v3705_v54 }
 0xe7a   :  { %v3717_v49 = vpop.xlane.xlu1 %3716 }
 0xe7b   :  { %v3711_v1 = vpop.xlane.xlu0 %3710  ;;  %v3726_v25 = vsel %vm1198_vm3, %v3717_v49, 0.0 }
 0xe7c   :  { %v3718_v62 = vsel %vm1198_vm3, %v3711_v1, 0.0 }
 0xe7e   :  { %v3714_v38 = vpop.xlane.xlu1 %3713 }
 0xe7f   :  { %v3727_v18 = vadd.f32 %v3726_v25, %v3714_v38  ;;  %v3707_v27 = vpop.xlane.xlu0 %3706 }
 0xe80   :  { %v3719_v47 = vadd.f32 %v3718_v62, %v3707_v27 }
 0xe81   :  { %v3728_v17 = vrot.slane %v3727_v18, 4 }
 0xe82   :  { %v3720_v33 = vrot.slane %v3719_v47, 4 }
 0xe83   :  { %v3729_v57 = vadd.f32 %v3728_v17, %v3727_v18  ;;  %v4568_v17 = vld [vmem:[#allocation9 + $0xa] ss:$0 sm:$0xff] }
 0xe84   :  { %v3721_v7 = vadd.f32 %v3720_v33, %v3719_v47 }
 0xe85   :  { %v3730_v36 = vrot.slane %v3729_v57, 2 }
 0xe86   :  { %v3722_v55 = vrot.slane %v3721_v7, 2 }
 0xe87   :  { %v3731_v30 = vadd.f32 %v3730_v36, %v3729_v57  ;;  %v4569_v36 = vld [vmem:[#allocation9 + $0xb] ss:$0 sm:$0xff] }
 0xe88   :  { %v3723_v58 = vadd.f32 %v3722_v55, %v3721_v7 }
 0xe89   :  { %v3732_v15 = vrot.slane %v3731_v30, 1 }
 0xe8a   :  { %v3724_v40 = vrot.slane %v3723_v58, 1 }
 0xe8b   :  { %v3733_v29 = vadd.f32 %v3732_v15, %v3731_v30 }
 0xe8c   :  { %v3725_v26 = vadd.f32 %v3724_v40, %v3723_v58 }
 0xe8d   :  { %v3735_v56 = vmul.f32 0.0017361111, %v3733_v29  ;;  %v3802_v29 = vstv %s4562_s8 }
 0xe8e   :  { %v3734_v50 = vmul.f32 0.0017361111, %v3725_v26 }
 0xe8f   :  { %v7464_v23 = vsub.f32 %v5295_v3, %v3735_v56  ;;  %v7466_v20 = vsub.f32 %v3694_v21, %v3735_v56 }
 0xe90   :  { %v7468_v16 = vsub.f32 %v5276_v14, %v3734_v50  ;;  %v7470_v6 = vsub.f32 %v3613_v43, %v3734_v50 }
 0xe91   :  { %v3743_v61 = vmul.f32 %v7464_v23, %v7464_v23  ;;  %v3742_v22 = vmul.f32 %v7466_v20, %v7466_v20 }
 0xe92   :  { %v3741_v44 = vmul.f32 %v7468_v16, %v7468_v16  ;;  %v3740_v24 = vmul.f32 %v7470_v6, %v7470_v6 }
 0xe93   :  { %v3753_v48 = vsel %vm3708_vm4, %v3743_v61, 0.0  ;;  %v3750_v12 = vsel %vm2639_vm14, %v3742_v22, 0.0 }
 0xe94   :  { %3754 = vadd.xlane.f32.xlu1 %v3753_v48  ;;  %v3747_v8 = vsel %vm3708_vm4, %v3741_v44, 0.0  ;;  %v3744_v51 = vsel %vm2639_vm14, %v3740_v24, 0.0 }
 0xe95   :  { %3748 = vadd.xlane.f32.xlu0 %v3747_v8 }
 0xe98   :  { %3751 = vadd.xlane.f32.xlu1 %v3750_v12 }
 0xe99   :  { %3745 = vadd.xlane.f32.xlu0 %v3744_v51 }
 0xf1d   :  { %v3755_v37 = vpop.xlane.xlu1 %3754 }
 0xf1e   :  { %v3749_v31 = vpop.xlane.xlu0 %3748  ;;  %v3764_v2 = vsel %vm1198_vm3, %v3755_v37, 0.0 }
 0xf1f   :  { %v3756_v28 = vsel %vm1198_vm3, %v3749_v31, 0.0 }
 0xf21   :  { %v3752_v59 = vpop.xlane.xlu1 %3751 }
 0xf22   :  { %v3765_v13 = vadd.f32 %v3764_v2, %v3752_v59  ;;  %v3746_v11 = vpop.xlane.xlu0 %3745 }
 0xf23   :  { %v3757_v4 = vadd.f32 %v3756_v28, %v3746_v11 }
 0xf24   :  { %v3766_v35 = vrot.slane %v3765_v13, 4 }
 0xf25   :  { %v3758_v3 = vrot.slane %v3757_v4, 4 }
 0xf26   :  { %v3767_v14 = vadd.f32 %v3766_v35, %v3765_v13 }
 0xf27   :  { %v3759_v9 = vadd.f32 %v3758_v3, %v3757_v4 }
 0xf28   :  { %v3768_v53 = vrot.slane %v3767_v14, 2 }
 0xf29   :  { %v3760_v21 = vrot.slane %v3759_v9, 2 }
 0xf2a   :  { %v3769_v43 = vadd.f32 %v3768_v53, %v3767_v14 }
 0xf2b   :  { %v3761_v41 = vadd.f32 %v3760_v21, %v3759_v9 }
 0xf2c   :  { %v3770_v54 = vrot.slane %v3769_v43, 1 }
 0xf2d   :  { %v3762_v49 = vrot.slane %v3761_v41, 1 }
 0xf2e   :  { %v3771_v1 = vadd.f32 %v3770_v54, %v3769_v43 }
 0xf2f   :  { %v3763_v25 = vadd.f32 %v3762_v49, %v3761_v41 }
 0xf30   :  { %v3773_v38 = vmul.f32 0.0017361111, %v3771_v1 }
 0xf31   :  { %v3772_v62 = vmul.f32 0.0017361111, %v3763_v25 }
 0xf32   :  { %v3775_v18 = vadd.f32 1e-08, %v3773_v38 }
 0xf33   :  { %v3774_v27 = vadd.f32 1e-08, %v3772_v62 }
 0xf34   :  { %5459 = vrsqrt.f32 %v3775_v18 }
 0xf35   :  { %5461 = vrsqrt.f32 %v3774_v27 }
 0xf41   :  { %v5460_v47 = vpop.eup %5459 }
 0xf42   :  { %v5462_v33 = vpop.eup %5461  ;;  %v3780_v57 = vmul.f32 %v5460_v47, %v7466_v20  ;;  %v3781_v7 = vmul.f32 %v5460_v47, %v7464_v23 }
 0xf43   :  { %v3778_v55 = vmul.f32 %v5462_v33, %v7470_v6  ;;  %v3779_v30 = vmul.f32 %v5462_v33, %v7468_v16 }
 0xf44   :  { %v3788_v58 = vmul.f32 %v4568_v17, %v3780_v57  ;;  %v3789_v15 = vmul.f32 %v4568_v17, %v3781_v7 }
 0xf45   :  { %v3786_v40 = vmul.f32 %v4568_v17, %v3778_v55  ;;  %v3787_v26 = vmul.f32 %v4568_v17, %v3779_v30 }
 0xf46   :  { %v3796_v56 = vadd.f32 %v4569_v36, %v3788_v58  ;;  %v3797_v50 = vadd.f32 %v4569_v36, %v3789_v15 }
 0xf47   :  { %v3794_v61 = vadd.f32 %v4569_v36, %v3786_v40  ;;  %v3795_v44 = vadd.f32 %v4569_v36, %v3787_v26 }
 0xf48   :  { %vm3800_vm11 = vcmp.ge.f32.partialorder %v3796_v56, 0.0  ;;  %v3805_v48 = vmul.f32 %v3802_v29, %v3796_v56  ;;  %vm3801_vm12 = vcmp.ge.f32.partialorder %v3797_v50, 0.0  ;;  %v3806_v20 = vmul.f32 %v3802_v29, %v3797_v50 }
 0xf49   :  { %vm3798_vm0 = vcmp.ge.f32.partialorder %v3794_v61, 0.0  ;;  %v3803_v23 = vmul.f32 %v3802_v29, %v3794_v61  ;;  %vm3799_vm13 = vcmp.ge.f32.partialorder %v3795_v44, 0.0  ;;  %v3804_v22 = vmul.f32 %v3802_v29, %v3795_v44 }
 0xf4a   :  { %v3809_v6 = vsel %vm3800_vm11, %v3796_v56, %v3805_v48  ;;  %v3810_v8 = vsel %vm3801_vm12, %v3797_v50, %v3806_v20 }
 0xf4b   :  { %v3807_v16 = vsel %vm3798_vm0, %v3794_v61, %v3803_v23  ;;  %5331 = vmatprep.mubr.msk.f32.mxu1 %vm2639_vm14, %v3809_v6  ;;  %v3808_v24 = vsel %vm3799_vm13, %v3795_v44, %v3804_v22 }
 0xf4c   :  { %5312 = vmatprep.mubr.msk.f32.mxu0 %vm2639_vm14, %v3807_v16  ;;  %5332 = vmatmul.mubr.msk.f32.vlgmr.msra.gmra.mxu1 %vm2639_vm14, %v3810_v8 }
 0xf4d   :  { %5313 = vmatmul.mubr.msk.f32.vlgmr.msra.gmra.mxu0 %vm2639_vm14, %v3808_v24  ;;  %5345 = vmatprep.mubr.msk.f32.mxu1 %vm5618_vm2, %v7652_v10 }
 0xf4e   :  { %5338 = vmatprep.mubr.msk.f32.mxu0 %vm5618_vm2, %v7652_v10 }
0x100c   :  { %v5333_v12 = vpop.f32.mrf.mxu1 }
0x100d   :  { %v5314_v51 = vpop.f32.mrf.mxu0  ;;  %v3992_v34 = vsel %vm3708_vm4, %v5333_v12, 0.0 }
0x100e   :  { %3993 = vadd.xlane.f32.xlu1 %v3992_v34  ;;  %v3972_v63 = vpop.f32.mrf.mxu1  ;;  %v3986_v19 = vsel %vm3708_vm4, %v5314_v51, 0.0 }
0x100f   :  { %3987 = vadd.xlane.f32.xlu0 %v3986_v19  ;;  %v3891_v45 = vpop.f32.mrf.mxu0  ;;  %v3989_v0 = vsel %vm2639_vm14, %v3972_v63, 0.0 }
0x1010   :  { %v3983_v5 = vsel %vm2639_vm14, %v3891_v45, 0.0 }
0x1012   :  { %3990 = vadd.xlane.f32.xlu1 %v3989_v0 }
0x1013   :  { %3984 = vadd.xlane.f32.xlu0 %v3983_v5 }
0x1097   :  { %v3994_v46 = vpop.xlane.xlu1 %3993 }
0x1098   :  { %v3988_v32 = vpop.xlane.xlu0 %3987  ;;  %v4003_v37 = vsel %vm1198_vm3, %v3994_v46, 0.0  ;;  %v4574_v46 = vld [vmem:[#allocation9 + $0xc] ss:$0 sm:$0xff] }
0x1099   :  { %v3995_v2 = vsel %vm1198_vm3, %v3988_v32, 0.0 }
0x109b   :  { %v3991_v31 = vpop.xlane.xlu1 %3990 }
0x109c   :  { %v4004_v59 = vadd.f32 %v4003_v37, %v3991_v31  ;;  %v3985_v28 = vpop.xlane.xlu0 %3984 }
0x109d   :  { %v3996_v13 = vadd.f32 %v3995_v2, %v3985_v28  ;;  %v4575_v2 = vld [vmem:[#allocation9 + $0xd] ss:$0 sm:$0xff] }
0x109e   :  { %v4005_v11 = vrot.slane %v4004_v59, 4 }
0x109f   :  { %v3997_v4 = vrot.slane %v3996_v13, 4 }
0x10a0   :  { %v4006_v35 = vadd.f32 %v4005_v11, %v4004_v59 }
0x10a1   :  { %v3998_v3 = vadd.f32 %v3997_v4, %v3996_v13 }
0x10a2   :  { %v4007_v14 = vrot.slane %v4006_v35, 2 }
0x10a3   :  { %v3999_v9 = vrot.slane %v3998_v3, 2 }
0x10a4   :  { %v4008_v53 = vadd.f32 %v4007_v14, %v4006_v35 }
0x10a5   :  { %v4000_v21 = vadd.f32 %v3999_v9, %v3998_v3 }
0x10a6   :  { %v4009_v43 = vrot.slane %v4008_v53, 1 }
0x10a7   :  { %v4001_v41 = vrot.slane %v4000_v21, 1 }
0x10a8   :  { %v4010_v54 = vadd.f32 %v4009_v43, %v4008_v53  ;;  %v4083_v53 = vstv %s4563_s22 }
0x10a9   :  { %v4002_v49 = vadd.f32 %v4001_v41, %v4000_v21 }
0x10aa   :  { %v4012_v1 = vmul.f32 0.0017361111, %v4010_v54 }
0x10ab   :  { %v4011_v25 = vmul.f32 0.0017361111, %v4002_v49 }
0x10ac   :  { %v4016_v38 = vsub.f32 %v5333_v12, %v4012_v1  ;;  %v4015_v62 = vsub.f32 %v3972_v63, %v4012_v1 }
0x10ad   :  { %v4014_v18 = vsub.f32 %v5314_v51, %v4011_v25  ;;  %v4013_v27 = vsub.f32 %v3891_v45, %v4011_v25 }
0x10ae   :  { %v4020_v47 = vmul.f32 %v4016_v38, %v4016_v38  ;;  %v4019_v57 = vmul.f32 %v4015_v62, %v4015_v62 }
0x10af   :  { %v4018_v17 = vmul.f32 %v4014_v18, %v4014_v18  ;;  %v4017_v36 = vmul.f32 %v4013_v27, %v4013_v27 }
0x10b0   :  { %v4030_v33 = vsel %vm3708_vm4, %v4020_v47, 0.0  ;;  %v4027_v55 = vsel %vm2639_vm14, %v4019_v57, 0.0  ;;  %v4249_v47 = vld [vmem:[%s7613_s9 + $0x30] sm:$0xff]  ;;  %v4246_v57 = vld [vmem:[%s7613_s9 + $0x18] sm:$0xff] }
0x10b1   :  { %4031 = vadd.xlane.f32.xlu1 %v4030_v33  ;;  %v4024_v7 = vsel %vm3708_vm4, %v4018_v17, 0.0  ;;  %v4021_v30 = vsel %vm2639_vm14, %v4017_v36, 0.0  ;;  %v4248_v17 = vld [vmem:[%s7613_s9 + $0x28] sm:$0xff]  ;;  %v4247_v33 = vld [vmem:[%s7613_s9 + $0x20] sm:$0xff] }
0x10b2   :  { %4025 = vadd.xlane.f32.xlu0 %v4024_v7  ;;  %v4245_v7 = vld [vmem:[%s7613_s9 + $0x10] sm:$0xff]  ;;  %v4244_v36 = vld [vmem:[%s7613_s9 + $0x8] sm:$0xff] }
0x10b5   :  { %4028 = vadd.xlane.f32.xlu1 %v4027_v55  ;;  %v4243_v55 = vld [vmem:[%s7613_s9] sm:$0xff] }
0x10b6   :  { %4022 = vadd.xlane.f32.xlu0 %v4021_v30 }
0x113a   :  { %v4032_v58 = vpop.xlane.xlu1 %4031 }
0x113b   :  { %v4026_v15 = vpop.xlane.xlu0 %4025  ;;  %v4041_v40 = vsel %vm1198_vm3, %v4032_v58, 0.0 }
0x113c   :  { %v4033_v26 = vsel %vm1198_vm3, %v4026_v15, 0.0 }
0x113e   :  { %v4029_v29 = vpop.xlane.xlu1 %4028 }
0x113f   :  { %v4042_v56 = vadd.f32 %v4041_v40, %v4029_v29  ;;  %v4023_v50 = vpop.xlane.xlu0 %4022 }
0x1140   :  { %v4034_v61 = vadd.f32 %v4033_v26, %v4023_v50 }
0x1141   :  { %v4043_v44 = vrot.slane %v4042_v56, 4 }
0x1142   :  { %v4035_v48 = vrot.slane %v4034_v61, 4 }
0x1143   :  { %v4044_v20 = vadd.f32 %v4043_v44, %v4042_v56 }
0x1144   :  { %v4036_v23 = vadd.f32 %v4035_v48, %v4034_v61 }
0x1145   :  { %v4045_v22 = vrot.slane %v4044_v20, 2 }
0x1146   :  { %v4037_v6 = vrot.slane %v4036_v23, 2 }
0x1147   :  { %v4046_v8 = vadd.f32 %v4045_v22, %v4044_v20 }
0x1148   :  { %v4038_v16 = vadd.f32 %v4037_v6, %v4036_v23 }
0x1149   :  { %v4047_v24 = vrot.slane %v4046_v8, 1 }
0x114a   :  { %v4039_v12 = vrot.slane %v4038_v16, 1 }
0x114b   :  { %v4048_v51 = vadd.f32 %v4047_v24, %v4046_v8 }
0x114c   :  { %v4040_v34 = vadd.f32 %v4039_v12, %v4038_v16 }
0x114d   :  { %v4050_v63 = vmul.f32 0.0017361111, %v4048_v51 }
0x114e   :  { %v4049_v19 = vmul.f32 0.0017361111, %v4040_v34 }
0x114f   :  { %v4052_v45 = vadd.f32 1e-08, %v4050_v63 }
0x1150   :  { %v4051_v0 = vadd.f32 1e-08, %v4049_v19 }
0x1151   :  { %5463 = vrsqrt.f32 %v4052_v45 }
0x1152   :  { %5465 = vrsqrt.f32 %v4051_v0 }
0x115e   :  { %v5464_v5 = vpop.eup %5463 }
0x115f   :  { %v5466_v32 = vpop.eup %5465  ;;  %v4058_v37 = vmul.f32 %v5464_v5, %v4016_v38  ;;  %v4057_v31 = vmul.f32 %v5464_v5, %v4015_v62 }
0x1160   :  { %v4056_v59 = vmul.f32 %v5466_v32, %v4014_v18  ;;  %v4055_v28 = vmul.f32 %v5466_v32, %v4013_v27 }
0x1161   :  { %v4066_v13 = vmul.f32 %v4574_v46, %v4058_v37  ;;  %v4065_v11 = vmul.f32 %v4574_v46, %v4057_v31 }
0x1162   :  { %v4064_v4 = vmul.f32 %v4574_v46, %v4056_v59  ;;  %v4063_v35 = vmul.f32 %v4574_v46, %v4055_v28 }
0x1163   :  { %v4074_v3 = vadd.f32 %v4575_v2, %v4066_v13  ;;  %v4073_v14 = vadd.f32 %v4575_v2, %v4065_v11 }
0x1164   :  { %v4072_v9 = vadd.f32 %v4575_v2, %v4064_v4  ;;  %v4071_v21 = vadd.f32 %v4575_v2, %v4063_v35 }
0x1165   :  { %v4078_v43 = vadd.f32 %v7442_v52, %v4074_v3  ;;  %v4077_v41 = vadd.f32 %v4073_v14, %v7446_v42  ;;  %v4092_v52 = vld [vmem:[%s7617_s13] sm:$0x7] }
0x1166   :  { %v4076_v54 = vadd.f32 %v7444_v60, %v4072_v9  ;;  %v4075_v49 = vadd.f32 %v4071_v21, %v7448_v39  ;;  %v4250_v39 = vld [vmem:[%s7613_s9 + $0x38] sm:$0xff] }
0x1167   :  { %vm4082_vm15 = vcmp.ge.f32.partialorder %v4078_v43, 0.0  ;;  %v4087_v1 = vmul.f32 %v4083_v53, %v4078_v43  ;;  %v4086_v25 = vmul.f32 %v4083_v53, %v4077_v41  ;;  %vm4081_vm6 = vcmp.ge.f32.partialorder %v4077_v41, 0.0 }
0x1168   :  { %vm4080_vm5 = vcmp.ge.f32.partialorder %v4076_v54, 0.0  ;;  %v4085_v38 = vmul.f32 %v4083_v53, %v4076_v54  ;;  %v4084_v62 = vmul.f32 %v4083_v53, %v4075_v49  ;;  %vm4079_vm7 = vcmp.ge.f32.partialorder %v4075_v49, 0.0 }
0x1169   :  { %v4091_v18 = vsel %vm4082_vm15, %v4078_v43, %v4087_v1  ;;  %v4090_v60 = vsel %vm4081_vm6, %v4077_v41, %v4086_v25 }
0x116a   :  { %v4089_v27 = vsel %vm4080_vm5, %v4076_v54, %v4085_v38  ;;  %5342 = vmatpush3.msk.msra.mxu1 %vm1198_vm3, %v4091_v18  ;;  %v4088_v42 = vsel %vm4079_vm7, %v4075_v49, %v4084_v62 }
0x116b   :  { %5335 = vmatpush3.msk.msra.mxu0 %vm1198_vm3, %v4089_v27  ;;  %5343 = vmatprep.subr.mxu1 %v7652_v10  ;;  %vm4397_vm3 = vcmask 256000  }
0x116c   :  { %5336 = vmatprep.subr.mxu0 %v7652_v10  ;;  %5344 = vmatpush3.msra.mxu1 %v4090_v60 }
0x116d   :  { %5337 = vmatpush3.msra.mxu0 %v4088_v42  ;;  %5346 = vmatmul.mubr.msk.f32.vlgmr.msra.gmra.mxu1 %vm4093_vm8, %v4092_v52 }
0x116e   :  { %5339 = vmatmul.mubr.msk.f32.vlgmr.msra.gmra.mxu0 %vm4093_vm8, %v4092_v52  ;;  %5348 = vmatprep.subr.mxu0 %v7652_v10 }
0x116f   :  { %5367 = vmatprep.subr.mxu1 %v7652_v10  ;;  %5349 = vmatpush3.msra.mxu0 %v4250_v39 }
0x1170   :  { %5368 = vmatpush3.msra.mxu1 %v4250_v39  ;;  %5350 = vmatprep.subr.mxu0 %v7652_v10 }
0x1171   :  { %5369 = vmatprep.subr.mxu1 %v7652_v10  ;;  %5351 = vmatpush3.msra.mxu0 %v4249_v47 }
0x1172   :  { %5370 = vmatpush3.msra.mxu1 %v4249_v47  ;;  %5352 = vmatprep.subr.mxu0 %v7652_v10 }
0x1173   :  { %5371 = vmatprep.subr.mxu1 %v7652_v10  ;;  %5353 = vmatpush3.msra.mxu0 %v4248_v17 }
0x1174   :  { %5372 = vmatpush3.msra.mxu1 %v4248_v17  ;;  %5354 = vmatprep.subr.mxu0 %v7652_v10 }
0x1175   :  { %5373 = vmatprep.subr.mxu1 %v7652_v10  ;;  %5355 = vmatpush3.msra.mxu0 %v4247_v33 }
0x1176   :  { %5374 = vmatpush3.msra.mxu1 %v4247_v33  ;;  %5356 = vmatprep.subr.mxu0 %v7652_v10 }
0x1177   :  { %5375 = vmatprep.subr.mxu1 %v7652_v10  ;;  %5357 = vmatpush3.msra.mxu0 %v4246_v57 }
0x1178   :  { %5376 = vmatpush3.msra.mxu1 %v4246_v57  ;;  %5358 = vmatprep.subr.mxu0 %v7652_v10 }
0x1179   :  { %5377 = vmatprep.subr.mxu1 %v7652_v10  ;;  %5359 = vmatpush3.msra.mxu0 %v4245_v7 }
0x117a   :  { %5378 = vmatpush3.msra.mxu1 %v4245_v7  ;;  %5360 = vmatprep.subr.mxu0 %v7652_v10 }
0x117b   :  { %5379 = vmatprep.subr.mxu1 %v7652_v10  ;;  %5361 = vmatpush3.msra.mxu0 %v4244_v36 }
0x117c   :  { %5380 = vmatpush3.msra.mxu1 %v4244_v36  ;;  %5362 = vmatprep.subr.mxu0 %v7652_v10 }
0x117d   :  { %5381 = vmatprep.subr.mxu1 %v7652_v10  ;;  %5364 = vmatprep.mubr.msk.f32.mxu0 %vm5618_vm2, %v7652_v10 }
0x117e   :  { %5383 = vmatprep.mubr.msk.f32.mxu1 %vm5618_vm2, %v7652_v10  ;;  %5363 = vmatpush3.msra.mxu0 %v4243_v55 }
0x117f   :  { %5382 = vmatpush3.msra.mxu1 %v4243_v55 }
0x122d   :  { %v4239_v30 = vpop.f32.mrf.mxu1 }
0x122e   :  { %v4166_v58 = vpop.f32.mrf.mxu0  ;;  %5384 = vmatmul.mubr.msk.f32.vlgmr.msra.gmra.mxu1 %vm2639_vm14, %v4239_v30 }
0x122f   :  { %5365 = vmatmul.mubr.msk.f32.vlgmr.msra.gmra.mxu0 %vm2639_vm14, %v4166_v58  ;;  %v5347_v15 = vpop.f32.mrf.mxu1 }
0x1230   :  { %v5340_v40 = vpop.f32.mrf.mxu0 }
0x12ee   :  { %v4393_v29 = vpop.f32.mrf.mxu1 }
0x12ef   :  { %v4320_v26 = vpop.f32.mrf.mxu0  ;;  %4399 = vst.msk [vmem:[%s7619_s15 + $0x4] sm:$0x7] %vm4397_vm3, %v4393_v29  ;;  %v4407_v10 = vsel %vm4397_vm3, %v4393_v29, 0.0 }
0x12f0   :  { %4398 = vst.msk [vmem:[%s7619_s15] sm:$0x7] %vm4397_vm3, %v4320_v26  ;;  %v4400_v56 = vsel %vm4397_vm3, %v4320_v26, 0.0  ;;  %v4408_v50 = vrot.slane %v4407_v10, 4  ;;  %v5385_v61 = vpop.f32.mrf.mxu1  ;;  %s5579_s15 = scalar_lea.vmem %s4427_s27, 32 }
0x12f1   :  { %v4401_v44 = vrot.slane %v4400_v56, 4  ;;  %v5366_v48 = vpop.f32.mrf.mxu0  ;;  %p5580_p2 = scmp.ne.s32.totalorder %s4427_s27, %s5579_s15  ;;  %p5585_p4 = scmp.lt.s32.totalorder %s5579_s15, %s5579_s15 }
0x12f2   :  { %v4409_v20 = vadd.f32 %v4408_v50, %v4407_v10 }
0x12f3   :  { %v4402_v23 = vadd.f32 %v4401_v44, %v4400_v56  ;;  %p5586_p5 = por %p5585_p4, %p5584_p3 }
0x12f4   :  { %v4410_v22 = vrot.slane %v4409_v20, 2 }
0x12f5   :  { %v4403_v6 = vrot.slane %v4402_v23, 2  ;;  %p5587_p6 = pnand %p5586_p5, %p5580_p2 }
0x12f6   :  { %v4411_v8 = vadd.f32 %v4410_v22, %v4409_v20 }
0x12f7   :  { %v4404_v16 = vadd.f32 %v4403_v6, %v4402_v23 }
0x12f8   :  { %v4412_v24 = vrot.slane %v4411_v8, 1 }
0x12f9   :  { %v4405_v12 = vrot.slane %v4404_v16, 1 }
0x12fa   :  { %v4413_v51 = vadd.f32 %v4412_v24, %v4411_v8 }
0x12fb   :  { %v4406_v34 = vadd.f32 %v4405_v12, %v4404_v16 }
0x12fc   :  { %v4416_v63 = vmul.f32 0.33333334, %v4413_v51 }
0x12fd   :  { %v4415_v19 = vmul.f32 0.33333334, %v4406_v34 }
0x12fe   :  { %4418 = vst.msk [vmem:[#allocation13 + $0x1] sm:$0x1] %vm189_vm1, %v4416_v63 }
0x12ff   :  { %4417 = vst.msk [vmem:[#allocation13] sm:$0x1] %vm189_vm1, %v4415_v19 }
0x1300   :  { %5590 = shalt.err (!%p5587_p6)
}
0x1301   :  { %s5620_s21 = smov 16   ;;  %s5621_s26 = smov 1  }
0x1302   :  { %4432 = dma.vmem_to_hbm [thread:$0]  %s4427_s27, 32, %s7620_s16, [#allocation4], %s5620_s21, %s5620_s21, %s5621_s26  }
0x1303   :  { %5607 = dma.done.wait [#allocation4], 32  }
0x1304   :  { %5608 = vsyncadd [#allocation4], 4294967264 }
0x1305   :  { %4438 = vsyncpa [#allocation3], 1 }
0x1306   :  { %4439 = vsyncpa [#allocation7], 1 }
0x1307   :  { %4440 = vsyncpa [#allocation10], 1 }
0x1308   :  { %4441 = vsyncpa [#allocation4], 1 }
0x1309   :  { %4442 = vsyncpa [#allocation5], 1 }

</bundles_post_ra>
